<compile_context>
chip_gen: v6e
topology: v6e:2x2x1
jax: 0.10.0
libtpu: 0.0.40
codegen_flags: <defaults>
</compile_context>

<pallas_src>
import functools

import jax
import jax.numpy as jnp
from jax import lax
from jax.experimental import pallas as pl
from jax.experimental.pallas import tpu as pltpu


# ----------------------------------------------------------------------------
# Trace-time hardware introspection (safe fallbacks if introspection fails).
# ----------------------------------------------------------------------------
def _vmem_capacity_bytes():
    try:
        return int(pltpu.get_tpu_info().vmem_capacity_bytes)
    except Exception:
        return 128 * 1024 * 1024


def _pick_exp_dtype():
    """bf16 exp on chips with a bf16 EUP (v6e / v7x); f32 on v5e and older."""
    try:
        kind = jax.devices()[0].device_kind.lower()
    except Exception:
        kind = ""
    if ("v6" in kind) or ("v7" in kind):
        return jnp.bfloat16
    return jnp.float32


# ----------------------------------------------------------------------------
# Kernel 1: per-batch fused projections + streamed attention + trans conv.
# ----------------------------------------------------------------------------
def sa_attn_kernel(x_ref, wkv_ref, bkv_ref, wt_ref, bt_ref,
                   y_ref, ysum_ref, ysq_ref,
                   xk_scr, xv_scr, xr_scr, cs_scr,
                   *, c4, tq, exp_dtype):
    n = x_ref.shape[2]
    n_q = n // tq

    def foreach_tile(body):
        # Small static trip count -> unroll at trace time (gives the LLO
        # scheduler cross-iteration visibility); otherwise a real scf.for.
        if n_q <= 4:
            for t in range(n_q):
                body(t)
        else:
            pl.loop(0, n_q)(body)

    def tile_start(t):
        if isinstance(t, int):
            return t * tq
        return pl.multiple_of(t * tq, tq)

    # ---- 1) fused [q/k ; v] projection, tiled along N ----------------------
    def project(t):
        q0 = tile_start(t)
        xb = x_ref[0, :, pl.ds(q0, tq)].astype(jnp.bfloat16)          # (C, tq)
        kv = jnp.dot(wkv_ref[...], xb,
                     preferred_element_type=jnp.float32) + bkv_ref[...]
        xk_scr[:, pl.ds(q0, tq)] = kv[:c4].astype(jnp.bfloat16)       # q/k feats
        xv_scr[:, pl.ds(q0, tq)] = kv[c4:].astype(jnp.bfloat16)       # v feats

    foreach_tile(project)

    xr_scr[...] = jnp.zeros_like(xr_scr)
    cs_scr[...] = jnp.zeros_like(cs_scr)

    # ---- 2) streamed attention over query tiles ----------------------------
    def attend(t):
        q0 = tile_start(t)
        xk_t = xk_scr[:, pl.ds(q0, tq)]                               # (C/4, tq)
        # energy[q, k] = sum_c xk[c, q0+q] * xk[c, k]   (LHS-transposed matmul)
        e = lax.dot_general(xk_t, xk_scr[...],
                            dimension_numbers=(((0,), (0,)), ((), ())),
                            preferred_element_type=jnp.float32)       # (tq, N)
        m = jnp.max(e, axis=-1, keepdims=True)
        p = jnp.exp((e - m).astype(exp_dtype))                        # EUP exp
        rs = jnp.sum(p.astype(jnp.float32), axis=-1, keepdims=True)   # (tq, 1)
        attn = p * pl.reciprocal(rs, approx=True).astype(p.dtype)     # row softmax
        # Column-sum accumulation (for the hoisted re-normalization) in f32.
        cs_scr[...] += jnp.sum(attn.astype(jnp.float32), axis=0, keepdims=True)
        xv_t = xv_scr[:, pl.ds(q0, tq)]                               # (C, tq)
        xr_scr[...] += jnp.dot(xv_t, attn.astype(jnp.bfloat16),
                               preferred_element_type=jnp.float32)

    foreach_tile(attend)

    # ---- 3) exact column re-normalization, trans_conv, BN partial sums -----
    inv_cs = 1.0 / (1e-9 + cs_scr[...])                               # exact (1, N)
    x_r = xr_scr[...] * inv_cs
    d = (x_ref[0] - x_r).astype(jnp.bfloat16)
    y = jnp.dot(wt_ref[...], d, preferred_element_type=jnp.float32) + bt_ref[...]
    # Per-batch partial BatchNorm stats in f32 BEFORE the bf16 writeback.
    ysum_ref[0] = jnp.sum(y, axis=1, keepdims=True)
    ysq_ref[0] = jnp.sum(y * y, axis=1, keepdims=True)
    y_ref[0] = y.astype(y_ref.dtype)                                  # bf16 store


# ----------------------------------------------------------------------------
# Kernel 2: BN (precomputed scale/shift) + ReLU + residual, (B, C, N) layout.
# ----------------------------------------------------------------------------
def bn_relu_res_kernel(x_ref, y_ref, scale_ref, shift_ref, o_ref):
    yn = y_ref[0].astype(jnp.float32) * scale_ref[...] + shift_ref[...]
    o_ref[0] = x_ref[0] + jnp.maximum(yn, 0.0)


# ----------------------------------------------------------------------------
# Wrapper
# ----------------------------------------------------------------------------
def sa_layer(x, params, *, tq=None, tn=None, exp_dtype=None):
    B, C, N = x.shape
    C4 = C // 4
    wqk, wv, bv, wt, bt, gamma, beta = params

    assert C % 32 == 0, "channels must be a multiple of 32"
    assert N % 128 == 0, "N must be lane-aligned (multiple of 128)"

    vmem_cap = _vmem_capacity_bytes()
    if exp_dtype is None:
        exp_dtype = _pick_exp_dtype()
    if tq is None:
        # 64-MiB-VMEM parts (v7x) -> small query tile; 128-MiB parts -> large.
        tq = 128 if vmem_cap <= 80 * 1024 * 1024 else 512
    tq = min(tq, N)
    while N % tq:
        tq //= 2
    assert tq >= 128

    # Fuse shared-q/k and v projections into one (5C/4, C) weight; cast MXU
    # operands to bf16 once in the wrapper (halves weight DMA bytes).
    wkv = jnp.concatenate([wqk, wv], axis=0).astype(jnp.bfloat16)
    bkv = jnp.concatenate([jnp.zeros((C4,), jnp.float32), bv]).reshape(C4 + C, 1)
    wt_bf = wt.astype(jnp.bfloat16)
    bt_c = bt.reshape(C, 1)

    kernel1 = functools.partial(sa_attn_kernel, c4=C4, tq=tq, exp_dtype=exp_dtype)
    vmem_limit = min(int(vmem_cap * 3 // 4), 100 * 1024 * 1024)

    y, ysum, ysq = pl.pallas_call(
        kernel1,
        out_shape=(
            jax.ShapeDtypeStruct((B, C, N), jnp.bfloat16),   # y in bf16
            jax.ShapeDtypeStruct((B, C, 1), jnp.float32),
            jax.ShapeDtypeStruct((B, C, 1), jnp.float32),
        ),
        grid_spec=pltpu.PrefetchScalarGridSpec(
            num_scalar_prefetch=0,
            grid=(B,),
            in_specs=[
                pl.BlockSpec((1, C, N), lambda b: (b, 0, 0)),
                pl.BlockSpec((C4 + C, C), lambda b: (0, 0)),
                pl.BlockSpec((C4 + C, 1), lambda b: (0, 0)),
                pl.BlockSpec((C, C), lambda b: (0, 0)),
                pl.BlockSpec((C, 1), lambda b: (0, 0)),
            ],
            out_specs=(
                pl.BlockSpec((1, C, N), lambda b: (b, 0, 0)),
                pl.BlockSpec((1, C, 1), lambda b: (b, 0, 0)),
                pl.BlockSpec((1, C, 1), lambda b: (b, 0, 0)),
            ),
            scratch_shapes=[
                pltpu.VMEM((C4, N), jnp.bfloat16),   # x_k (shared q/k feats)
                pltpu.VMEM((C, N), jnp.bfloat16),    # x_v
                pltpu.VMEM((C, N), jnp.float32),     # x_r accumulator
                pltpu.VMEM((1, N), jnp.float32),     # attention column sums
            ],
        ),
        compiler_params=pltpu.CompilerParams(
            dimension_semantics=("parallel",),
            vmem_limit_bytes=vmem_limit,
        ),
    )(x, wkv, bkv, wt_bf, bt_c)

    # Combine per-batch partial sums into training-mode (biased) BN statistics.
    # Tiny (C,)-sized math; stays in XLA.  E[y^2]-E[y]^2 in f32 (eps guards it).
    cnt = B * N
    mean = jnp.sum(ysum[:, :, 0], axis=0) / cnt
    ex2 = jnp.sum(ysq[:, :, 0], axis=0) / cnt
    var = ex2 - mean * mean
    inv = jax.lax.rsqrt(var + 1e-5)
    scale = (gamma * inv).reshape(C, 1)
    shift = (beta - mean * gamma * inv).reshape(C, 1)

    # BN + ReLU + residual directly on (B, C, N): no wrapper transposes.
    if tn is None:
        tn = N if N <= 2048 else 2048
    assert N % tn == 0

    out = pl.pallas_call(
        bn_relu_res_kernel,
        out_shape=jax.ShapeDtypeStruct((B, C, N), jnp.float32),
        grid_spec=pltpu.PrefetchScalarGridSpec(
            num_scalar_prefetch=0,
            grid=(B, N // tn),
            in_specs=[
                pl.BlockSpec((1, C, tn), lambda b, n: (b, 0, n)),
                pl.BlockSpec((1, C, tn), lambda b, n: (b, 0, n)),
                pl.BlockSpec((C, 1), lambda b, n: (0, 0)),
                pl.BlockSpec((C, 1), lambda b, n: (0, 0)),
            ],
            out_specs=pl.BlockSpec((1, C, tn), lambda b, n: (b, 0, n)),
        ),
        compiler_params=pltpu.CompilerParams(
            dimension_semantics=("parallel", "parallel"),
        ),
    )(x, y, scale, shift)
    return out


# ----------------------------------------------------------------------------
# Pure-JAX reference (mirrors the PyTorch forward).  Matmul inputs are cast to
# bf16 (f32 accumulation) and the softmax exp uses the same dtype policy as the
# kernel, so the comparison validates structure rather than dtype policy; all
# other math stays f32; training-mode BatchNorm (biased variance), gamma=1 /
# beta=0.
# ----------------------------------------------------------------------------
def sa_layer_ref(x, params, exp_dtype=jnp.float32):
    wqk, wv, bv, wt, bt, gamma, beta = params
    bf = lambda a: a.astype(jnp.bfloat16)
    f32 = jnp.float32
    xk = jnp.einsum('oc,bcn->bon', bf(wqk), bf(x), preferred_element_type=f32)
    xv = jnp.einsum('oc,bcn->bon', bf(wv), bf(x), preferred_element_type=f32) \
        + bv[None, :, None]
    xkb, xvb = bf(xk), bf(xv)
    energy = jnp.einsum('bcq,bck->bqk', xkb, xkb, preferred_element_type=f32)
    m = jnp.max(energy, axis=-1, keepdims=True)
    p = jnp.exp((energy - m).astype(exp_dtype)).astype(f32)
    attn = p / jnp.sum(p, axis=-1, keepdims=True)
    colsum = jnp.sum(attn, axis=1, keepdims=True)             # sum over query dim
    xr = jnp.einsum('bcq,bqk->bck', xvb, bf(attn), preferred_element_type=f32)
    xr = xr / (1e-9 + colsum)
    d = bf(x - xr)
    y = jnp.einsum('oc,bcn->bon', bf(wt), d, preferred_element_type=f32) \
        + bt[None, :, None]
    mean = jnp.mean(y, axis=(0, 2), keepdims=True)
    var = jnp.mean((y - mean) ** 2, axis=(0, 2), keepdims=True)
    yn = (y - mean) * jax.lax.rsqrt(var + 1e-5)
    yn = yn * gamma[None, :, None] + beta[None, :, None]
    return x + jax.nn.relu(yn)


if __name__ == "__main__":
    B, C, N = 2, 128, 256        # lane-aligned N so stores are unmasked/lane-dense
    C4 = C // 4

    key = jax.random.PRNGKey(0)
    k_x, k_qk, k_v, k_bv, k_t, k_bt = jax.random.split(key, 6)

    x = jax.random.normal(k_x, (B, C, N), dtype=jnp.float32)

    # Conv1d kernel-size-1 weights as 2-D mats; q/k share one weight (no bias).
    wqk = jax.random.normal(k_qk, (C4, C), dtype=jnp.float32) * 0.1
    wv = jax.random.normal(k_v, (C, C), dtype=jnp.float32) * 0.2
    bv = jax.random.normal(k_bv, (C,), dtype=jnp.float32) * 0.1
    wt = jax.random.normal(k_t, (C, C), dtype=jnp.float32) * 0.2
    bt = jax.random.normal(k_bt, (C,), dtype=jnp.float32) * 0.1
    gamma = jnp.ones((C,), dtype=jnp.float32)    # BatchNorm1d default init
    beta = jnp.zeros((C,), dtype=jnp.float32)

    params = (wqk, wv, bv, wt, bt, gamma, beta)

    # Same exp-dtype policy for kernel and reference (bf16 on v6e/v7x, f32 on v5e).
    exp_dtype = _pick_exp_dtype()

    # tq=128 so the demo exercises the streamed (multi-tile) attention path.
    fwd = jax.jit(functools.partial(sa_layer, tq=128, exp_dtype=exp_dtype))
    out = jax.block_until_ready(fwd(x, params))

    ref = sa_layer_ref(x, params, exp_dtype=exp_dtype)
    assert out.shape == (B, C, N)
    max_diff = jnp.max(jnp.abs(out - ref))
    assert jnp.allclose(out, ref, atol=2e-2, rtol=2e-2), (
        f"mismatch vs reference, max abs diff {max_diff:.3e}")

    print("KERNEL_OK")
</pallas_src>

<mosaic_0001>
module attributes {stable_mosaic.version = 11 : i64} {
  func.func @bn_relu_res_kernel(%arg0: i32, %arg1: i32, %arg2: memref<1x128x256xf32, #tpu.memory_space<vmem>>, %arg3: memref<1x128x256xbf16, #tpu.memory_space<vmem>>, %arg4: memref<128x1xf32, #tpu.memory_space<vmem>>, %arg5: memref<128x1xf32, #tpu.memory_space<vmem>>, %arg6: memref<1x128x256xf32, #tpu.memory_space<vmem>>) attributes {dimension_semantics = [#tpu.dimension_semantics<parallel>, #tpu.dimension_semantics<parallel>], iteration_bounds = array<i64: 2, 1>, scalar_prefetch = 0 : i64, scratch_operands = 0 : i64, tpu.core_type = #tpu.core_type<tc>, window_params = [{transform_indices = @transform_0, window_bounds = array<i64: 1, 128, 256>}, {transform_indices = @transform_1, window_bounds = array<i64: 1, 128, 256>}, {pipeline_mode = #tpu.pipeline_mode<synchronous>, transform_indices = @transform_2, window_bounds = array<i64: 128, 1>}, {pipeline_mode = #tpu.pipeline_mode<synchronous>, transform_indices = @transform_3, window_bounds = array<i64: 128, 1>}, {transform_indices = @transform_4, window_bounds = array<i64: 1, 128, 256>}]} {
    %c0 = arith.constant 0 : index
    %c0_0 = arith.constant 0 : index
    %c0_1 = arith.constant 0 : index
    %0 = vector.load %arg3[%c0, %c0_0, %c0_1] : memref<1x128x256xbf16, #tpu.memory_space<vmem>>, vector<1x128x256xbf16>
    %1 = vector.shape_cast %0 : vector<1x128x256xbf16> to vector<128x256xbf16>
    %2 = arith.extf %1 : vector<128x256xbf16> to vector<128x256xf32>
    %c0_2 = arith.constant 0 : index
    %c0_3 = arith.constant 0 : index
    %3 = vector.load %arg4[%c0_2, %c0_3] : memref<128x1xf32, #tpu.memory_space<vmem>>, vector<128x1xf32>
    %4 = vector.broadcast %3 : vector<128x1xf32> to vector<128x256xf32>
    %5 = arith.mulf %2, %4 : vector<128x256xf32>
    %c0_4 = arith.constant 0 : index
    %c0_5 = arith.constant 0 : index
    %6 = vector.load %arg5[%c0_4, %c0_5] : memref<128x1xf32, #tpu.memory_space<vmem>>, vector<128x1xf32>
    %7 = vector.broadcast %6 : vector<128x1xf32> to vector<128x256xf32>
    %8 = arith.addf %5, %7 : vector<128x256xf32>
    %c0_6 = arith.constant 0 : index
    %c0_7 = arith.constant 0 : index
    %c0_8 = arith.constant 0 : index
    %9 = vector.load %arg2[%c0_6, %c0_7, %c0_8] : memref<1x128x256xf32, #tpu.memory_space<vmem>>, vector<1x128x256xf32>
    %10 = vector.shape_cast %9 : vector<1x128x256xf32> to vector<128x256xf32>
    %cst = arith.constant 0.000000e+00 : f32
    %11 = vector.broadcast %cst : f32 to vector<128x256xf32>
    %12 = arith.maximumf %8, %11 : vector<128x256xf32>
    %13 = arith.addf %10, %12 : vector<128x256xf32>
    %c0_9 = arith.constant 0 : index
    %c0_10 = arith.constant 0 : index
    %c0_11 = arith.constant 0 : index
    %14 = vector.load %arg6[%c0_9, %c0_10, %c0_11] : memref<1x128x256xf32, #tpu.memory_space<vmem>>, vector<1x128x256xf32>
    %15 = vector.shape_cast %14 : vector<1x128x256xf32> to vector<128x256xf32>
    %16 = vector.shape_cast %13 : vector<128x256xf32> to vector<1x128x256xf32>
    tpu.vector_store %arg6[%c0_9, %c0_10, %c0_11], %16 {strides = array<i32>} : memref<1x128x256xf32, #tpu.memory_space<vmem>>, vector<1x128x256xf32>,
    return
  }
  func.func @transform_0(%arg0: i32, %arg1: i32) -> (i32, i32, i32) {
    %c0_i32 = arith.constant 0 : i32
    %c0_i32_0 = arith.constant 0 : i32
    return %arg0, %c0_i32, %arg1 : i32, i32, i32
  }
  func.func @transform_1(%arg0: i32, %arg1: i32) -> (i32, i32, i32) {
    %c0_i32 = arith.constant 0 : i32
    %c0_i32_0 = arith.constant 0 : i32
    return %arg0, %c0_i32, %arg1 : i32, i32, i32
  }
  func.func @transform_2(%arg0: i32, %arg1: i32) -> (i32, i32) {
    %c0_i32 = arith.constant 0 : i32
    %c0_i32_0 = arith.constant 0 : i32
    %c0_i32_1 = arith.constant 0 : i32
    return %c0_i32, %c0_i32_0 : i32, i32
  }
  func.func @transform_3(%arg0: i32, %arg1: i32) -> (i32, i32) {
    %c0_i32 = arith.constant 0 : i32
    %c0_i32_0 = arith.constant 0 : i32
    %c0_i32_1 = arith.constant 0 : i32
    return %c0_i32, %c0_i32_0 : i32, i32
  }
  func.func @transform_4(%arg0: i32, %arg1: i32) -> (i32, i32, i32) {
    %c0_i32 = arith.constant 0 : i32
    %c0_i32_0 = arith.constant 0 : i32
    return %arg0, %c0_i32, %arg1 : i32, i32, i32
  }
}

module attributes {stable_mosaic.version = 11 : i64} {
  func.func @sa_attn_kernel(%arg0: i32, %arg1: memref<1x128x256xf32, #tpu.memory_space<vmem>>, %arg2: memref<160x128xbf16, #tpu.memory_space<vmem>>, %arg3: memref<160x1xf32, #tpu.memory_space<vmem>>, %arg4: memref<128x128xbf16, #tpu.memory_space<vmem>>, %arg5: memref<128x1xf32, #tpu.memory_space<vmem>>, %arg6: memref<1x128x256xbf16, #tpu.memory_space<vmem>>, %arg7: memref<1x128x1xf32, #tpu.memory_space<vmem>>, %arg8: memref<1x128x1xf32, #tpu.memory_space<vmem>>, %arg9: memref<32x256xbf16, #tpu.memory_space<vmem>>, %arg10: memref<128x256xbf16, #tpu.memory_space<vmem>>, %arg11: memref<128x256xf32, #tpu.memory_space<vmem>>, %arg12: memref<1x256xf32, #tpu.memory_space<vmem>>) attributes {dimension_semantics = [#tpu.dimension_semantics<parallel>], iteration_bounds = array<i64: 2>, scalar_prefetch = 0 : i64, scratch_operands = 4 : i64, tpu.core_type = #tpu.core_type<tc>, window_params = [{transform_indices = @transform_0, window_bounds = array<i64: 1, 128, 256>}, {pipeline_mode = #tpu.pipeline_mode<synchronous>, transform_indices = @transform_1, window_bounds = array<i64: 160, 128>}, {pipeline_mode = #tpu.pipeline_mode<synchronous>, transform_indices = @transform_2, window_bounds = array<i64: 160, 1>}, {pipeline_mode = #tpu.pipeline_mode<synchronous>, transform_indices = @transform_3, window_bounds = array<i64: 128, 128>}, {pipeline_mode = #tpu.pipeline_mode<synchronous>, transform_indices = @transform_4, window_bounds = array<i64: 128, 1>}, {transform_indices = @transform_5, window_bounds = array<i64: 1, 128, 256>}, {transform_indices = @transform_6, window_bounds = array<i64: 1, 128, 1>}, {transform_indices = @transform_7, window_bounds = array<i64: 1, 128, 1>}]} {
    %c0 = arith.constant 0 : index
    %c0_0 = arith.constant 0 : index
    %c0_1 = arith.constant 0 : index
    %0 = vector.load %arg1[%c0, %c0_0, %c0_1] : memref<1x128x256xf32, #tpu.memory_space<vmem>>, vector<1x128x128xf32>
    %1 = vector.shape_cast %0 : vector<1x128x128xf32> to vector<128x128xf32>
    %2 = arith.truncf %1 : vector<128x128xf32> to vector<128x128xbf16>
    %c0_2 = arith.constant 0 : index
    %c0_3 = arith.constant 0 : index
    %3 = vector.load %arg2[%c0_2, %c0_3] : memref<160x128xbf16, #tpu.memory_space<vmem>>, vector<160x128xbf16>
    %cst = arith.constant dense<0.000000e+00> : vector<160x128xf32>
    %4 = tpu.matmul %3, %2, %cst {dimension_numbers = #tpu.dot_dimension_numbers<[1], [0], [0], [1], [0, 0, 1, 1], [], []>} : vector<160x128xbf16>, vector<128x128xbf16>, vector<160x128xf32> -> vector<160x128xf32>
    %c0_4 = arith.constant 0 : index
    %c0_5 = arith.constant 0 : index
    %5 = vector.load %arg3[%c0_4, %c0_5] : memref<160x1xf32, #tpu.memory_space<vmem>>, vector<160x1xf32>
    %6 = vector.broadcast %5 : vector<160x1xf32> to vector<160x128xf32>
    %7 = arith.addf %4, %6 : vector<160x128xf32>
    %8 = vector.extract_strided_slice %7 {offsets = [0, 0], sizes = [32, 128], strides = [1, 1]} : vector<160x128xf32> to vector<32x128xf32>
    %9 = arith.truncf %8 : vector<32x128xf32> to vector<32x128xbf16>
    %c0_6 = arith.constant 0 : index
    %c0_7 = arith.constant 0 : index
    %10 = vector.load %arg9[%c0_6, %c0_7] : memref<32x256xbf16, #tpu.memory_space<vmem>>, vector<32x128xbf16>
    tpu.vector_store %arg9[%c0_6, %c0_7], %9 {strides = array<i32>} : memref<32x256xbf16, #tpu.memory_space<vmem>>, vector<32x128xbf16>,
    %11 = vector.extract_strided_slice %7 {offsets = [32, 0], sizes = [128, 128], strides = [1, 1]} : vector<160x128xf32> to vector<128x128xf32>
    %12 = arith.truncf %11 : vector<128x128xf32> to vector<128x128xbf16>
    %c0_8 = arith.constant 0 : index
    %c0_9 = arith.constant 0 : index
    %13 = vector.load %arg10[%c0_8, %c0_9] : memref<128x256xbf16, #tpu.memory_space<vmem>>, vector<128x128xbf16>
    tpu.vector_store %arg10[%c0_8, %c0_9], %12 {strides = array<i32>} : memref<128x256xbf16, #tpu.memory_space<vmem>>, vector<128x128xbf16>,
    %c0_10 = arith.constant 0 : index
    %c0_11 = arith.constant 0 : index
    %c128 = arith.constant 128 : index
    %14 = vector.load %arg1[%c0_10, %c0_11, %c128] : memref<1x128x256xf32, #tpu.memory_space<vmem>>, vector<1x128x128xf32>
    %15 = vector.shape_cast %14 : vector<1x128x128xf32> to vector<128x128xf32>
    %16 = arith.truncf %15 : vector<128x128xf32> to vector<128x128xbf16>
    %c0_12 = arith.constant 0 : index
    %c0_13 = arith.constant 0 : index
    %17 = vector.load %arg2[%c0_12, %c0_13] : memref<160x128xbf16, #tpu.memory_space<vmem>>, vector<160x128xbf16>
    %cst_14 = arith.constant dense<0.000000e+00> : vector<160x128xf32>
    %18 = tpu.matmul %17, %16, %cst_14 {dimension_numbers = #tpu.dot_dimension_numbers<[1], [0], [0], [1], [0, 0, 1, 1], [], []>} : vector<160x128xbf16>, vector<128x128xbf16>, vector<160x128xf32> -> vector<160x128xf32>
    %c0_15 = arith.constant 0 : index
    %c0_16 = arith.constant 0 : index
    %19 = vector.load %arg3[%c0_15, %c0_16] : memref<160x1xf32, #tpu.memory_space<vmem>>, vector<160x1xf32>
    %20 = vector.broadcast %19 : vector<160x1xf32> to vector<160x128xf32>
    %21 = arith.addf %18, %20 : vector<160x128xf32>
    %22 = vector.extract_strided_slice %21 {offsets = [0, 0], sizes = [32, 128], strides = [1, 1]} : vector<160x128xf32> to vector<32x128xf32>
    %23 = arith.truncf %22 : vector<32x128xf32> to vector<32x128xbf16>
    %c0_17 = arith.constant 0 : index
    %c128_18 = arith.constant 128 : index
    %24 = vector.load %arg9[%c0_17, %c128_18] : memref<32x256xbf16, #tpu.memory_space<vmem>>, vector<32x128xbf16>
    tpu.vector_store %arg9[%c0_17, %c128_18], %23 {strides = array<i32>} : memref<32x256xbf16, #tpu.memory_space<vmem>>, vector<32x128xbf16>,
    %25 = vector.extract_strided_slice %21 {offsets = [32, 0], sizes = [128, 128], strides = [1, 1]} : vector<160x128xf32> to vector<128x128xf32>
    %26 = arith.truncf %25 : vector<128x128xf32> to vector<128x128xbf16>
    %c0_19 = arith.constant 0 : index
    %c128_20 = arith.constant 128 : index
    %27 = vector.load %arg10[%c0_19, %c128_20] : memref<128x256xbf16, #tpu.memory_space<vmem>>, vector<128x128xbf16>
    tpu.vector_store %arg10[%c0_19, %c128_20], %26 {strides = array<i32>} : memref<128x256xbf16, #tpu.memory_space<vmem>>, vector<128x128xbf16>,
    %cst_21 = arith.constant 0.000000e+00 : f32
    %28 = vector.broadcast %cst_21 : f32 to vector<128x256xf32>
    %c0_22 = arith.constant 0 : index
    %c0_23 = arith.constant 0 : index
    %29 = vector.load %arg11[%c0_22, %c0_23] : memref<128x256xf32, #tpu.memory_space<vmem>>, vector<128x256xf32>
    tpu.vector_store %arg11[%c0_22, %c0_23], %28 {strides = array<i32>} : memref<128x256xf32, #tpu.memory_space<vmem>>, vector<128x256xf32>,
    %cst_24 = arith.constant 0.000000e+00 : f32
    %30 = vector.broadcast %cst_24 : f32 to vector<1x256xf32>
    %c0_25 = arith.constant 0 : index
    %c0_26 = arith.constant 0 : index
    %31 = vector.load %arg12[%c0_25, %c0_26] : memref<1x256xf32, #tpu.memory_space<vmem>>, vector<1x256xf32>
    tpu.vector_store %arg12[%c0_25, %c0_26], %30 {strides = array<i32>} : memref<1x256xf32, #tpu.memory_space<vmem>>, vector<1x256xf32>,
    %c0_27 = arith.constant 0 : index
    %c0_28 = arith.constant 0 : index
    %32 = vector.load %arg9[%c0_27, %c0_28] : memref<32x256xbf16, #tpu.memory_space<vmem>>, vector<32x128xbf16>
    %c0_29 = arith.constant 0 : index
    %c0_30 = arith.constant 0 : index
    %33 = vector.load %arg9[%c0_29, %c0_30] : memref<32x256xbf16, #tpu.memory_space<vmem>>, vector<32x256xbf16>
    %cst_31 = arith.constant dense<0.000000e+00> : vector<128x256xf32>
    %34 = tpu.matmul %32, %33, %cst_31 {dimension_numbers = #tpu.dot_dimension_numbers<[0], [0], [1], [1], [0, 1, 1, 1], [], []>} : vector<32x128xbf16>, vector<32x256xbf16>, vector<128x256xf32> -> vector<128x256xf32>
    %cst_32 = arith.constant dense<0xFF800000> : vector<128xf32>
    %35 = vector.multi_reduction <maximumf>, %34, %cst_32 [1] : vector<128x256xf32> to vector<128xf32>
    %36 = vector.shape_cast %35 : vector<128xf32> to vector<128x1xf32>
    %37 = vector.broadcast %36 : vector<128x1xf32> to vector<128x256xf32>
    %38 = arith.subf %34, %37 : vector<128x256xf32>
    %39 = math.exp %38 : vector<128x256xf32>
    %cst_33 = arith.constant dense<0.000000e+00> : vector<128xf32>
    %40 = vector.multi_reduction <add>, %39, %cst_33 [1] : vector<128x256xf32> to vector<128xf32>
    %41 = vector.shape_cast %40 : vector<128xf32> to vector<128x1xf32>
    %42 = tpu.reciprocal %41 {approx = true} : vector<128x1xf32> -> vector<128x1xf32>
    %43 = vector.broadcast %42 : vector<128x1xf32> to vector<128x256xf32>
    %44 = arith.mulf %39, %43 : vector<128x256xf32>
    %c0_34 = arith.constant 0 : index
    %c0_35 = arith.constant 0 : index
    %45 = vector.load %arg12[%c0_34, %c0_35] : memref<1x256xf32, #tpu.memory_space<vmem>>, vector<1x256xf32>
    %cst_36 = arith.constant dense<0.000000e+00> : vector<256xf32>
    %46 = vector.multi_reduction <add>, %44, %cst_36 [0] : vector<128x256xf32> to vector<256xf32>
    %47 = vector.shape_cast %46 : vector<256xf32> to vector<1x256xf32>
    %48 = arith.addf %45, %47 : vector<1x256xf32>
    %c0_37 = arith.constant 0 : index
    %c0_38 = arith.constant 0 : index
    %49 = vector.load %arg12[%c0_37, %c0_38] : memref<1x256xf32, #tpu.memory_space<vmem>>, vector<1x256xf32>
    tpu.vector_store %arg12[%c0_37, %c0_38], %48 {strides = array<i32>} : memref<1x256xf32, #tpu.memory_space<vmem>>, vector<1x256xf32>,
    %c0_39 = arith.constant 0 : index
    %c0_40 = arith.constant 0 : index
    %50 = vector.load %arg10[%c0_39, %c0_40] : memref<128x256xbf16, #tpu.memory_space<vmem>>, vector<128x128xbf16>
    %c0_41 = arith.constant 0 : index
    %c0_42 = arith.constant 0 : index
    %51 = vector.load %arg11[%c0_41, %c0_42] : memref<128x256xf32, #tpu.memory_space<vmem>>, vector<128x256xf32>
    %52 = arith.truncf %44 : vector<128x256xf32> to vector<128x256xbf16>
    %cst_43 = arith.constant dense<0.000000e+00> : vector<128x256xf32>
    %53 = tpu.matmul %50, %52, %cst_43 {dimension_numbers = #tpu.dot_dimension_numbers<[1], [0], [0], [1], [0, 0, 1, 1], [], []>} : vector<128x128xbf16>, vector<128x256xbf16>, vector<128x256xf32> -> vector<128x256xf32>
    %54 = arith.addf %51, %53 : vector<128x256xf32>
    %c0_44 = arith.constant 0 : index
    %c0_45 = arith.constant 0 : index
    %55 = vector.load %arg11[%c0_44, %c0_45] : memref<128x256xf32, #tpu.memory_space<vmem>>, vector<128x256xf32>
    tpu.vector_store %arg11[%c0_44, %c0_45], %54 {strides = array<i32>} : memref<128x256xf32, #tpu.memory_space<vmem>>, vector<128x256xf32>,
    %c0_46 = arith.constant 0 : index
    %c128_47 = arith.constant 128 : index
    %56 = vector.load %arg9[%c0_46, %c128_47] : memref<32x256xbf16, #tpu.memory_space<vmem>>, vector<32x128xbf16>
    %c0_48 = arith.constant 0 : index
    %c0_49 = arith.constant 0 : index
    %57 = vector.load %arg9[%c0_48, %c0_49] : memref<32x256xbf16, #tpu.memory_space<vmem>>, vector<32x256xbf16>
    %cst_50 = arith.constant dense<0.000000e+00> : vector<128x256xf32>
    %58 = tpu.matmul %56, %57, %cst_50 {dimension_numbers = #tpu.dot_dimension_numbers<[0], [0], [1], [1], [0, 1, 1, 1], [], []>} : vector<32x128xbf16>, vector<32x256xbf16>, vector<128x256xf32> -> vector<128x256xf32>
    %cst_51 = arith.constant dense<0xFF800000> : vector<128xf32>
    %59 = vector.multi_reduction <maximumf>, %58, %cst_51 [1] : vector<128x256xf32> to vector<128xf32>
    %60 = vector.shape_cast %59 : vector<128xf32> to vector<128x1xf32>
    %61 = vector.broadcast %60 : vector<128x1xf32> to vector<128x256xf32>
    %62 = arith.subf %58, %61 : vector<128x256xf32>
    %63 = math.exp %62 : vector<128x256xf32>
    %cst_52 = arith.constant dense<0.000000e+00> : vector<128xf32>
    %64 = vector.multi_reduction <add>, %63, %cst_52 [1] : vector<128x256xf32> to vector<128xf32>
    %65 = vector.shape_cast %64 : vector<128xf32> to vector<128x1xf32>
    %66 = tpu.reciprocal %65 {approx = true} : vector<128x1xf32> -> vector<128x1xf32>
    %67 = vector.broadcast %66 : vector<128x1xf32> to vector<128x256xf32>
    %68 = arith.mulf %63, %67 : vector<128x256xf32>
    %c0_53 = arith.constant 0 : index
    %c0_54 = arith.constant 0 : index
    %69 = vector.load %arg12[%c0_53, %c0_54] : memref<1x256xf32, #tpu.memory_space<vmem>>, vector<1x256xf32>
    %cst_55 = arith.constant dense<0.000000e+00> : vector<256xf32>
    %70 = vector.multi_reduction <add>, %68, %cst_55 [0] : vector<128x256xf32> to vector<256xf32>
    %71 = vector.shape_cast %70 : vector<256xf32> to vector<1x256xf32>
    %72 = arith.addf %69, %71 : vector<1x256xf32>
    %c0_56 = arith.constant 0 : index
    %c0_57 = arith.constant 0 : index
    %73 = vector.load %arg12[%c0_56, %c0_57] : memref<1x256xf32, #tpu.memory_space<vmem>>, vector<1x256xf32>
    tpu.vector_store %arg12[%c0_56, %c0_57], %72 {strides = array<i32>} : memref<1x256xf32, #tpu.memory_space<vmem>>, vector<1x256xf32>,
    %c0_58 = arith.constant 0 : index
    %c128_59 = arith.constant 128 : index
    %74 = vector.load %arg10[%c0_58, %c128_59] : memref<128x256xbf16, #tpu.memory_space<vmem>>, vector<128x128xbf16>
    %c0_60 = arith.constant 0 : index
    %c0_61 = arith.constant 0 : index
    %75 = vector.load %arg11[%c0_60, %c0_61] : memref<128x256xf32, #tpu.memory_space<vmem>>, vector<128x256xf32>
    %76 = arith.truncf %68 : vector<128x256xf32> to vector<128x256xbf16>
    %cst_62 = arith.constant dense<0.000000e+00> : vector<128x256xf32>
    %77 = tpu.matmul %74, %76, %cst_62 {dimension_numbers = #tpu.dot_dimension_numbers<[1], [0], [0], [1], [0, 0, 1, 1], [], []>} : vector<128x128xbf16>, vector<128x256xbf16>, vector<128x256xf32> -> vector<128x256xf32>
    %78 = arith.addf %75, %77 : vector<128x256xf32>
    %c0_63 = arith.constant 0 : index
    %c0_64 = arith.constant 0 : index
    %79 = vector.load %arg11[%c0_63, %c0_64] : memref<128x256xf32, #tpu.memory_space<vmem>>, vector<128x256xf32>
    tpu.vector_store %arg11[%c0_63, %c0_64], %78 {strides = array<i32>} : memref<128x256xf32, #tpu.memory_space<vmem>>, vector<128x256xf32>,
    %c0_65 = arith.constant 0 : index
    %c0_66 = arith.constant 0 : index
    %80 = vector.load %arg12[%c0_65, %c0_66] : memref<1x256xf32, #tpu.memory_space<vmem>>, vector<1x256xf32>
    %cst_67 = arith.constant 9.99999971E-10 : f32
    %81 = vector.broadcast %cst_67 : f32 to vector<1x256xf32>
    %82 = arith.addf %81, %80 : vector<1x256xf32>
    %cst_68 = arith.constant 1.000000e+00 : f32
    %83 = vector.broadcast %cst_68 : f32 to vector<1x256xf32>
    %84 = arith.divf %83, %82 : vector<1x256xf32>
    %c0_69 = arith.constant 0 : index
    %c0_70 = arith.constant 0 : index
    %85 = vector.load %arg11[%c0_69, %c0_70] : memref<128x256xf32, #tpu.memory_space<vmem>>, vector<128x256xf32>
    %86 = vector.broadcast %84 : vector<1x256xf32> to vector<128x256xf32>
    %87 = arith.mulf %85, %86 : vector<128x256xf32>
    %c0_71 = arith.constant 0 : index
    %c0_72 = arith.constant 0 : index
    %c0_73 = arith.constant 0 : index
    %88 = vector.load %arg1[%c0_71, %c0_72, %c0_73] : memref<1x128x256xf32, #tpu.memory_space<vmem>>, vector<1x128x256xf32>
    %89 = vector.shape_cast %88 : vector<1x128x256xf32> to vector<128x256xf32>
    %90 = arith.subf %89, %87 : vector<128x256xf32>
    %91 = arith.truncf %90 : vector<128x256xf32> to vector<128x256xbf16>
    %c0_74 = arith.constant 0 : index
    %c0_75 = arith.constant 0 : index
    %92 = vector.load %arg4[%c0_74, %c0_75] : memref<128x128xbf16, #tpu.memory_space<vmem>>, vector<128x128xbf16>
    %cst_76 = arith.constant dense<0.000000e+00> : vector<128x256xf32>
    %93 = tpu.matmul %92, %91, %cst_76 {dimension_numbers = #tpu.dot_dimension_numbers<[1], [0], [0], [1], [0, 0, 1, 1], [], []>} : vector<128x128xbf16>, vector<128x256xbf16>, vector<128x256xf32> -> vector<128x256xf32>
    %c0_77 = arith.constant 0 : index
    %c0_78 = arith.constant 0 : index
    %94 = vector.load %arg5[%c0_77, %c0_78] : memref<128x1xf32, #tpu.memory_space<vmem>>, vector<128x1xf32>
    %95 = vector.broadcast %94 : vector<128x1xf32> to vector<128x256xf32>
    %96 = arith.addf %93, %95 : vector<128x256xf32>
    %cst_79 = arith.constant dense<0.000000e+00> : vector<128xf32>
    %97 = vector.multi_reduction <add>, %96, %cst_79 [1] : vector<128x256xf32> to vector<128xf32>
    %98 = vector.shape_cast %97 : vector<128xf32> to vector<128x1xf32>
    %c0_80 = arith.constant 0 : index
    %c0_81 = arith.constant 0 : index
    %c0_82 = arith.constant 0 : index
    %99 = vector.load %arg7[%c0_80, %c0_81, %c0_82] : memref<1x128x1xf32, #tpu.memory_space<vmem>>, vector<1x128x1xf32>
    %100 = vector.shape_cast %99 : vector<1x128x1xf32> to vector<128x1xf32>
    %101 = vector.shape_cast %98 : vector<128x1xf32> to vector<1x128x1xf32>
    tpu.vector_store %arg7[%c0_80, %c0_81, %c0_82], %101 {strides = array<i32>} : memref<1x128x1xf32, #tpu.memory_space<vmem>>, vector<1x128x1xf32>,
    %102 = arith.mulf %96, %96 : vector<128x256xf32>
    %cst_83 = arith.constant dense<0.000000e+00> : vector<128xf32>
    %103 = vector.multi_reduction <add>, %102, %cst_83 [1] : vector<128x256xf32> to vector<128xf32>
    %104 = vector.shape_cast %103 : vector<128xf32> to vector<128x1xf32>
    %c0_84 = arith.constant 0 : index
    %c0_85 = arith.constant 0 : index
    %c0_86 = arith.constant 0 : index
    %105 = vector.load %arg8[%c0_84, %c0_85, %c0_86] : memref<1x128x1xf32, #tpu.memory_space<vmem>>, vector<1x128x1xf32>
    %106 = vector.shape_cast %105 : vector<1x128x1xf32> to vector<128x1xf32>
    %107 = vector.shape_cast %104 : vector<128x1xf32> to vector<1x128x1xf32>
    tpu.vector_store %arg8[%c0_84, %c0_85, %c0_86], %107 {strides = array<i32>} : memref<1x128x1xf32, #tpu.memory_space<vmem>>, vector<1x128x1xf32>,
    %108 = arith.truncf %96 : vector<128x256xf32> to vector<128x256xbf16>
    %c0_87 = arith.constant 0 : index
    %c0_88 = arith.constant 0 : index
    %c0_89 = arith.constant 0 : index
    %109 = vector.load %arg6[%c0_87, %c0_88, %c0_89] : memref<1x128x256xbf16, #tpu.memory_space<vmem>>, vector<1x128x256xbf16>
    %110 = vector.shape_cast %109 : vector<1x128x256xbf16> to vector<128x256xbf16>
    %111 = vector.shape_cast %108 : vector<128x256xbf16> to vector<1x128x256xbf16>
    tpu.vector_store %arg6[%c0_87, %c0_88, %c0_89], %111 {strides = array<i32>} : memref<1x128x256xbf16, #tpu.memory_space<vmem>>, vector<1x128x256xbf16>,
    return
  }
  func.func @transform_0(%arg0: i32) -> (i32, i32, i32) {
    %c0_i32 = arith.constant 0 : i32
    %c0_i32_0 = arith.constant 0 : i32
    %c0_i32_1 = arith.constant 0 : i32
    return %arg0, %c0_i32, %c0_i32_0 : i32, i32, i32
  }
  func.func @transform_1(%arg0: i32) -> (i32, i32) {
    %c0_i32 = arith.constant 0 : i32
    %c0_i32_0 = arith.constant 0 : i32
    %c0_i32_1 = arith.constant 0 : i32
    return %c0_i32, %c0_i32_0 : i32, i32
  }
  func.func @transform_2(%arg0: i32) -> (i32, i32) {
    %c0_i32 = arith.constant 0 : i32
    %c0_i32_0 = arith.constant 0 : i32
    %c0_i32_1 = arith.constant 0 : i32
    return %c0_i32, %c0_i32_0 : i32, i32
  }
  func.func @transform_3(%arg0: i32) -> (i32, i32) {
    %c0_i32 = arith.constant 0 : i32
    %c0_i32_0 = arith.constant 0 : i32
    %c0_i32_1 = arith.constant 0 : i32
    return %c0_i32, %c0_i32_0 : i32, i32
  }
  func.func @transform_4(%arg0: i32) -> (i32, i32) {
    %c0_i32 = arith.constant 0 : i32
    %c0_i32_0 = arith.constant 0 : i32
    %c0_i32_1 = arith.constant 0 : i32
    return %c0_i32, %c0_i32_0 : i32, i32
  }
  func.func @transform_5(%arg0: i32) -> (i32, i32, i32) {
    %c0_i32 = arith.constant 0 : i32
    %c0_i32_0 = arith.constant 0 : i32
    %c0_i32_1 = arith.constant 0 : i32
    return %arg0, %c0_i32, %c0_i32_0 : i32, i32, i32
  }
  func.func @transform_6(%arg0: i32) -> (i32, i32, i32) {
    %c0_i32 = arith.constant 0 : i32
    %c0_i32_0 = arith.constant 0 : i32
    %c0_i32_1 = arith.constant 0 : i32
    return %arg0, %c0_i32, %c0_i32_0 : i32, i32, i32
  }
  func.func @transform_7(%arg0: i32) -> (i32, i32, i32) {
    %c0_i32 = arith.constant 0 : i32
    %c0_i32_0 = arith.constant 0 : i32
    %c0_i32_1 = arith.constant 0 : i32
    return %arg0, %c0_i32, %c0_i32_0 : i32, i32, i32
  }
}

</mosaic_0001>

<bundles_post_ra>
// kernel: sa_layer.3
= control target key start
LH: loop header
LB: loop body
LE: loop exit
PB: predicated region body
PF: predicated region fallthrough
CT: control target
= control target key end

     0   :  { %9 = vsyncpa [#allocation3], 0  ;;  %s1468_s0 = inlined_call_operand.vmem [shape: f32[2,128,256], index: 0, kind: input, shape index: {}]   ;;  %s1469_s1 = inlined_call_operand.vmem [shape: bf16[2,128,256], index: 1, kind: input, shape index: {}]   ;;  %s1470_s2 = inlined_call_operand.vmem [shape: f32[128,1], index: 2, kind: input, shape index: {}]   ;;  %s1471_s3 = inlined_call_operand.vmem [shape: f32[128,1], index: 3, kind: input, shape index: {}]   ;;  %s1472_s4 = inlined_call_operand.hbm [shape: f32[2,128,256], index: 4, kind: output, shape index: {}]  }
   0x1   :  { %11 = vsyncpa [#allocation3 + $0x1], 0  ;;  %s993_s15 = smov 0   ;;  %s995_s16 = smov 0  }
   0x2   :  { %s997_s17 = smov 0   ;;  %s999_s18 = smov 0  }
   0x3   :  { %s1001_s19 = smov 0   ;;  %s1003_s20 = smov 0  }
   0x4 LB: > { %s808_s21 = sadd.s32 4294967295, %s962_s20   ;;  %s809_s22 = sadd.s32 4294967294, %s962_s20   ;;  %s962_s20 = sphi %s1003_s20, %s17_s20   ;;  %s958_s19 = sphi %s1001_s19, %s1491_s19   ;;  %s954_s18 = sphi %s999_s18, %s1490_s18   ;;  %s950_s17 = sphi %s997_s17, %s1489_s17   ;;  %s946_s16 = sphi %s995_s16, %s1488_s16   ;;  %s942_s15 = sphi %s993_s15, %s1487_s15  }
   0x5   : > { %s29_s23 = sadd.s32 1, %s958_s19  ;;  %s136_s24 = sadd.s32 1, %s950_s17 }
   0x6   : > { %p31_p0 = scmp.ge.s32.totalorder %s29_s23, 2  ;;  %p146_p1 = scmp.ne.s32.totalorder %s950_s17, %s946_s16 }
   0x7   : > { %p147_p2 = scmp.eq.s32.totalorder %s808_s21, 1  ;;  %p152_p3 = scmp.ne.s32.totalorder %s946_s16, %s942_s15 }
   0x8   : > { %s1493_s23 = smov (%p31_p0, %s29_s23), 0  ;;  %p153_p5 = scmp.eq.s32.totalorder %s809_s22, 1 }
   0x9   : > { %p1033_p4 = por %p147_p2, %p146_p1  ;;  %s131_s26 = ssub.s32 %s958_s19, %s1493_s23 }
   0xa   : > { %p812_p6 = scmp.ge.s32.totalorder %s962_s20, 1  ;;  %p134_p7 = scmp.eq.s32.totalorder %s131_s26, 0 }
   0xb   : > { %p1040_p8 = por %p153_p5, %p152_p3  ;;  %p203_p9 = scmp.lt.s32.totalorder %s962_s20, 3 }
   0xc   : > { %s1046_s28 = scalar_select %p134_p7, %s950_s17, %s136_s24  }
   0xd   : > { %p204_p10 = pnand %p812_p6, %p203_p9 }
   0xe   : > { %p243_p11 = scmp.lt.s32.totalorder (!%p204_p10), %s954_s18, 1  ;;  %s239_s9 = sand.u32 (!%p204_p10), 1, %s946_s16  }
   0xf   : > { %207 = sbr.rel (%p204_p10) target bundleno = 231 (0xe7), region = 36  ;;  %s1259_s13 = sshll.u32 (!%p204_p10), %s239_s9, 8 }
  0x10   : > { %s1291_s14 = scalar_lea.vmem (!%p204_p10), [#allocation2], %s1259_s13  ;;  %s825_s21 = sshll.u32 (!%p204_p10), %s954_s18, 12 }
  0x11   : > { %s711_s22 = sshll.u32 (!%p204_p10), %s1291_s14, 4  ;;  %s1413_s26 = scalar_lea.hbm (!%p204_p10), %s1472_s4, %s825_s21  ;;  %s1415_s22 = int_to_ptr.vmem [resolvable:$true] %s711_s22 }
  0x12   : > { %s965_s5 = smov (!%p204_p10), [#allocation2]  }
  0x13   : > { %s890_s6 = sshll.u32 (!%p204_p10), %s965_s5, 4  ;;  %s891_s6 = int_to_ptr.vmem [resolvable:$false] %s890_s6 }
  0x14   : > { %v313_v0 = vld [vmem:[%s1470_s2 + $0x10] sm:$0xff]  ;;  %v311_v1 = vld [vmem:[%s1470_s2] sm:$0xff]  ;;  %v964_v2 = vmov 0   ;;  %v314_v3 = vld [vmem:[%s1470_s2 + $0x18] sm:$0xff]  ;;  %s1154_s29 = scalar_select %p243_p11, %s954_s18, 1 }
  0x15   : > { %885 = vset.pattern.permute.xlu1 %v964_v2  ;;  %884 = vset.pattern.permute.xlu0 %v964_v2  ;;  %v312_v4 = vld [vmem:[%s1470_s2 + $0x8] sm:$0xff]  ;;  %v315_v6 = vld [vmem:[%s1470_s2 + $0x20] sm:$0xff]  ;;  %v318_v7 = vld [vmem:[%s1470_s2 + $0x38] sm:$0xff]  ;;  %p893_p1 = scmp.lt.s32.totalorder %s1415_s22, %s891_s6 }
  0x16   : > { %339 = vperm.xlu1 %885, %v313_v0   ;;  %329 = vperm.xlu0 %884, %v311_v1   ;;  %v316_v5 = vld [vmem:[%s1470_s2 + $0x28] sm:$0xff]  ;;  %v317_v8 = vld [vmem:[%s1470_s2 + $0x30] sm:$0xff]  ;;  %v319_v10 = vld [vmem:[%s1470_s2 + $0x40] sm:$0xff]  ;;  %s824_s30 = sshll.u32 %s1154_s29, 7  ;;  %s823_s8 = sshll.u32 %s1154_s29, 8 }
  0x17   : > { %v320_v9 = vld [vmem:[%s1470_s2 + $0x48] sm:$0xff]  ;;  %v322_v11 = vld [vmem:[%s1470_s2 + $0x58] sm:$0xff]  ;;  %v321_v12 = vld [vmem:[%s1470_s2 + $0x50] sm:$0xff]  ;;  %s1168_s7 = scalar_lea.vmem %s1469_s1, %s824_s30  ;;  %s1245_s12 = scalar_lea.vmem %s1468_s0, %s823_s8 }
  0x18   : > { %v324_v13 = vld [vmem:[%s1470_s2 + $0x68] sm:$0xff]  ;;  %v323_v14 = vld [vmem:[%s1470_s2 + $0x60] sm:$0xff]  ;;  %v326_v15 = vld [vmem:[%s1470_s2 + $0x78] sm:$0xff]  ;;  %s1423_s29 = scalar_lea.sflag [#allocation3], %s239_s9  ;;  %s886_s30 = scalar_lea.vmem %s1415_s22, 4096 }
  0x19   : > { %v325_v16 = vld [vmem:[%s1470_s2 + $0x70] sm:$0xff]  ;;  %v440_v17 = vld [vmem:[%s1471_s3 + $0x8] sm:$0xff]  ;;  %v439_v18 = vld [vmem:[%s1471_s3] sm:$0xff]  ;;  %p887_p12 = scmp.ne.s32.totalorder %s1415_s22, %s886_s30 }
  0x1a   : > { %344 = vperm.xlu1 %885, %v314_v3   ;;  %334 = vperm.xlu0 %884, %v312_v4   ;;  %v442_v19 = vld [vmem:[%s1471_s3 + $0x18] sm:$0xff]  ;;  %v441_v20 = vld [vmem:[%s1471_s3 + $0x10] sm:$0xff]  ;;  %v444_v21 = vld [vmem:[%s1471_s3 + $0x28] sm:$0xff] }
  0x1b   : > { %v443_v22 = vld [vmem:[%s1471_s3 + $0x20] sm:$0xff]  ;;  %v446_v23 = vld [vmem:[%s1471_s3 + $0x38] sm:$0xff]  ;;  %v445_v24 = vld [vmem:[%s1471_s3 + $0x30] sm:$0xff]  ;;  %p888_p13 = pnand %p887_p12, %p1033_p4 }
  0x1c   : > { %v448_v25 = vld [vmem:[%s1471_s3 + $0x48] sm:$0xff]  ;;  %v447_v26 = vld [vmem:[%s1471_s3 + $0x40] sm:$0xff]  ;;  %v450_v27 = vld [vmem:[%s1471_s3 + $0x58] sm:$0xff] }
  0x1d   : > { %v449_v28 = vld [vmem:[%s1471_s3 + $0x50] sm:$0xff]  ;;  %v452_v29 = vld [vmem:[%s1471_s3 + $0x68] sm:$0xff]  ;;  %v451_v30 = vld [vmem:[%s1471_s3 + $0x60] sm:$0xff]  ;;  %p889_p0 = pneg %p888_p13 }
  0x1e   : > { %354 = vperm.xlu1 %885, %v316_v5   ;;  %349 = vperm.xlu0 %884, %v315_v6   ;;  %v454_v31 = vld [vmem:[%s1471_s3 + $0x78] sm:$0xff]  ;;  %v453_v32 = vld [vmem:[%s1471_s3 + $0x70] sm:$0xff]  ;;  %v263_v46 = vld [vmem:[%s1168_s7] sm:$0xff] }
  0x1f   : > { %v1175_v45 = vld [vmem:[%s1168_s7 + $0x10] sm:$0xff]  ;;  %v1179_v47 = vld [vmem:[%s1168_s7 + $0x18] sm:$0xff]  ;;  %v264_v48 = vld [vmem:[%s1168_s7 + $0x8] sm:$0xff]  ;;  %v279_v55 = vunpack.c.l.bf16 %v263_v46  ;;  %v280_v56 = vunpack.c.h.bf16 %v263_v46 }
  0x20   : > { %v1183_v49 = vld [vmem:[%s1168_s7 + $0x28] sm:$0xff]  ;;  %v1186_v50 = vld [vmem:[%s1168_s7 + $0x20] sm:$0xff]  ;;  %v283_v53 = vunpack.c.l.bf16 %v1175_v45  ;;  %v284_v54 = vunpack.c.h.bf16 %v1175_v45  ;;  %v1195_v57 = vld [vmem:[%s1168_s7 + $0x38] sm:$0xff]  ;;  %v285_v59 = vunpack.c.l.bf16 %v1179_v47  ;;  %v286_v60 = vunpack.c.h.bf16 %v1179_v47 }
  0x21   : > { %v1198_v58 = vld [vmem:[%s1168_s7 + $0x30] sm:$0xff]  ;;  %v281_v61 = vunpack.c.l.bf16 %v264_v48  ;;  %v282_v62 = vunpack.c.h.bf16 %v264_v48  ;;  %v1203_v63 = vld [vmem:[%s1168_s7 + $0x48] sm:$0xff]  ;;  %v1206_v0 = vld [vmem:[%s1168_s7 + $0x40] sm:$0xff]  ;;  %v289_v1 = vunpack.c.l.bf16 %v1183_v49  ;;  %v290_v2 = vunpack.c.h.bf16 %v1183_v49 }
  0x22   : > { %364 = vperm.xlu1 %885, %v318_v7   ;;  %359 = vperm.xlu0 %884, %v317_v8   ;;  %v287_v3 = vunpack.c.l.bf16 %v1186_v50  ;;  %v288_v4 = vunpack.c.h.bf16 %v1186_v50  ;;  %v1213_v5 = vld [vmem:[%s1168_s7 + $0x58] sm:$0xff]  ;;  %v1216_v6 = vld [vmem:[%s1168_s7 + $0x50] sm:$0xff]  ;;  %v293_v7 = vunpack.c.l.bf16 %v1195_v57  ;;  %v294_v8 = vunpack.c.h.bf16 %v1195_v57  ;;  %v571_v49 = vld [vmem:[%s1245_s12 + $0x20] sm:$0xff] }
  0x23   : > { %v569_v48 = vld [vmem:[%s1245_s12 + $0x10] sm:$0xff] }
  0x26   : > { %374 = vperm.xlu1 %885, %v320_v9   ;;  %369 = vperm.xlu0 %884, %v319_v10   ;;  %v291_v9 = vunpack.c.l.bf16 %v1198_v58  ;;  %v292_v10 = vunpack.c.h.bf16 %v1198_v58 }
  0x2a   : > { %384 = vperm.xlu1 %885, %v322_v11   ;;  %379 = vperm.xlu0 %884, %v321_v12  }
  0x2e   : > { %394 = vperm.xlu1 %885, %v324_v13   ;;  %389 = vperm.xlu0 %884, %v323_v14   ;;  %v297_v13 = vunpack.c.l.bf16 %v1203_v63  ;;  %v298_v14 = vunpack.c.h.bf16 %v1203_v63 }
  0x32   : > { %404 = vperm.xlu1 %885, %v326_v15   ;;  %399 = vperm.xlu0 %884, %v325_v16   ;;  %v295_v15 = vunpack.c.l.bf16 %v1206_v0  ;;  %v296_v16 = vunpack.c.h.bf16 %v1206_v0 }
  0x36   : > { %462 = vperm.xlu1 %885, %v440_v17   ;;  %457 = vperm.xlu0 %884, %v439_v18   ;;  %v1232_v17 = vld [vmem:[%s1168_s7 + $0x68] sm:$0xff]  ;;  %v1235_v18 = vld [vmem:[%s1168_s7 + $0x60] sm:$0xff] }
  0x3a   : > { %472 = vperm.xlu1 %885, %v442_v19   ;;  %467 = vperm.xlu0 %884, %v441_v20  }
  0x3e   : > { %482 = vperm.xlu1 %885, %v444_v21   ;;  %477 = vperm.xlu0 %884, %v443_v22   ;;  %v568_v22 = vld [vmem:[%s1245_s12 + $0x8] sm:$0xff] }
  0x42   : > { %492 = vperm.xlu1 %885, %v446_v23   ;;  %487 = vperm.xlu0 %884, %v445_v24  }
  0x46   : > { %502 = vperm.xlu1 %885, %v448_v25   ;;  %497 = vperm.xlu0 %884, %v447_v26  }
  0x4a   : > { %512 = vperm.xlu1 %885, %v450_v27   ;;  %507 = vperm.xlu0 %884, %v449_v28   ;;  %v1248_v27 = vld [vmem:[%s1168_s7 + $0x78] sm:$0xff]  ;;  %v1251_v28 = vld [vmem:[%s1168_s7 + $0x70] sm:$0xff]  ;;  %s892_s7 = scalar_lea.vmem %s891_s6, 8192 }
  0x4b   : > { %p894_p2 = scmp.lt.s32.totalorder %s892_s7, %s886_s30 }
  0x4d   : > { %p895_p3 = por %p894_p2, %p893_p1 }
  0x4e   : > { %522 = vperm.xlu1 %885, %v452_v29   ;;  %517 = vperm.xlu0 %884, %v451_v30   ;;  %v570_v29 = vld [vmem:[%s1245_s12 + $0x18] sm:$0xff] }
  0x4f   : > { %p896_p5 = pnand %p895_p3, %p889_p0 }
  0x52   : > { %532 = vperm.xlu1 %885, %v454_v31   ;;  %527 = vperm.xlu0 %884, %v453_v32   ;;  %v567_v32 = vld [vmem:[%s1245_s12] sm:$0xff] }
  0x91   : > { %v1144_v33 = vpop.permute.xlu1 %339  ;;  %v330_v34 = vpop.permute.xlu0 %329 }
  0x92   : > { %v407_v23 = vmul.f32 %v330_v34, %v279_v55  ;;  %v408_v24 = vmul.f32 %v330_v34, %v280_v56 }
  0x95   : > { %v1146_v35 = vpop.permute.xlu1 %344  ;;  %v335_v36 = vpop.permute.xlu0 %334 }
  0x96   : > { %v409_v25 = vmul.f32 %v335_v36, %v281_v61  ;;  %v410_v26 = vmul.f32 %v335_v36, %v282_v62  ;;  %v573_v62 = vld [vmem:[%s1245_s12 + $0x30] sm:$0xff] }
  0x99   : > { %v1149_v37 = vpop.permute.xlu1 %354  ;;  %v1151_v38 = vpop.permute.xlu0 %349 }
  0x9d   : > { %v1156_v39 = vpop.permute.xlu1 %364  ;;  %v1158_v40 = vpop.permute.xlu0 %359 }
  0xa1   : > { %v1161_v41 = vpop.permute.xlu1 %374  ;;  %v1163_v42 = vpop.permute.xlu0 %369 }
  0xa5   : > { %v1170_v43 = vpop.permute.xlu1 %384  ;;  %v1172_v44 = vpop.permute.xlu0 %379 }
  0xa9   : > { %v1188_v51 = vpop.permute.xlu1 %394  ;;  %v1190_v52 = vpop.permute.xlu0 %389 }
  0xad   : > { %v1223_v11 = vpop.permute.xlu1 %404  ;;  %v1225_v12 = vpop.permute.xlu0 %399 }
  0xb1   : > { %v463_v46 = vpop.permute.xlu1 %462  ;;  %v458_v47 = vpop.permute.xlu0 %457 }
  0xb2   : > { %v537_v34 = vadd.f32 %v463_v46, %v409_v25  ;;  %v538_v36 = vadd.f32 %v463_v46, %v410_v26  ;;  %v535_v55 = vadd.f32 %v458_v47, %v407_v23  ;;  %v536_v56 = vadd.f32 %v458_v47, %v408_v24 }
  0xb3   : > { %v411_v23 = vmul.f32 %v1144_v33, %v283_v53  ;;  %v412_v24 = vmul.f32 %v1144_v33, %v284_v54  ;;  %v413_v26 = vmul.f32 %v1146_v35, %v285_v59  ;;  %v414_v46 = vmul.f32 %v1146_v35, %v286_v60  ;;  %v572_v60 = vld [vmem:[%s1245_s12 + $0x28] sm:$0xff] }
  0xb4   : > { %v601_v21 = vmax.f32 %v537_v34, 0.0  ;;  %v602_v20 = vmax.f32 %v538_v36, 0.0  ;;  %v599_v19 = vmax.f32 %v535_v55, 0.0  ;;  %v600_v25 = vmax.f32 %v536_v56, 0.0 }
  0xb5   : > { %v473_v47 = vpop.permute.xlu1 %472  ;;  %v468_v31 = vpop.permute.xlu0 %467  ;;  %v417_v33 = vmul.f32 %v1149_v37, %v289_v1  ;;  %v418_v35 = vmul.f32 %v1149_v37, %v290_v2  ;;  %v415_v54 = vmul.f32 %v1151_v38, %v287_v3  ;;  %v416_v59 = vmul.f32 %v1151_v38, %v288_v4  ;;  %v574_v37 = vld [vmem:[%s1245_s12 + $0x38] sm:$0xff] }
  0xb6   : > { %v633_v34 = vadd.f32 %v601_v21, %v569_v48  ;;  %v634_v30 = vadd.f32 %v602_v20, %v570_v29  ;;  %v631_v36 = vadd.f32 %v599_v19, %v567_v32  ;;  %v632_v55 = vadd.f32 %v600_v25, %v568_v22  ;;  %v577_v21 = vld [vmem:[%s1245_s12 + $0x50] sm:$0xff]  ;;  %v578_v25 = vld [vmem:[%s1245_s12 + $0x58] sm:$0xff] }
  0xb7   : > { %v541_v56 = vadd.f32 %v473_v47, %v413_v26  ;;  %v542_v53 = vadd.f32 %v473_v47, %v414_v46  ;;  %v539_v45 = vadd.f32 %v468_v31, %v411_v23  ;;  %v540_v61 = vadd.f32 %v468_v31, %v412_v24  ;;  %v575_v23 = vld [vmem:[%s1245_s12 + $0x40] sm:$0xff]  ;;  %v576_v24 = vld [vmem:[%s1245_s12 + $0x48] sm:$0xff] }
  0xb8   : > { %665 = vst [vmem:[%s1291_s14 + $0x10] sm:$0xff] %v633_v34  ;;  %666 = vst [vmem:[%s1291_s14 + $0x18] sm:$0xff] %v634_v30  ;;  %v421_v34 = vmul.f32 %v1156_v39, %v293_v7 }
  0xb9   : > { %663 = vst [vmem:[%s1291_s14] sm:$0xff] %v631_v36  ;;  %664 = vst [vmem:[%s1291_s14 + $0x8] sm:$0xff] %v632_v55  ;;  %v605_v1 = vmax.f32 %v541_v56, 0.0  ;;  %v606_v50 = vmax.f32 %v542_v53, 0.0  ;;  %v603_v38 = vmax.f32 %v539_v45, 0.0  ;;  %v604_v2 = vmax.f32 %v540_v61, 0.0  ;;  %v483_v3 = vpop.permute.xlu1 %482  ;;  %v478_v4 = vpop.permute.xlu0 %477 }
  0xba   : > { %v545_v19 = vadd.f32 %v483_v3, %v417_v33  ;;  %v546_v20 = vadd.f32 %v483_v3, %v418_v35  ;;  %v543_v22 = vadd.f32 %v478_v4, %v415_v54  ;;  %v544_v29 = vadd.f32 %v478_v4, %v416_v59 }
  0xbb   : > { %v637_v30 = vadd.f32 %v605_v1, %v573_v62  ;;  %v638_v31 = vadd.f32 %v606_v50, %v574_v37  ;;  %v635_v32 = vadd.f32 %v603_v38, %v571_v49  ;;  %v636_v48 = vadd.f32 %v604_v2, %v572_v60  ;;  %v582_v37 = vld [vmem:[%s1245_s12 + $0x78] sm:$0xff]  ;;  %v579_v49 = vld [vmem:[%s1245_s12 + $0x60] sm:$0xff] }
  0xbc   : > { %v609_v26 = vmax.f32 %v545_v19, 0.0  ;;  %v610_v61 = vmax.f32 %v546_v20, 0.0  ;;  %v607_v46 = vmax.f32 %v543_v22, 0.0  ;;  %v608_v47 = vmax.f32 %v544_v29, 0.0  ;;  %v586_v20 = vld [vmem:[%s1245_s12 + $0x98] sm:$0xff]  ;;  %v584_v22 = vld [vmem:[%s1245_s12 + $0x88] sm:$0xff] }
  0xbd   : > { %v422_v62 = vmul.f32 %v1156_v39, %v294_v8  ;;  %v419_v36 = vmul.f32 %v1158_v40, %v291_v9  ;;  %v420_v55 = vmul.f32 %v1158_v40, %v292_v10  ;;  %669 = vst [vmem:[%s1291_s14 + $0x30] sm:$0xff] %v637_v30  ;;  %670 = vst [vmem:[%s1291_s14 + $0x38] sm:$0xff] %v638_v31  ;;  %v493_v56 = vpop.permute.xlu1 %492  ;;  %v488_v7 = vpop.permute.xlu0 %487  ;;  %v581_v40 = vld [vmem:[%s1245_s12 + $0x70] sm:$0xff] }
  0xbe   : > { %667 = vst [vmem:[%s1291_s14 + $0x20] sm:$0xff] %v635_v32  ;;  %668 = vst [vmem:[%s1291_s14 + $0x28] sm:$0xff] %v636_v48  ;;  %v641_v57 = vadd.f32 %v609_v26, %v577_v21  ;;  %v642_v39 = vadd.f32 %v610_v61, %v578_v25  ;;  %v639_v8 = vadd.f32 %v607_v46, %v575_v23  ;;  %v583_v21 = vld [vmem:[%s1245_s12 + $0x80] sm:$0xff]  ;;  %v1475_v48 = vunpack.c.l.bf16 %v1213_v5 }
  0xbf   : > { %v640_v9 = vadd.f32 %v608_v47, %v576_v24  ;;  %v549_v58 = vadd.f32 %v493_v56, %v421_v34  ;;  %v550_v53 = vadd.f32 %v493_v56, %v422_v62  ;;  %v547_v10 = vadd.f32 %v488_v7, %v419_v36 }
  0xc0   : > { %v548_v45 = vadd.f32 %v488_v7, %v420_v55  ;;  %v425_v33 = vmul.f32 %v1161_v41, %v297_v13  ;;  %v426_v35 = vmul.f32 %v1161_v41, %v298_v14  ;;  %v423_v54 = vmul.f32 %v1163_v42, %v295_v15  ;;  %673 = vst [vmem:[%s1291_s14 + $0x50] sm:$0xff] %v641_v57  ;;  %v580_v13 = vld [vmem:[%s1245_s12 + $0x68] sm:$0xff] }
  0xc1   : > { %v424_v59 = vmul.f32 %v1163_v42, %v296_v16  ;;  %674 = vst [vmem:[%s1291_s14 + $0x58] sm:$0xff] %v642_v39  ;;  %671 = vst [vmem:[%s1291_s14 + $0x40] sm:$0xff] %v639_v8  ;;  %v613_v63 = vmax.f32 %v549_v58, 0.0  ;;  %v614_v41 = vmax.f32 %v550_v53, 0.0  ;;  %v611_v14 = vmax.f32 %v547_v10, 0.0  ;;  %v503_v15 = vpop.permute.xlu1 %502  ;;  %v498_v1 = vpop.permute.xlu0 %497  ;;  %v585_v42 = vld [vmem:[%s1245_s12 + $0x90] sm:$0xff] }
  0xc2   : > { %672 = vst [vmem:[%s1291_s14 + $0x48] sm:$0xff] %v640_v9  ;;  %v612_v60 = vmax.f32 %v548_v45, 0.0  ;;  %v553_v0 = vadd.f32 %v503_v15, %v425_v33  ;;  %v554_v50 = vadd.f32 %v503_v15, %v426_v35  ;;  %v551_v16 = vadd.f32 %v498_v1, %v423_v54  ;;  %v590_v33 = vld [vmem:[%s1245_s12 + $0xb8] sm:$0xff]  ;;  %v587_v35 = vld [vmem:[%s1245_s12 + $0xa0] sm:$0xff]  ;;  %v588_v54 = vld [vmem:[%s1245_s12 + $0xa8] sm:$0xff] }
  0xc3   : > { %v552_v38 = vadd.f32 %v498_v1, %v424_v59  ;;  %v645_v2 = vadd.f32 %v613_v63, %v581_v40  ;;  %v646_v3 = vadd.f32 %v614_v41, %v582_v37  ;;  %v643_v4 = vadd.f32 %v611_v14, %v579_v49 }
  0xc4   : > { %v644_v19 = vadd.f32 %v612_v60, %v580_v13  ;;  %v617_v29 = vmax.f32 %v553_v0, 0.0  ;;  %v618_v30 = vmax.f32 %v554_v50, 0.0  ;;  %v615_v31 = vmax.f32 %v551_v16, 0.0  ;;  %v594_v50 = vld [vmem:[%s1245_s12 + $0xd8] sm:$0xff]  ;;  %v592_v16 = vld [vmem:[%s1245_s12 + $0xc8] sm:$0xff] }
  0xc5   : > { %v616_v32 = vmax.f32 %v552_v38, 0.0  ;;  %v429_v25 = vmul.f32 %v1170_v43, %v1475_v48  ;;  %v1476_v23 = vunpack.c.h.bf16 %v1213_v5  ;;  %v1477_v26 = vunpack.c.l.bf16 %v1216_v6  ;;  %677 = vst [vmem:[%s1291_s14 + $0x70] sm:$0xff] %v645_v2  ;;  %678 = vst [vmem:[%s1291_s14 + $0x78] sm:$0xff] %v646_v3  ;;  %v513_v34 = vpop.permute.xlu1 %512  ;;  %v508_v62 = vpop.permute.xlu0 %507 }
  0xc6   : > { %v1478_v46 = vunpack.c.h.bf16 %v1216_v6  ;;  %675 = vst [vmem:[%s1291_s14 + $0x60] sm:$0xff] %v643_v4  ;;  %676 = vst [vmem:[%s1291_s14 + $0x68] sm:$0xff] %v644_v19  ;;  %v649_v5 = vadd.f32 %v617_v29, %v585_v42  ;;  %v647_v36 = vadd.f32 %v615_v31, %v583_v21  ;;  %v1479_v39 = vunpack.c.l.bf16 %v1232_v17  ;;  %v591_v42 = vld [vmem:[%s1245_s12 + $0xc0] sm:$0xff] }
  0xc7   : > { %v430_v24 = vmul.f32 %v1170_v43, %v1476_v23  ;;  %v427_v61 = vmul.f32 %v1172_v44, %v1477_v26  ;;  %v650_v43 = vadd.f32 %v618_v30, %v586_v20  ;;  %v648_v55 = vadd.f32 %v616_v32, %v584_v22  ;;  %v597_v26 = vld [vmem:[%s1245_s12 + $0xf0] sm:$0xff] }
  0xc8   : > { %v428_v47 = vmul.f32 %v1172_v44, %v1478_v46  ;;  %v557_v6 = vadd.f32 %v513_v34, %v429_v25  ;;  %v589_v44 = vld [vmem:[%s1245_s12 + $0xb0] sm:$0xff]  ;;  %v433_v8 = vmul.f32 %v1188_v51, %v1479_v39  ;;  %v1480_v9 = vunpack.c.h.bf16 %v1232_v17  ;;  %681 = vst [vmem:[%s1291_s14 + $0x90] sm:$0xff] %v649_v5  ;;  %679 = vst [vmem:[%s1291_s14 + $0x80] sm:$0xff] %v647_v36 }
  0xc9   : > { %v558_v56 = vadd.f32 %v513_v34, %v430_v24  ;;  %v555_v7 = vadd.f32 %v508_v62, %v427_v61  ;;  %v1481_v53 = vunpack.c.l.bf16 %v1235_v18  ;;  %v1482_v10 = vunpack.c.h.bf16 %v1235_v18  ;;  %682 = vst [vmem:[%s1291_s14 + $0x98] sm:$0xff] %v650_v43  ;;  %680 = vst [vmem:[%s1291_s14 + $0x88] sm:$0xff] %v648_v55  ;;  %v523_v49 = vpop.permute.xlu1 %522  ;;  %v518_v13 = vpop.permute.xlu0 %517  ;;  %v595_v34 = vld [vmem:[%s1245_s12 + $0xe0] sm:$0xff] }
  0xca   : > { %v556_v57 = vadd.f32 %v508_v62, %v428_v47  ;;  %v434_v58 = vmul.f32 %v1188_v51, %v1480_v9  ;;  %v621_v17 = vmax.f32 %v557_v6, 0.0  ;;  %v561_v18 = vadd.f32 %v523_v49, %v433_v8  ;;  %v598_v47 = vld [vmem:[%s1245_s12 + $0xf8] sm:$0xff]  ;;  %v596_v62 = vld [vmem:[%s1245_s12 + $0xe8] sm:$0xff] }
  0xcb   : > { %v431_v40 = vmul.f32 %v1190_v52, %v1481_v53  ;;  %v432_v45 = vmul.f32 %v1190_v52, %v1482_v10  ;;  %v622_v51 = vmax.f32 %v558_v56, 0.0  ;;  %v619_v59 = vmax.f32 %v555_v7, 0.0  ;;  %v593_v52 = vld [vmem:[%s1245_s12 + $0xd0] sm:$0xff] }
  0xcc   : > { %v620_v37 = vmax.f32 %v556_v57, 0.0  ;;  %v562_v63 = vadd.f32 %v523_v49, %v434_v58  ;;  %v653_v60 = vadd.f32 %v621_v17, %v589_v44  ;;  %v625_v38 = vmax.f32 %v561_v18, 0.0 }
  0xcd   : > { %v559_v41 = vadd.f32 %v518_v13, %v431_v40  ;;  %v560_v14 = vadd.f32 %v518_v13, %v432_v45  ;;  %v654_v15 = vadd.f32 %v622_v51, %v590_v33  ;;  %v651_v1 = vadd.f32 %v619_v59, %v587_v35 }
  0xce   : > { %v652_v0 = vadd.f32 %v620_v37, %v588_v54  ;;  %v626_v2 = vmax.f32 %v562_v63, 0.0  ;;  %v1483_v19 = vunpack.c.l.bf16 %v1248_v27  ;;  %v1484_v21 = vunpack.c.h.bf16 %v1248_v27  ;;  %685 = vst [vmem:[%s1291_s14 + $0xb0] sm:$0xff] %v653_v60  ;;  %v533_v27 = vpop.permute.xlu1 %532 }
  0xcf   : > { %v623_v3 = vmax.f32 %v559_v41, 0.0  ;;  %v624_v4 = vmax.f32 %v560_v14, 0.0  ;;  %v1485_v29 = vunpack.c.l.bf16 %v1251_v28  ;;  %v1486_v31 = vunpack.c.h.bf16 %v1251_v28  ;;  %686 = vst [vmem:[%s1291_s14 + $0xb8] sm:$0xff] %v654_v15  ;;  %683 = vst [vmem:[%s1291_s14 + $0xa0] sm:$0xff] %v651_v1 }
  0xd0   : > { %v437_v20 = vmul.f32 %v1223_v11, %v1483_v19  ;;  %v438_v22 = vmul.f32 %v1223_v11, %v1484_v21  ;;  %684 = vst [vmem:[%s1291_s14 + $0xa8] sm:$0xff] %v652_v0  ;;  %v528_v11 = vpop.permute.xlu0 %527  ;;  %v657_v48 = vadd.f32 %v625_v38, %v593_v52  ;;  %v658_v25 = vadd.f32 %v626_v2, %v594_v50 }
  0xd1   : > { %v435_v30 = vmul.f32 %v1225_v12, %v1485_v29  ;;  %v436_v32 = vmul.f32 %v1225_v12, %v1486_v31  ;;  %v655_v28 = vadd.f32 %v623_v3, %v591_v42  ;;  %v656_v23 = vadd.f32 %v624_v4, %v592_v16 }
  0xd2   : > { %v565_v12 = vadd.f32 %v533_v27, %v437_v20  ;;  %v566_v24 = vadd.f32 %v533_v27, %v438_v22  ;;  %689 = vst [vmem:[%s1291_s14 + $0xd0] sm:$0xff] %v657_v48  ;;  %690 = vst [vmem:[%s1291_s14 + $0xd8] sm:$0xff] %v658_v25 }
  0xd3   : > { %v563_v61 = vadd.f32 %v528_v11, %v435_v30  ;;  %v564_v46 = vadd.f32 %v528_v11, %v436_v32  ;;  %687 = vst [vmem:[%s1291_s14 + $0xc0] sm:$0xff] %v655_v28  ;;  %688 = vst [vmem:[%s1291_s14 + $0xc8] sm:$0xff] %v656_v23 }
  0xd4   : > { %v629_v5 = vmax.f32 %v565_v12, 0.0  ;;  %v630_v43 = vmax.f32 %v566_v24, 0.0 }
  0xd5   : > { %v627_v36 = vmax.f32 %v563_v61, 0.0  ;;  %v628_v55 = vmax.f32 %v564_v46, 0.0 }
  0xd6   : > { %v661_v6 = vadd.f32 %v629_v5, %v597_v26  ;;  %v662_v56 = vadd.f32 %v630_v43, %v598_v47 }
  0xd7   : > { %v659_v44 = vadd.f32 %v627_v36, %v595_v34  ;;  %v660_v7 = vadd.f32 %v628_v55, %v596_v62 }
  0xd8   : > { %693 = vst [vmem:[%s1291_s14 + $0xf0] sm:$0xff] %v661_v6  ;;  %694 = vst [vmem:[%s1291_s14 + $0xf8] sm:$0xff] %v662_v56 }
  0xd9   : > { %691 = vst [vmem:[%s1291_s14 + $0xe0] sm:$0xff] %v659_v44  ;;  %692 = vst [vmem:[%s1291_s14 + $0xe8] sm:$0xff] %v660_v7 }
  0xda   : > { %899 = shalt.err (!%p896_p5)
}
  0xdb   : > { %s900_s8 = scalar_lea.hbm %s1413_s26, 4096  ;;  %s904_s11 = scalar_lea.hbm %s1472_s4, 8192 }
  0xdc   : > { %p901_p6 = scmp.ne.s32.totalorder %s1413_s26, %s900_s8  ;;  %p905_p10 = scmp.lt.s32.totalorder %s1413_s26, %s1472_s4 }
  0xdd   : > { %p906_p11 = scmp.lt.s32.totalorder %s904_s11, %s900_s8 }
  0xde   : > { %p902_p7 = pnand %p901_p6, %p1033_p4 }
  0xdf   : > { %p907_p12 = por %p906_p11, %p905_p10 }
  0xe0   : > { %p903_p9 = pneg %p902_p7 }
  0xe2   : > { %p908_p13 = pnand %p907_p12, %p903_p9 }
  0xe4   : > { %911 = shalt.err (!%p908_p13)
}
  0xe5   : > { %s966_s14 = smov 256   ;;  %s967_s21 = smov 16  }
  0xe6   : > { %826 = dma.vmem_to_hbm [thread:$0]  (%p1033_p4), %s1415_s22, 4096, %s1413_s26, %s1423_s29, %s966_s14, %s966_s14, %s967_s21  }
  0xe7 PF: > { %p832_p0 = scmp.ge.s32.totalorder %s962_s20, 2  ;;  %s726_s24 = sand.u32 1, %s942_s15  }
  0xe8   : > { %s727_s18 = scalar_lea.sflag [#allocation3], %s726_s24 }
  0xe9   : > { %p829_p1 = pnand %p832_p0, %p1040_p8 }
  0xeb   : > { %p830_p2 = pneg %p829_p1 }
  0xed   : > { %937 = dma.done.wait (%p830_p2), %s727_s18, 4096  }
  0xee   : > { %939 = vsyncadd (%p830_p2), %s727_s18, 4294963200  ;;  %s17_s20 = sadd.s32 1, %s962_s20   ;;  %s1487_s15 = smov %s946_s16 }
  0xef   : > { %p14_p3 = scmp.ge.s32.totalorder %s17_s20, 4   ;;  %s1488_s16 = smov %s950_s17 }
  0xf0   : > { %s1489_s17 = smov %s1046_s28  ;;  %s1490_s18 = smov %s958_s19 }
  0xf1   : > { %s1491_s19 = smov %s1493_s23  ;;  %16 = sbr.rel (!%p14_p3) target bundleno = 4 (0x4), region = 74 }
  0xf6   :  { %732 = vsyncpa [#allocation3], 1 }
  0xf7   :  { %734 = vsyncpa [#allocation3 + $0x1], 1 }

// kernel: sa_layer.2
= control target key start
LH: loop header
LB: loop body
LE: loop exit
PB: predicated region body
PF: predicated region fallthrough
CT: control target
= control target key end

     0   :  { %s4253_s24 = smov 0   ;;  %s5710_s0 = inlined_call_operand.vmem [shape: f32[2,128,256], index: 0, kind: input, shape index: {}]   ;;  %s5711_s1 = inlined_call_operand.vmem [shape: bf16[160,128], index: 1, kind: input, shape index: {}]   ;;  %s5712_s2 = inlined_call_operand.vmem [shape: f32[160,1], index: 2, kind: input, shape index: {}]   ;;  %s5713_s3 = inlined_call_operand.vmem [shape: bf16[128,128], index: 3, kind: input, shape index: {}]   ;;  %s5714_s4 = inlined_call_operand.vmem [shape: f32[128,1], index: 4, kind: input, shape index: {}]   ;;  %s5715_s5 = inlined_call_operand.vmem [shape: bf16[2,128,256], index: 5, kind: output, shape index: {0}]   ;;  %s5716_s6 = inlined_call_operand.vmem [shape: f32[2,128,1], index: 6, kind: output, shape index: {1}]   ;;  %s5717_s7 = inlined_call_operand.vmem [shape: f32[2,128,1], index: 7, kind: output, shape index: {2}]  }
   0x1 LB: > { %s3613_s25 = sadd.s32 4294967295, %s4208_s24   ;;  %p3617_p0 = scmp.ge.s32.totalorder %s4208_s24, 1  ;;  %s4208_s24 = sphi %s4253_s24, %s18_s24  }
   0x2   : > { %p242_p1 = scmp.lt.s32.totalorder %s4208_s24, 3 }
   0x4   : > { %p243_p2 = pnand %p3617_p0, %p242_p1 }
   0x6   : > { %246 = sbr.rel (%p243_p2) target bundleno = 1750 (0x6d6), region = 40 }
   0xb   : > { %p284_p3 = scmp.lt.s32.totalorder %s3613_s25, 1  ;;  %v3953_v0 = vld [vmem:[%s5711_s1] sm:$0xff]   ;;  %v3954_v1 = vld [vmem:[%s5711_s1 + $0x10] sm:$0xff]   ;;  %v5718_v2 = vmov 0   ;;  %v350_v25 = vld [vmem:[%s5712_s2 + $0x8] sm:$0xff]  ;;  %vm1272_vm0 = vcmask 261120  }
   0xc   : > { %3868 = vmatprep.mubr.bf16.mxu0 %v3953_v0  ;;  %3951 = vset.pattern.permute.xlu0 %v5718_v2  ;;  %v349_v22 = vld [vmem:[%s5712_s2] sm:$0xff]  ;;  %v351_v24 = vld [vmem:[%s5712_s2 + $0x10] sm:$0xff]  ;;  %v352_v26 = vld [vmem:[%s5712_s2 + $0x18] sm:$0xff]  ;;  %vm3267_vm2 = vcmask 7168  }
   0xd   : > { %s5852_s25 = smov (!%p284_p3, %s3613_s25), 1  ;;  %3872 = vmatprep.mubr.bf16.mxu1 %v3954_v1  ;;  %3952 = vset.pattern.permute.xlu1 %v5718_v2  ;;  %v3955_v36 = vld [vmem:[%s5711_s1 + $0x8] sm:$0xff]   ;;  %v3956_v37 = vld [vmem:[%s5711_s1 + $0x18] sm:$0xff]   ;;  %v3957_v38 = vld [vmem:[%s5711_s1 + $0x20] sm:$0xff]  }
   0xe   : > { %s3756_s30 = sshll.u32 %s5852_s25, 8  ;;  %371 = vperm.xlu0 %3951, %v349_v22   ;;  %381 = vperm.xlu1 %3952, %v351_v24   ;;  %v3958_v45 = vld [vmem:[%s5711_s1 + $0x28] sm:$0xff]   ;;  %v3959_v46 = vld [vmem:[%s5711_s1 + $0x30] sm:$0xff]   ;;  %v3960_v53 = vld [vmem:[%s5711_s1 + $0x38] sm:$0xff]   ;;  %s5607_s16 = sshll.u32 %s5852_s25, 7 }
   0xf   : > { %s4275_s10 = scalar_lea.vmem %s5710_s0, %s3756_s30  ;;  %v3961_v54 = vld [vmem:[%s5711_s1 + $0x40] sm:$0xff]   ;;  %v3962_v61 = vld [vmem:[%s5711_s1 + $0x48] sm:$0xff]   ;;  %s5613_s19 = scalar_lea.vmem %s5715_s5, %s5607_s16 }
  0x10   : > { %v319_v3 = vld [vmem:[%s4275_s10 + $0xe0] sm:$0xff]  ;;  %v320_v4 = vld [vmem:[%s4275_s10 + $0xf0] sm:$0xff]  ;;  %v756_v30 = vld [vmem:[%s4275_s10 + $0xe8] sm:$0xff]  ;;  %s5635_s21 = scalar_lea.vmem %s5716_s6, %s5607_s16  ;;  %s5641_s23 = scalar_lea.vmem %s5717_s7, %s5607_s16 }
  0x11   : > { %v317_v5 = vld [vmem:[%s4275_s10 + $0xc0] sm:$0xff]  ;;  %v328_v6 = vpack.c.bf16 %v320_v4, %v319_v3  ;;  %v318_v7 = vld [vmem:[%s4275_s10 + $0xd0] sm:$0xff]  ;;  %v757_v31 = vld [vmem:[%s4275_s10 + $0xf8] sm:$0xff] }
  0x12   : > { %v327_v8 = vpack.c.bf16 %v318_v7, %v317_v5  ;;  %v315_v9 = vld [vmem:[%s4275_s10 + $0xa0] sm:$0xff]  ;;  %v316_v10 = vld [vmem:[%s4275_s10 + $0xb0] sm:$0xff]  ;;  %376 = vperm.xlu0 %3951, %v350_v25   ;;  %386 = vperm.xlu1 %3952, %v352_v26   ;;  %v765_v33 = vpack.c.bf16 %v757_v31, %v756_v30  ;;  %v754_v34 = vld [vmem:[%s4275_s10 + $0xc8] sm:$0xff] }
  0x13   : > { %3852 = vmatprep.subr.bf16.mxu0 %v328_v6  ;;  %3924 = vmatprep.subr.bf16.mxu1 %v328_v6  ;;  %v326_v11 = vpack.c.bf16 %v316_v10, %v315_v9  ;;  %v313_v12 = vld [vmem:[%s4275_s10 + $0x80] sm:$0xff]  ;;  %v314_v13 = vld [vmem:[%s4275_s10 + $0x90] sm:$0xff]  ;;  %v755_v35 = vld [vmem:[%s4275_s10 + $0xd8] sm:$0xff] }
  0x14   : > { %3853 = vmatpush3.bf16.msra.mxu0 %v328_v6  ;;  %3932 = vmatpush3.bf16.msra.mxu1 %v328_v6  ;;  %v325_v14 = vpack.c.bf16 %v314_v13, %v313_v12  ;;  %v311_v15 = vld [vmem:[%s4275_s10 + $0x60] sm:$0xff]  ;;  %v312_v16 = vld [vmem:[%s4275_s10 + $0x70] sm:$0xff]  ;;  %v764_v39 = vpack.c.bf16 %v755_v35, %v754_v34  ;;  %v752_v40 = vld [vmem:[%s4275_s10 + $0xa8] sm:$0xff] }
  0x15   : > { %3854 = vmatprep.subr.bf16.mxu0 %v327_v8  ;;  %3925 = vmatprep.subr.bf16.mxu1 %v327_v8  ;;  %v324_v17 = vpack.c.bf16 %v312_v16, %v311_v15  ;;  %v309_v18 = vld [vmem:[%s4275_s10 + $0x40] sm:$0xff]  ;;  %v310_v19 = vld [vmem:[%s4275_s10 + $0x50] sm:$0xff]  ;;  %v753_v41 = vld [vmem:[%s4275_s10 + $0xb8] sm:$0xff] }
  0x16   : > { %v307_v20 = vld [vmem:[%s4275_s10 + $0x20] sm:$0xff]  ;;  %v308_v21 = vld [vmem:[%s4275_s10 + $0x30] sm:$0xff]  ;;  %v323_v23 = vpack.c.bf16 %v310_v19, %v309_v18  ;;  %818 = vperm.xlu0 %3951, %v351_v24   ;;  %823 = vperm.xlu1 %3952, %v352_v26   ;;  %v763_v42 = vpack.c.bf16 %v753_v41, %v752_v40  ;;  %v750_v43 = vld [vmem:[%s4275_s10 + $0x88] sm:$0xff] }
  0x17   : > { %v305_v27 = vld [vmem:[%s4275_s10] sm:$0xff]  ;;  %v306_v28 = vld [vmem:[%s4275_s10 + $0x10] sm:$0xff]  ;;  %v322_v29 = vpack.c.bf16 %v308_v21, %v307_v20  ;;  %v751_v44 = vld [vmem:[%s4275_s10 + $0x98] sm:$0xff] }
  0x18   : > { %3855 = vmatpush3.bf16.msra.mxu0 %v327_v8  ;;  %3933 = vmatpush3.bf16.msra.mxu1 %v327_v8  ;;  %v321_v32 = vpack.c.bf16 %v306_v28, %v305_v27  ;;  %v762_v47 = vpack.c.bf16 %v751_v44, %v750_v43  ;;  %v748_v48 = vld [vmem:[%s4275_s10 + $0x68] sm:$0xff]  ;;  %v749_v49 = vld [vmem:[%s4275_s10 + $0x78] sm:$0xff]  ;;  %v3963_v62 = vld [vmem:[%s5711_s1] sm:$0xff]  }
  0x19   : > { %3856 = vmatprep.subr.bf16.mxu0 %v326_v11  ;;  %3926 = vmatprep.subr.bf16.mxu1 %v326_v11  ;;  %v761_v50 = vpack.c.bf16 %v749_v49, %v748_v48  ;;  %v746_v51 = vld [vmem:[%s4275_s10 + $0x48] sm:$0xff]  ;;  %v747_v52 = vld [vmem:[%s4275_s10 + $0x58] sm:$0xff] }
  0x1a   : > { %808 = vperm.xlu0 %3951, %v349_v22   ;;  %813 = vperm.xlu1 %3952, %v350_v25   ;;  %v760_v55 = vpack.c.bf16 %v747_v52, %v746_v51  ;;  %v744_v56 = vld [vmem:[%s4275_s10 + $0x28] sm:$0xff]  ;;  %v745_v57 = vld [vmem:[%s4275_s10 + $0x38] sm:$0xff] }
  0x1b   : > { %v759_v58 = vpack.c.bf16 %v745_v57, %v744_v56  ;;  %v742_v59 = vld [vmem:[%s4275_s10 + $0x8] sm:$0xff]  ;;  %v743_v60 = vld [vmem:[%s4275_s10 + $0x18] sm:$0xff] }
  0x1c   : > { %3857 = vmatpush3.bf16.msra.mxu0 %v326_v11  ;;  %3934 = vmatpush3.bf16.msra.mxu1 %v326_v11  ;;  %v758_v63 = vpack.c.bf16 %v743_v60, %v742_v59  ;;  %v3964_v0 = vld [vmem:[%s5711_s1 + $0x8] sm:$0xff]   ;;  %v357_v59 = vld [vmem:[%s5712_s2 + $0x40] sm:$0xff]  ;;  %v359_v60 = vld [vmem:[%s5712_s2 + $0x50] sm:$0xff] }
  0x1d   : > { %3858 = vmatprep.subr.bf16.mxu0 %v325_v14  ;;  %3927 = vmatprep.subr.bf16.mxu1 %v325_v14 }
  0x20   : > { %3859 = vmatpush3.bf16.msra.mxu0 %v325_v14  ;;  %3935 = vmatpush3.bf16.msra.mxu1 %v325_v14 }
  0x21   : > { %3860 = vmatprep.subr.bf16.mxu0 %v324_v17  ;;  %3928 = vmatprep.subr.bf16.mxu1 %v324_v17 }
  0x24   : > { %3861 = vmatpush3.bf16.msra.mxu0 %v324_v17  ;;  %3936 = vmatpush3.bf16.msra.mxu1 %v324_v17 }
  0x25   : > { %3862 = vmatprep.subr.bf16.mxu0 %v323_v23  ;;  %3929 = vmatprep.subr.bf16.mxu1 %v323_v23 }
  0x28   : > { %3863 = vmatpush3.bf16.msra.mxu0 %v323_v23  ;;  %3937 = vmatpush3.bf16.msra.mxu1 %v323_v23 }
  0x29   : > { %3864 = vmatprep.subr.bf16.mxu0 %v322_v29  ;;  %3930 = vmatprep.subr.bf16.mxu1 %v322_v29 }
  0x2c   : > { %3865 = vmatpush3.bf16.msra.mxu0 %v322_v29  ;;  %3938 = vmatpush3.bf16.msra.mxu1 %v322_v29 }
  0x2d   : > { %3866 = vmatprep.subr.bf16.mxu0 %v321_v32  ;;  %3931 = vmatprep.subr.bf16.mxu1 %v321_v32 }
  0x30   : > { %3867 = vmatpush3.bf16.msra.mxu0 %v321_v32  ;;  %3939 = vmatpush3.bf16.msra.mxu1 %v321_v32 }
  0x31   : > { %3888 = vmatprep.subr.bf16.mxu1 %v765_v33 }
  0x33   : > { %3869 = vmatmul.mubr.bf16.vlgmr.msra.gmra.mxu0 %v3955_v36  ;;  %3873 = vmatmul.mubr.bf16.vlgmr.msra.gmra.mxu1 %v3956_v37 }
  0x34   : > { %3889 = vmatpush3.bf16.msra.mxu1 %v765_v33  ;;  %3876 = vmatprep.mubr.bf16.mxu1 %v3957_v38 }
  0x35   : > { %3890 = vmatprep.subr.bf16.mxu1 %v764_v39  ;;  %1329 = vmatprep.mubr.bf16.mxu0 %v5718_v2 }
  0x38   : > { %3891 = vmatpush3.bf16.msra.mxu1 %v764_v39 }
  0x39   : > { %3892 = vmatprep.subr.bf16.mxu1 %v763_v42 }
  0x3b   : > { %3877 = vmatmul.mubr.bf16.gmra.mxu1 %v3958_v45 }
  0x3c   : > { %3893 = vmatpush3.bf16.msra.mxu1 %v763_v42  ;;  %3880 = vmatprep.mubr.bf16.mxu1 %v3959_v46 }
  0x3d   : > { %3894 = vmatprep.subr.bf16.mxu1 %v762_v47 }
  0x40   : > { %3895 = vmatpush3.bf16.msra.mxu1 %v762_v47 }
  0x41   : > { %3896 = vmatprep.subr.bf16.mxu1 %v761_v50 }
  0x43   : > { %3881 = vmatmul.mubr.bf16.gmra.mxu1 %v3960_v53 }
  0x44   : > { %3897 = vmatpush3.bf16.msra.mxu1 %v761_v50  ;;  %3884 = vmatprep.mubr.bf16.mxu1 %v3961_v54 }
  0x45   : > { %3898 = vmatprep.subr.bf16.mxu1 %v760_v55 }
  0x48   : > { %3899 = vmatpush3.bf16.msra.mxu1 %v760_v55 }
  0x49   : > { %3900 = vmatprep.subr.bf16.mxu1 %v759_v58 }
  0x4b   : > { %3885 = vmatmul.mubr.bf16.gmra.mxu1 %v3962_v61  ;;  %v362_v61 = vld [vmem:[%s5712_s2 + $0x68] sm:$0xff] }
  0x4c   : > { %3901 = vmatpush3.bf16.msra.mxu1 %v759_v58  ;;  %3904 = vmatprep.mubr.bf16.mxu1 %v3963_v62  ;;  %v354_v58 = vld [vmem:[%s5712_s2 + $0x28] sm:$0xff]  ;;  %v353_v62 = vld [vmem:[%s5712_s2 + $0x20] sm:$0xff] }
  0x4d   : > { %3902 = vmatprep.subr.bf16.mxu1 %v758_v63 }
  0x50   : > { %3903 = vmatpush3.bf16.msra.mxu1 %v758_v63  ;;  %v355_v63 = vld [vmem:[%s5712_s2 + $0x30] sm:$0xff] }
  0x53   : > { %3905 = vmatmul.mubr.bf16.vlgmr.msra.gmra.mxu1 %v3964_v0  ;;  %v356_v0 = vld [vmem:[%s5712_s2 + $0x38] sm:$0xff] }
  0x89   : > { %v382_v1 = vpop.permute.xlu1 %381  ;;  %v372_v3 = vpop.permute.xlu0 %371 }
  0x8d   : > { %v387_v9 = vpop.permute.xlu1 %386  ;;  %v377_v14 = vpop.permute.xlu0 %376 }
  0x91   : > { %v819_v34 = vpop.permute.xlu0 %818  ;;  %v824_v37 = vpop.permute.xlu1 %823 }
  0x95   : > { %v809_v40 = vpop.permute.xlu0 %808  ;;  %v814_v47 = vpop.permute.xlu1 %813 }
  0xf3   : > { %v3870_v4 = vpop.f32.mrf.mxu0  ;;  %v4352_v5 = vpop.f32.mrf.mxu1 }
  0xf4   : > { %v572_v6 = vadd.f32 %v3870_v4, %v382_v1  ;;  %v358_v1 = vld [vmem:[%s5712_s2 + $0x48] sm:$0xff]  ;;  %v361_v4 = vld [vmem:[%s5712_s2 + $0x60] sm:$0xff] }
  0xf5   : > { %v563_v7 = vpop.f32.mrf.mxu0  ;;  %v4354_v8 = vpop.f32.mrf.mxu1 }
  0xf6   : > { %v3762_v10 = vpack.c.bf16 %v572_v6, %v572_v6  ;;  %v564_v11 = vadd.f32 %v563_v7, %v372_v3  ;;  %v360_v3 = vld [vmem:[%s5712_s2 + $0x58] sm:$0xff] }
  0xf7   : > { %v3871_v12 = vpop.f32.mrf.mxu0  ;;  %v4356_v13 = vpop.f32.mrf.mxu1 }
  0xf8   : > { %660 = vst [vmem:[#allocation2 + $0x10] sm:$0xf] %v3762_v10  ;;  %v3760_v15 = vpack.c.bf16 %v564_v11, %v564_v11  ;;  %v575_v16 = vadd.f32 %v3871_v12, %v387_v9 }
  0xf9   : > { %v566_v17 = vpop.f32.mrf.mxu0  ;;  %v4358_v18 = vpop.f32.mrf.mxu1 }
  0xfa   : > { %658 = vst [vmem:[#allocation2] sm:$0xf] %v3760_v15  ;;  %v3763_v19 = vpack.c.bf16 %v575_v16, %v575_v16  ;;  %v567_v20 = vadd.f32 %v566_v17, %v377_v14 }
  0xfb   : > { %v4360_v21 = vpop.f32.mrf.mxu1 }
  0xfc   : > { %661 = vst [vmem:[#allocation2 + $0x18] sm:$0xf] %v3763_v19  ;;  %v3761_v22 = vpack.c.bf16 %v567_v20, %v567_v20 }
  0xfd   : > { %v4362_v23 = vpop.f32.mrf.mxu1 }
  0xfe   : > { %659 = vst [vmem:[#allocation2 + $0x8] sm:$0xf] %v3761_v22 }
  0xff   : > { %v4364_v24 = vpop.f32.mrf.mxu1 }
 0x101   : > { %v4366_v25 = vpop.f32.mrf.mxu1 }
 0x103   : > { %v4368_v26 = vpop.f32.mrf.mxu1  ;;  %v3966_v31 = vld [vmem:[#allocation2 + $0x10] ss:$8 sps:$4 sm:$0xff]  }
 0x104   : > { %v3967_v52 = vld [vmem:[#allocation2 + $0x10] ss:$8 sps:$4 sm:$0xff]  }
 0x105   : > { %v4370_v27 = vpop.f32.mrf.mxu1  ;;  %v3965_v28 = vld [vmem:[#allocation2] ss:$8 sps:$4 sm:$0xff]  }
 0x106   : > { %1236 = vxpose.xlu0.c.b16.start [1/2] (short) %v3965_v28, 128  ;;  %v3971_v56 = vld [vmem:[#allocation2] ss:$8 sps:$4 sm:$0xff]  }
 0x107   : > { %v4372_v29 = vpop.f32.mrf.mxu1 }
 0x108   : > { %5760 = vst [vmem:[#allocation6_spill] sm:$0xff] %v4372_v29  ;;  %v3975_v29 = vld [vmem:[%s5711_s1 + $0x10] sm:$0xff]  }
 0x109   : > { %v4374_v30 = vpop.f32.mrf.mxu1  ;;  %3908 = vmatprep.mubr.bf16.mxu1 %v3975_v29 }
 0x10a   : > { %1237 = vxpose.xlu0.c.b16.end [2/2] (short) %v3966_v31, 128 }
 0x10b   : > { %v4376_v32 = vpop.f32.mrf.mxu1 }
 0x10c   : > { %5761 = vst [vmem:[#allocation7_spill] sm:$0xff] %v4376_v32 }
 0x10d   : > { %v4378_v33 = vpop.f32.mrf.mxu1 }
 0x10e   : > { %5762 = vst [vmem:[#allocation8_spill] sm:$0xff] %v4378_v33 }
 0x10f   : > { %v4380_v35 = vpop.f32.mrf.mxu1 }
 0x110   : > { %5763 = vst [vmem:[#allocation9_spill] sm:$0xff] %v4380_v35 }
 0x111   : > { %v4382_v36 = vpop.f32.mrf.mxu1 }
 0x112   : > { %5764 = vst [vmem:[#allocation10_spill] sm:$0xff] %v4382_v36 }
 0x113   : > { %v3906_v38 = vpop.f32.mrf.mxu1 }
 0x114   : > { %v1009_v39 = vadd.f32 %v3906_v38, %v819_v34 }
 0x115   : > { %v1000_v41 = vpop.f32.mrf.mxu1 }
 0x116   : > { %v3782_v42 = vpack.c.bf16 %v1009_v39, %v1009_v39  ;;  %v1001_v43 = vadd.f32 %v1000_v41, %v809_v40 }
 0x117   : > { %v3907_v44 = vpop.f32.mrf.mxu1 }
 0x118   : > { %1097 = vst [vmem:[#allocation2 + $0x14] sm:$0xf] %v3782_v42  ;;  %v3780_v45 = vpack.c.bf16 %v1001_v43, %v1001_v43  ;;  %v1012_v46 = vadd.f32 %v3907_v44, %v824_v37 }
 0x119   : > { %v1003_v48 = vpop.f32.mrf.mxu1 }
 0x11a   : > { %1095 = vst [vmem:[#allocation2 + $0x4] sm:$0xf] %v3780_v45  ;;  %v3783_v49 = vpack.c.bf16 %v1012_v46, %v1012_v46  ;;  %v1004_v50 = vadd.f32 %v1003_v48, %v814_v47 }
 0x11c   : > { %1098 = vst [vmem:[#allocation2 + $0x1c] sm:$0xf] %v3783_v49  ;;  %v3781_v51 = vpack.c.bf16 %v1004_v50, %v1004_v50 }
 0x11e   : > { %1096 = vst [vmem:[#allocation2 + $0xc] sm:$0xf] %v3781_v51 }
 0x123   : > { %v3969_v53 = vld [vmem:[#allocation2 + $0x14] ss:$8 sps:$4 sm:$0xff]  }
 0x124   : > { %1309 = vmatprep.subr.bf16.mxu0 %v3969_v53  ;;  %v3974_v57 = vld [vmem:[#allocation2 + $0x14] ss:$8 sps:$4 sm:$0xff]  }
 0x125   : > { %v3970_v54 = vld [vmem:[#allocation2 + $0x4] ss:$8 sps:$4 sm:$0xff]   ;;  %1310 = vmatpush1.bf16.msra.mxu0 %v3967_v52 }
 0x126   : > { %v3973_v55 = vld [vmem:[#allocation2 + $0x4] ss:$8 sps:$4 sm:$0xff]   ;;  %2022 = vxpose.xlu1.c.b16.start [1/2] (short) %v3970_v54, 128 }
 0x127   : > { %1311 = vmatprep.subr.bf16.mxu0 %v3973_v55 }
 0x129   : > { %1312 = vmatpush1.bf16.msra.mxu0 %v3971_v56 }
 0x12a   : > { %2023 = vxpose.xlu1.c.b16.end [2/2] (short) %v3974_v57, 128  ;;  %2094 = vmatprep.subr.bf16.mxu0 %v3969_v53 }
 0x12b   : > { %396 = vperm.xlu0 %3951, %v354_v58  }
 0x12f   : > { %411 = vperm.xlu0 %3951, %v357_v59  }
 0x133   : > { %421 = vperm.xlu0 %3951, %v359_v60  }
 0x137   : > { %436 = vperm.xlu0 %3951, %v362_v61  }
 0x146   : > { %391 = vperm.xlu1 %3952, %v353_v62  }
 0x14a   : > { %401 = vperm.xlu1 %3952, %v355_v63  }
 0x14e   : > { %406 = vperm.xlu1 %3952, %v356_v0  }
 0x152   : > { %416 = vperm.xlu1 %3952, %v358_v1  }
 0x156   : > { %426 = vperm.xlu1 %3952, %v360_v3  }
 0x15a   : > { %431 = vperm.xlu1 %3952, %v361_v4  }
 0x168   : > { %v1244_v6 = vpop.trf.xlu0 }
 0x169   : > { %3692 = vmatmul.mubr.msk.bf16.vlgmr.msra.gmra.mxu0 %vm1272_vm0, %v1244_v6 }
 0x16a   : > { %2095 = vmatpush1.bf16.msra.mxu0 %v3967_v52  ;;  %1339 = vmatprep.mubr.bf16.mxu0 %v5718_v2 }
 0x16b   : > { %2096 = vmatprep.subr.bf16.mxu0 %v3973_v55 }
 0x16c   : > { %v1245_v7 = vpop.trf.xlu0 }
 0x16e   : > { %2097 = vmatpush1.bf16.msra.mxu0 %v3971_v56 }
 0x170   : > { %v1246_v9 = vpop.trf.xlu0 }
 0x171   : > { %3693 = vmatmul.mubr.msk.bf16.gmra.mxu0 %vm1272_vm0, %v1245_v7 }
 0x172   : > { %1349 = vmatprep.mubr.bf16.mxu0 %v5718_v2 }
 0x174   : > { %v1247_v10 = vpop.trf.xlu0 }
 0x178   : > { %v1248_v11 = vpop.trf.xlu0 }
 0x179   : > { %3694 = vmatmul.mubr.msk.bf16.gmra.mxu0 %vm1272_vm0, %v1246_v9 }
 0x17a   : > { %1359 = vmatprep.mubr.bf16.mxu0 %v5718_v2 }
 0x17c   : > { %v1249_v12 = vpop.trf.xlu0 }
 0x180   : > { %v1250_v15 = vpop.trf.xlu0 }
 0x181   : > { %3695 = vmatmul.mubr.msk.bf16.gmra.mxu0 %vm1272_vm0, %v1247_v10 }
 0x182   : > { %1369 = vmatprep.mubr.bf16.mxu0 %v5718_v2 }
 0x184   : > { %v1251_v19 = vpop.trf.xlu0 }
 0x188   : > { %v2030_v14 = vpop.trf.xlu1 }
 0x189   : > { %3696 = vmatmul.mubr.msk.bf16.gmra.mxu0 %vm1272_vm0, %v1248_v11 }
 0x18a   : > { %1379 = vmatprep.mubr.bf16.mxu0 %v5718_v2 }
 0x18c   : > { %v2031_v16 = vpop.trf.xlu1 }
 0x190   : > { %v2032_v17 = vpop.trf.xlu1 }
 0x191   : > { %3697 = vmatmul.mubr.msk.bf16.gmra.mxu0 %vm1272_vm0, %v1249_v12 }
 0x192   : > { %1389 = vmatprep.mubr.bf16.mxu0 %v5718_v2 }
 0x194   : > { %v2033_v20 = vpop.trf.xlu1 }
 0x198   : > { %v2034_v34 = vpop.trf.xlu1 }
 0x199   : > { %3698 = vmatmul.mubr.msk.bf16.gmra.mxu0 %vm1272_vm0, %v1250_v15 }
 0x19a   : > { %1399 = vmatprep.mubr.bf16.mxu0 %v5718_v2 }
 0x19c   : > { %v2035_v42 = vpop.trf.xlu1 }
 0x1a0   : > { %v2036_v46 = vpop.trf.xlu1 }
 0x1a1   : > { %3699 = vmatmul.mubr.msk.bf16.gmra.mxu0 %vm1272_vm0, %v1251_v19 }
 0x1a2   : > { %2114 = vmatprep.mubr.bf16.mxu0 %v5718_v2 }
 0x1a6   : > { %v397_v22 = vpop.permute.xlu0 %396 }
 0x1a7   : > { %v583_v28 = vadd.f32 %v4358_v18, %v397_v22 }
 0x1a9   : > { %v3765_v31 = vpack.c.bf16 %v583_v28, %v583_v28  ;;  %3714 = vmatmul.mubr.msk.bf16.vlgmr.msra.gmra.mxu0 %vm1272_vm0, %v2030_v14 }
 0x1aa   : > { %v412_v37 = vpop.permute.xlu0 %411  ;;  %2124 = vmatprep.mubr.bf16.mxu0 %v5718_v2 }
 0x1ab   : > { %727 = vst [vmem:[#allocation3 + $0x8] sm:$0xf] %v3765_v31  ;;  %v596_v38 = vadd.f32 %v4362_v23, %v412_v37  ;;  %v2037_v23 = vpop.trf.xlu1 }
 0x1ad   : > { %v3768_v39 = vpack.c.bf16 %v596_v38, %v596_v38 }
 0x1ae   : > { %v422_v40 = vpop.permute.xlu0 %421 }
 0x1af   : > { %730 = vst [vmem:[#allocation3 + $0x20] sm:$0xf] %v3768_v39  ;;  %v604_v41 = vadd.f32 %v4360_v21, %v422_v40 }
 0x1b1   : > { %v3770_v43 = vpack.c.bf16 %v604_v41, %v604_v41  ;;  %3715 = vmatmul.mubr.msk.bf16.gmra.mxu0 %vm1272_vm0, %v2031_v16 }
 0x1b2   : > { %v437_v18 = vpop.permute.xlu0 %436  ;;  %2134 = vmatprep.mubr.bf16.mxu0 %v5718_v2 }
 0x1b3   : > { %732 = vst [vmem:[#allocation3 + $0x30] sm:$0xf] %v3770_v43  ;;  %v615_v44 = vadd.f32 %v4374_v30, %v437_v18 }
 0x1b5   : > { %v3773_v45 = vpack.c.bf16 %v615_v44, %v615_v44 }
 0x1b7   : > { %735 = vst [vmem:[#allocation3 + $0x48] sm:$0xf] %v3773_v45 }
 0x1b9   : > { %3716 = vmatmul.mubr.msk.bf16.gmra.mxu0 %vm1272_vm0, %v2032_v17 }
 0x1ba   : > { %2144 = vmatprep.mubr.bf16.mxu0 %v5718_v2 }
 0x1c1   : > { %v392_v47 = vpop.permute.xlu1 %391  ;;  %3717 = vmatmul.mubr.msk.bf16.gmra.mxu0 %vm1272_vm0, %v2033_v20 }
 0x1c2   : > { %v580_v21 = vadd.f32 %v4354_v8, %v392_v47  ;;  %2154 = vmatprep.mubr.bf16.mxu0 %v5718_v2 }
 0x1c4   : > { %v3764_v48 = vpack.c.bf16 %v580_v21, %v580_v21 }
 0x1c5   : > { %v402_v49 = vpop.permute.xlu1 %401 }
 0x1c6   : > { %726 = vst [vmem:[#allocation3] sm:$0xf] %v3764_v48  ;;  %v588_v30 = vadd.f32 %v4352_v5, %v402_v49 }
 0x1c8   : > { %v3766_v50 = vpack.c.bf16 %v588_v30, %v588_v30 }
 0x1c9   : > { %v407_v51 = vpop.permute.xlu1 %406  ;;  %3718 = vmatmul.mubr.msk.bf16.gmra.mxu0 %vm1272_vm0, %v2034_v34 }
 0x1ca   : > { %728 = vst [vmem:[#allocation3 + $0x10] sm:$0xf] %v3766_v50  ;;  %v591_v52 = vadd.f32 %v4356_v13, %v407_v51  ;;  %2164 = vmatprep.mubr.bf16.mxu0 %v5718_v2 }
 0x1cc   : > { %v3767_v53 = vpack.c.bf16 %v591_v52, %v591_v52 }
 0x1cd   : > { %v417_v54 = vpop.permute.xlu1 %416 }
 0x1ce   : > { %729 = vst [vmem:[#allocation3 + $0x18] sm:$0xf] %v3767_v53  ;;  %v599_v8 = vadd.f32 %v4366_v25, %v417_v54 }
 0x1d0   : > { %v3769_v55 = vpack.c.bf16 %v599_v8, %v599_v8 }
 0x1d1   : > { %v427_v56 = vpop.permute.xlu1 %426  ;;  %3719 = vmatmul.mubr.msk.bf16.gmra.mxu0 %vm1272_vm0, %v2035_v42 }
 0x1d2   : > { %731 = vst [vmem:[#allocation3 + $0x28] sm:$0xf] %v3769_v55  ;;  %v607_v5 = vadd.f32 %v4364_v24, %v427_v56  ;;  %2174 = vmatprep.mubr.bf16.mxu0 %v5718_v2 }
 0x1d4   : > { %v3771_v57 = vpack.c.bf16 %v607_v5, %v607_v5 }
 0x1d5   : > { %v432_v58 = vpop.permute.xlu1 %431 }
 0x1d6   : > { %733 = vst [vmem:[#allocation3 + $0x38] sm:$0xf] %v3771_v57  ;;  %v612_v13 = vadd.f32 %v4370_v27, %v432_v58 }
 0x1d8   : > { %v3772_v59 = vpack.c.bf16 %v612_v13, %v612_v13 }
 0x1d9   : > { %3720 = vmatmul.mubr.msk.bf16.gmra.mxu0 %vm1272_vm0, %v2036_v46 }
 0x1da   : > { %734 = vst [vmem:[#allocation3 + $0x40] sm:$0xf] %v3772_v59  ;;  %2184 = vmatprep.mubr.bf16.mxu0 %v5718_v2  ;;  %v363_v59 = vld [vmem:[%s5712_s2 + $0x70] sm:$0xff] }
 0x1e1   : > { %3721 = vmatmul.mubr.msk.bf16.gmra.mxu0 %vm1272_vm0, %v2037_v23 }
 0x1e2   : > { %3138 = vmatprep.mubr.bf16.mxu0 %v5718_v2 }
 0x229   : > { %v4456_v25 = vpop.f32.mrf.mxu0 }
 0x22b   : > { %v4458_v24 = vpop.f32.mrf.mxu0 }
 0x22c   : > { %v1410_v60 = vmax.f32 %v4456_v25, %v4458_v24 }
 0x22d   : > { %v4462_v61 = vpop.f32.mrf.mxu0 }
 0x22e   : > { %1411 = vmax.xlane.f32.xlu1 %v1410_v60  ;;  %v4574_v60 = vld [vmem:[%s5712_s2 + $0x78] sm:$0xff] }
 0x22f   : > { %v4464_v27 = vpop.f32.mrf.mxu0  ;;  %5770 = vst [vmem:[#allocation16_spill] sm:$0xff] %v4574_v60 }
 0x230   : > { %v1413_v62 = vmax.f32 %v4462_v61, %v4464_v27 }
 0x231   : > { %v4468_v63 = vpop.f32.mrf.mxu0 }
 0x232   : > { %1414 = vmax.xlane.f32.xlu0 %v1413_v62 }
 0x233   : > { %v4470_v0 = vpop.f32.mrf.mxu0 }
 0x234   : > { %v1416_v1 = vmax.f32 %v4468_v63, %v4470_v0 }
 0x235   : > { %v4474_v3 = vpop.f32.mrf.mxu0 }
 0x236   : > { %1417 = vmax.xlane.f32.xlu1 %v1416_v1 }
 0x237   : > { %v4476_v4 = vpop.f32.mrf.mxu0 }
 0x238   : > { %v1419_v6 = vmax.f32 %v4474_v3, %v4476_v4 }
 0x239   : > { %v4480_v7 = vpop.f32.mrf.mxu0 }
 0x23a   : > { %1420 = vmax.xlane.f32.xlu0 %v1419_v6 }
 0x23b   : > { %v4482_v9 = vpop.f32.mrf.mxu0 }
 0x23c   : > { %v1422_v10 = vmax.f32 %v4480_v7, %v4482_v9 }
 0x23d   : > { %v4486_v11 = vpop.f32.mrf.mxu0 }
 0x23e   : > { %1423 = vmax.xlane.f32.xlu1 %v1422_v10 }
 0x23f   : > { %v4488_v12 = vpop.f32.mrf.mxu0 }
 0x240   : > { %v1425_v14 = vmax.f32 %v4486_v11, %v4488_v12 }
 0x241   : > { %v4492_v15 = vpop.f32.mrf.mxu0 }
 0x242   : > { %1426 = vmax.xlane.f32.xlu0 %v1425_v14 }
 0x243   : > { %v4494_v16 = vpop.f32.mrf.mxu0 }
 0x244   : > { %v1428_v17 = vmax.f32 %v4492_v15, %v4494_v16 }
 0x245   : > { %v4498_v19 = vpop.f32.mrf.mxu0 }
 0x246   : > { %1429 = vmax.xlane.f32.xlu1 %v1428_v17 }
 0x247   : > { %v4500_v20 = vpop.f32.mrf.mxu0 }
 0x248   : > { %v1431_v22 = vmax.f32 %v4498_v19, %v4500_v20 }
 0x249   : > { %v4504_v28 = vpop.f32.mrf.mxu0 }
 0x24a   : > { %1432 = vmax.xlane.f32.xlu0 %v1431_v22 }
 0x24b   : > { %v4506_v31 = vpop.f32.mrf.mxu0 }
 0x24c   : > { %v1434_v34 = vmax.f32 %v4504_v28, %v4506_v31 }
 0x24d   : > { %v4510_v37 = vpop.f32.mrf.mxu0 }
 0x24e   : > { %1435 = vmax.xlane.f32.xlu1 %v1434_v34 }
 0x24f   : > { %v4512_v38 = vpop.f32.mrf.mxu0 }
 0x250   : > { %v1437_v39 = vmax.f32 %v4510_v37, %v4512_v38 }
 0x251   : > { %v4516_v40 = vpop.f32.mrf.mxu0 }
 0x252   : > { %1438 = vmax.xlane.f32.xlu0 %v1437_v39 }
 0x253   : > { %v4518_v41 = vpop.f32.mrf.mxu0 }
 0x254   : > { %v1440_v42 = vmax.f32 %v4516_v40, %v4518_v41 }
 0x255   : > { %v4522_v43 = vpop.f32.mrf.mxu0 }
 0x256   : > { %1441 = vmax.xlane.f32.xlu1 %v1440_v42 }
 0x257   : > { %v4524_v18 = vpop.f32.mrf.mxu0 }
 0x258   : > { %v1443_v44 = vmax.f32 %v4522_v43, %v4524_v18 }
 0x259   : > { %v4528_v45 = vpop.f32.mrf.mxu0 }
 0x25a   : > { %1444 = vmax.xlane.f32.xlu0 %v1443_v44 }
 0x25b   : > { %v4530_v46 = vpop.f32.mrf.mxu0 }
 0x25c   : > { %v1446_v23 = vmax.f32 %v4528_v45, %v4530_v46 }
 0x25d   : > { %v4534_v47 = vpop.f32.mrf.mxu0 }
 0x25e   : > { %1447 = vmax.xlane.f32.xlu0 %v1446_v23 }
 0x25f   : > { %v4536_v21 = vpop.f32.mrf.mxu0 }
 0x260   : > { %v1449_v48 = vmax.f32 %v4534_v47, %v4536_v21 }
 0x261   : > { %v4540_v49 = vpop.f32.mrf.mxu0 }
 0x262   : > { %1450 = vmax.xlane.f32.xlu0 %v1449_v48 }
 0x263   : > { %v4542_v30 = vpop.f32.mrf.mxu0 }
 0x264   : > { %v1452_v50 = vmax.f32 %v4540_v49, %v4542_v30 }
 0x265   : > { %v4546_v51 = vpop.f32.mrf.mxu0 }
 0x266   : > { %1453 = vmax.xlane.f32.xlu0 %v1452_v50 }
 0x267   : > { %v4548_v52 = vpop.f32.mrf.mxu0 }
 0x268   : > { %v1455_v53 = vmax.f32 %v4546_v51, %v4548_v52 }
 0x269   : > { %v4552_v54 = vpop.f32.mrf.mxu0 }
 0x26a   : > { %1456 = vmax.xlane.f32.xlu1 %v1455_v53 }
 0x26b   : > { %v4554_v8 = vpop.f32.mrf.mxu0 }
 0x26c   : > { %5765 = vst [vmem:[#allocation11_spill] sm:$0xff] %v4554_v8  ;;  %v2195_v33 = vmax.f32 %v4552_v54, %v4554_v8 }
 0x26d   : > { %v4556_v55 = vpop.f32.mrf.mxu0 }
 0x26e   : > { %5766 = vst [vmem:[#allocation12_spill] sm:$0xff] %v4556_v55 }
 0x26f   : > { %v4558_v56 = vpop.f32.mrf.mxu0 }
 0x270   : > { %5767 = vst [vmem:[#allocation13_spill] sm:$0xff] %v4558_v56  ;;  %v2198_v2 = vmax.f32 %v4556_v55, %v4558_v56 }
 0x271   : > { %v4560_v5 = vpop.f32.mrf.mxu0 }
 0x273   : > { %v4562_v57 = vpop.f32.mrf.mxu0 }
 0x275   : > { %v4564_v58 = vpop.f32.mrf.mxu0 }
 0x276   : > { %5768 = vst [vmem:[#allocation14_spill] sm:$0xff] %v4564_v58 }
 0x277   : > { %v4566_v13 = vpop.f32.mrf.mxu0 }
 0x278   : > { %5769 = vst [vmem:[#allocation15_spill] sm:$0xff] %v4566_v13  ;;  %v2204_v36 = vmax.f32 %v4564_v58, %v4566_v13  ;;  %v2201_v13 = vmax.f32 %v4560_v5, %v4562_v57 }
 0x279   : > { %v4576_v62 = vpop.f32.mrf.mxu0 }
 0x27b   : > { %441 = vperm.xlu1 %3952, %v363_v59   ;;  %v4578_v1 = vpop.f32.mrf.mxu0 }
 0x27c   : > { %446 = vperm.xlu0 %3951, %v4574_v60   ;;  %v2207_v58 = vmax.f32 %v4576_v62, %v4578_v1 }
 0x27d   : > { %v4581_v6 = vpop.f32.mrf.mxu0 }
 0x27f   : > { %v4583_v10 = vpop.f32.mrf.mxu0 }
 0x280   : > { %5771 = vst [vmem:[#allocation17_spill] sm:$0xff] %v4583_v10  ;;  %v2210_v55 = vmax.f32 %v4581_v6, %v4583_v10 }
 0x281   : > { %v4585_v14 = vpop.f32.mrf.mxu0 }
 0x283   : > { %v4587_v17 = vpop.f32.mrf.mxu0 }
 0x284   : > { %v2213_v29 = vmax.f32 %v4585_v14, %v4587_v17 }
 0x285   : > { %v4589_v22 = vpop.f32.mrf.mxu0 }
 0x287   : > { %v4591_v34 = vpop.f32.mrf.mxu0 }
 0x289   : > { %v4593_v39 = vpop.f32.mrf.mxu0 }
 0x28b   : > { %v4595_v42 = vpop.f32.mrf.mxu0 }
 0x28d   : > { %v4597_v44 = vpop.f32.mrf.mxu0 }
 0x28f   : > { %v4599_v23 = vpop.f32.mrf.mxu0 }
 0x290   : > { %5772 = vst [vmem:[#allocation18_spill] sm:$0xff] %v4599_v23  ;;  %v2222_v10 = vmax.f32 %v4597_v44, %v4599_v23 }
 0x291   : > { %v4601_v48 = vpop.f32.mrf.mxu0 }
 0x293   : > { %v4603_v50 = vpop.f32.mrf.mxu0 }
 0x294   : > { %v2225_v23 = vmax.f32 %v4601_v48, %v4603_v50 }
 0x295   : > { %v4605_v53 = vpop.f32.mrf.mxu0 }
 0x297   : > { %v4607_v59 = vpop.f32.mrf.mxu0 }
 0x298   : > { %5773 = vst [vmem:[#allocation19_spill] sm:$0xff] %v4607_v59 }
 0x299   : > { %v4611_v35 = vpop.f32.mrf.mxu0 }
 0x29a   : > { %5774 = vst [vmem:[#allocation20_spill] sm:$0xff] %v4611_v35 }
 0x29b   : > { %2199 = vmax.xlane.f32.xlu0 %v2198_v2  ;;  %v4613_v32 = vpop.f32.mrf.mxu0  ;;  %v3976_v2 = vld [vmem:[%s5711_s1 + $0x18] sm:$0xff]  }
 0x29c   : > { %5775 = vst [vmem:[#allocation21_spill] sm:$0xff] %v4613_v32  ;;  %3909 = vmatmul.mubr.bf16.gmra.mxu1 %v3976_v2  ;;  %v2228_v2 = vmax.f32 %v4605_v53, %v4607_v59 }
 0x29d   : > { %v4619_v60 = vpop.f32.mrf.mxu0 }
 0x29f   : > { %2205 = vmax.xlane.f32.xlu0 %v2204_v36  ;;  %2196 = vmax.xlane.f32.xlu1 %v2195_v33  ;;  %v4627_v56 = vpop.f32.mrf.mxu0  ;;  %v2216_v36 = vmax.f32 %v4589_v22, %v4591_v34 }
 0x2a0   : > { %5776 = vst [vmem:[#allocation22_spill] sm:$0xff] %v4627_v56 }
 0x2a1   : > { %v4633_v33 = vpop.f32.mrf.mxu0 }
 0x2a3   : > { %2211 = vmax.xlane.f32.xlu0 %v2210_v55  ;;  %2202 = vmax.xlane.f32.xlu1 %v2201_v13  ;;  %v4639_v8 = vpop.f32.mrf.mxu0  ;;  %v3977_v13 = vld [vmem:[%s5711_s1 + $0x20] sm:$0xff]  }
 0x2a4   : > { %3912 = vmatprep.mubr.bf16.mxu1 %v3977_v13  ;;  %v3979_v13 = vld [vmem:[%s5711_s1 + $0x30] sm:$0xff]  }
 0x2a5   : > { %v4645_v55 = vpop.f32.mrf.mxu0 }
 0x2a6   : > { %5777 = vst [vmem:[#allocation23_spill] sm:$0xff] %v4645_v55 }
 0x2a7   : > { %2217 = vmax.xlane.f32.xlu0 %v2216_v36  ;;  %2208 = vmax.xlane.f32.xlu1 %v2207_v58  ;;  %v2219_v58 = vmax.f32 %v4593_v39, %v4595_v42  ;;  %v3978_v36 = vld [vmem:[%s5711_s1 + $0x28] sm:$0xff]  }
 0x2a8   : > { %3913 = vmatmul.mubr.bf16.gmra.mxu1 %v3978_v36 }
 0x2a9   : > { %3916 = vmatprep.mubr.bf16.mxu1 %v3979_v13 }
 0x2ab   : > { %2223 = vmax.xlane.f32.xlu0 %v2222_v10  ;;  %2214 = vmax.xlane.f32.xlu1 %v2213_v29  ;;  %v4657_v10 = vpop.f32.mrf.mxu0  ;;  %v2234_v29 = vmax.f32 %v4619_v60, %v4627_v56 }
 0x2ac   : > { %5778 = vst [vmem:[#allocation24_spill] sm:$0xff] %v4657_v10  ;;  %v2240_v59 = vmax.f32 %v4645_v55, %v4657_v10  ;;  %v2237_v10 = vmax.f32 %v4633_v33, %v4639_v8 }
 0x2af   : > { %2229 = vmax.xlane.f32.xlu0 %v2228_v2  ;;  %2220 = vmax.xlane.f32.xlu1 %v2219_v58  ;;  %v2231_v2 = vmax.f32 %v4611_v35, %v4613_v32  ;;  %v3980_v58 = vld [vmem:[%s5711_s1 + $0x38] sm:$0xff]  }
 0x2b0   : > { %3917 = vmatmul.mubr.bf16.gmra.mxu1 %v3980_v58 }
 0x2b3   : > { %2235 = vmax.xlane.f32.xlu0 %v2234_v29  ;;  %2226 = vmax.xlane.f32.xlu1 %v2225_v23 }
 0x2b7   : > { %v1412_v36 = vpop.xlane.xlu1 %1411  ;;  %2241 = vmax.xlane.f32.xlu0 %v2240_v59  ;;  %2232 = vmax.xlane.f32.xlu1 %v2231_v2  ;;  %v3981_v59 = vld [vmem:[%s5711_s1 + $0x40] sm:$0xff]  }
 0x2b8   : > { %v1458_v23 = vsub.f32 %v4456_v25, %v1412_v36  ;;  %v1459_v29 = vsub.f32 %v4458_v24, %v1412_v36  ;;  %v3982_v25 = vld [vmem:[%s5711_s1 + $0x48] sm:$0xff]   ;;  %3920 = vmatprep.mubr.bf16.mxu1 %v3981_v59 }
 0x2b9   : > { %3921 = vmatmul.mubr.bf16.gmra.mxu1 %v3982_v25 }
 0x2ba   : > { %v1490_v55 = vmul.f32 1.442695, %v1458_v23  ;;  %v1492_v56 = vmul.f32 1.442695, %v1459_v29 }
 0x2bb   : > { %2238 = vmax.xlane.f32.xlu1 %v2237_v10  ;;  %v1415_v32 = vpop.xlane.xlu0 %1414 }
 0x2bc   : > { %4007 = vpow2.f32 %v1490_v55  ;;  %v1460_v35 = vsub.f32 %v4462_v61, %v1415_v32  ;;  %v1461_v13 = vsub.f32 %v4464_v27, %v1415_v32  ;;  %v5779_v32 = vmov 0  }
 0x2bd   : > { %4009 = vpow2.f32 %v1492_v56  ;;  %1857 = vmatprep.mubr.bf16.mxu1 %v5779_v32  ;;  %v5794_v32 = vld [vmem:[#allocation15_spill] sm:$0xff] }
 0x2be   : > { %v1494_v24 = vmul.f32 1.442695, %v1460_v35  ;;  %v1496_v2 = vmul.f32 1.442695, %v1461_v13 }
 0x2bf   : > { %v1418_v58 = vpop.xlane.xlu1 %1417 }
 0x2c0   : > { %4011 = vpow2.f32 %v1494_v24  ;;  %v1462_v55 = vsub.f32 %v4468_v63, %v1418_v58  ;;  %v1463_v61 = vsub.f32 %v4470_v0, %v1418_v58 }
 0x2c1   : > { %4013 = vpow2.f32 %v1496_v2 }
 0x2c2   : > { %v1498_v27 = vmul.f32 1.442695, %v1462_v55  ;;  %v1500_v10 = vmul.f32 1.442695, %v1463_v61 }
 0x2c3   : > { %v1421_v56 = vpop.xlane.xlu0 %1420 }
 0x2c4   : > { %4015 = vpow2.f32 %v1498_v27  ;;  %v1464_v36 = vsub.f32 %v4474_v3, %v1421_v56  ;;  %v1465_v35 = vsub.f32 %v4476_v4, %v1421_v56 }
 0x2c5   : > { %4017 = vpow2.f32 %v1500_v10 }
 0x2c6   : > { %v1502_v23 = vmul.f32 1.442695, %v1464_v36  ;;  %v1504_v29 = vmul.f32 1.442695, %v1465_v35 }
 0x2c7   : > { %v1424_v13 = vpop.xlane.xlu1 %1423 }
 0x2c8   : > { %4019 = vpow2.f32 %v1502_v23  ;;  %v1466_v63 = vsub.f32 %v4480_v7, %v1424_v13  ;;  %v1467_v0 = vsub.f32 %v4482_v9, %v1424_v13 }
 0x2c9   : > { %v4692_v59 = vpop.eup %4007  ;;  %4021 = vpow2.f32 %v1504_v29 }
 0x2ca   : > { %v4694_v25 = vpop.eup %4009  ;;  %v1506_v24 = vmul.f32 1.442695, %v1466_v63  ;;  %v1508_v2 = vmul.f32 1.442695, %v1467_v0 }
 0x2cb   : > { %v1427_v58 = vpop.xlane.xlu0 %1426  ;;  %v1554_v3 = vadd.f32 %v4694_v25, %v4692_v59 }
 0x2cc   : > { %4023 = vpow2.f32 %v1506_v24  ;;  %v1468_v4 = vsub.f32 %v4486_v11, %v1427_v58  ;;  %v1469_v55 = vsub.f32 %v4488_v12, %v1427_v58 }
 0x2cd   : > { %v4700_v61 = vpop.eup %4011  ;;  %4025 = vpow2.f32 %v1508_v2  ;;  %1555 = vadd.xlane.f32.xlu1 %v1554_v3 }
 0x2ce   : > { %v4702_v7 = vpop.eup %4013  ;;  %v1510_v9 = vmul.f32 1.442695, %v1468_v4  ;;  %v1512_v27 = vmul.f32 1.442695, %v1469_v55 }
 0x2cf   : > { %v1430_v10 = vpop.xlane.xlu1 %1429  ;;  %v1557_v56 = vadd.f32 %v4702_v7, %v4700_v61 }
 0x2d0   : > { %4027 = vpow2.f32 %v1510_v9  ;;  %v1470_v36 = vsub.f32 %v4492_v15, %v1430_v10  ;;  %v1471_v35 = vsub.f32 %v4494_v16, %v1430_v10 }
 0x2d1   : > { %v4708_v11 = vpop.eup %4015  ;;  %4029 = vpow2.f32 %v1512_v27  ;;  %1558 = vadd.xlane.f32.xlu0 %v1557_v56 }
 0x2d2   : > { %v4710_v12 = vpop.eup %4017  ;;  %v1514_v23 = vmul.f32 1.442695, %v1470_v36  ;;  %v1516_v29 = vmul.f32 1.442695, %v1471_v35 }
 0x2d3   : > { %v1433_v13 = vpop.xlane.xlu0 %1432  ;;  %v1560_v63 = vadd.f32 %v4710_v12, %v4708_v11 }
 0x2d4   : > { %4031 = vpow2.f32 %v1514_v23  ;;  %v1472_v0 = vsub.f32 %v4498_v19, %v1433_v13  ;;  %v1473_v24 = vsub.f32 %v4500_v20, %v1433_v13 }
 0x2d5   : > { %v4716_v15 = vpop.eup %4019  ;;  %4033 = vpow2.f32 %v1516_v29  ;;  %1561 = vadd.xlane.f32.xlu1 %v1560_v63 }
 0x2d6   : > { %v4718_v16 = vpop.eup %4021  ;;  %v1518_v2 = vmul.f32 1.442695, %v1472_v0  ;;  %v1520_v58 = vmul.f32 1.442695, %v1473_v24 }
 0x2d7   : > { %v1436_v3 = vpop.xlane.xlu1 %1435  ;;  %v1563_v4 = vadd.f32 %v4718_v16, %v4716_v15 }
 0x2d8   : > { %4035 = vpow2.f32 %v1518_v2  ;;  %v1474_v55 = vsub.f32 %v4504_v28, %v1436_v3  ;;  %v1475_v9 = vsub.f32 %v4506_v31, %v1436_v3 }
 0x2d9   : > { %v4724_v19 = vpop.eup %4023  ;;  %4037 = vpow2.f32 %v1520_v58  ;;  %1564 = vadd.xlane.f32.xlu0 %v1563_v4 }
 0x2da   : > { %v4726_v20 = vpop.eup %4025  ;;  %v1522_v27 = vmul.f32 1.442695, %v1474_v55  ;;  %v1524_v10 = vmul.f32 1.442695, %v1475_v9 }
 0x2db   : > { %v1439_v56 = vpop.xlane.xlu0 %1438  ;;  %v1566_v36 = vadd.f32 %v4726_v20, %v4724_v19 }
 0x2dc   : > { %4039 = vpow2.f32 %v1522_v27  ;;  %v1476_v35 = vsub.f32 %v4510_v37, %v1439_v56  ;;  %v1477_v23 = vsub.f32 %v4512_v38, %v1439_v56 }
 0x2dd   : > { %v4732_v28 = vpop.eup %4027  ;;  %4041 = vpow2.f32 %v1524_v10  ;;  %1567 = vadd.xlane.f32.xlu1 %v1566_v36 }
 0x2de   : > { %v4734_v31 = vpop.eup %4029  ;;  %v1526_v29 = vmul.f32 1.442695, %v1476_v35  ;;  %v1528_v13 = vmul.f32 1.442695, %v1477_v23 }
 0x2df   : > { %v1442_v63 = vpop.xlane.xlu1 %1441  ;;  %v1569_v0 = vadd.f32 %v4734_v31, %v4732_v28 }
 0x2e0   : > { %4043 = vpow2.f32 %v1526_v29  ;;  %v1478_v24 = vsub.f32 %v4516_v40, %v1442_v63  ;;  %v1479_v2 = vsub.f32 %v4518_v41, %v1442_v63 }
 0x2e1   : > { %v4740_v37 = vpop.eup %4031  ;;  %4045 = vpow2.f32 %v1528_v13  ;;  %1570 = vadd.xlane.f32.xlu0 %v1569_v0 }
 0x2e2   : > { %v4742_v38 = vpop.eup %4033  ;;  %v1530_v58 = vmul.f32 1.442695, %v1478_v24  ;;  %v1532_v3 = vmul.f32 1.442695, %v1479_v2 }
 0x2e3   : > { %v1445_v4 = vpop.xlane.xlu0 %1444  ;;  %v1572_v55 = vadd.f32 %v4742_v38, %v4740_v37 }
 0x2e4   : > { %4047 = vpow2.f32 %v1530_v58  ;;  %v1480_v9 = vsub.f32 %v4522_v43, %v1445_v4  ;;  %v1481_v27 = vsub.f32 %v4524_v18, %v1445_v4 }
 0x2e5   : > { %v4748_v40 = vpop.eup %4035  ;;  %4049 = vpow2.f32 %v1532_v3  ;;  %1573 = vadd.xlane.f32.xlu1 %v1572_v55 }
 0x2e6   : > { %v4750_v41 = vpop.eup %4037  ;;  %v1534_v10 = vmul.f32 1.442695, %v1480_v9  ;;  %v1536_v56 = vmul.f32 1.442695, %v1481_v27 }
 0x2e7   : > { %v1448_v36 = vpop.xlane.xlu0 %1447  ;;  %v1575_v35 = vadd.f32 %v4750_v41, %v4748_v40 }
 0x2e8   : > { %4051 = vpow2.f32 %v1534_v10  ;;  %v1482_v23 = vsub.f32 %v4528_v45, %v1448_v36  ;;  %v1483_v29 = vsub.f32 %v4530_v46, %v1448_v36 }
 0x2e9   : > { %v4756_v43 = vpop.eup %4039  ;;  %4053 = vpow2.f32 %v1536_v56  ;;  %1576 = vadd.xlane.f32.xlu0 %v1575_v35 }
 0x2ea   : > { %v4758_v18 = vpop.eup %4041  ;;  %v1538_v13 = vmul.f32 1.442695, %v1482_v23  ;;  %v1540_v63 = vmul.f32 1.442695, %v1483_v29 }
 0x2eb   : > { %v1451_v0 = vpop.xlane.xlu0 %1450  ;;  %v1578_v24 = vadd.f32 %v4758_v18, %v4756_v43 }
 0x2ec   : > { %4055 = vpow2.f32 %v1538_v13  ;;  %v1484_v2 = vsub.f32 %v4534_v47, %v1451_v0  ;;  %v1485_v58 = vsub.f32 %v4536_v21, %v1451_v0 }
 0x2ed   : > { %v4764_v45 = vpop.eup %4043  ;;  %4057 = vpow2.f32 %v1540_v63  ;;  %1579 = vadd.xlane.f32.xlu1 %v1578_v24 }
 0x2ee   : > { %v4766_v46 = vpop.eup %4045  ;;  %v1542_v3 = vmul.f32 1.442695, %v1484_v2  ;;  %v1544_v4 = vmul.f32 1.442695, %v1485_v58 }
 0x2ef   : > { %v1454_v55 = vpop.xlane.xlu0 %1453  ;;  %v1581_v9 = vadd.f32 %v4766_v46, %v4764_v45 }
 0x2f0   : > { %4059 = vpow2.f32 %v1542_v3  ;;  %v1486_v27 = vsub.f32 %v4540_v49, %v1454_v55  ;;  %v1487_v10 = vsub.f32 %v4542_v30, %v1454_v55 }
 0x2f1   : > { %v4772_v47 = vpop.eup %4047  ;;  %4061 = vpow2.f32 %v1544_v4  ;;  %1582 = vadd.xlane.f32.xlu0 %v1581_v9  ;;  %v5780_v4 = vld [vmem:[#allocation6_spill] sm:$0xff] }
 0x2f2   : > { %v4774_v21 = vpop.eup %4049  ;;  %v1546_v56 = vmul.f32 1.442695, %v1486_v27  ;;  %v1548_v36 = vmul.f32 1.442695, %v1487_v10 }
 0x2f3   : > { %v1457_v35 = vpop.xlane.xlu1 %1456  ;;  %v1584_v23 = vadd.f32 %v4774_v21, %v4772_v47 }
 0x2f4   : > { %4063 = vpow2.f32 %v1546_v56  ;;  %v1488_v29 = vsub.f32 %v4546_v51, %v1457_v35  ;;  %v1489_v13 = vsub.f32 %v4548_v52, %v1457_v35 }
 0x2f5   : > { %v4780_v49 = vpop.eup %4051  ;;  %4065 = vpow2.f32 %v1548_v36  ;;  %1585 = vadd.xlane.f32.xlu1 %v1584_v23 }
 0x2f6   : > { %v4782_v30 = vpop.eup %4053  ;;  %v1550_v63 = vmul.f32 1.442695, %v1488_v29  ;;  %v1552_v0 = vmul.f32 1.442695, %v1489_v13 }
 0x2f7   : > { %v442_v24 = vpop.permute.xlu1 %441  ;;  %v447_v2 = vpop.permute.xlu0 %446  ;;  %v1587_v58 = vadd.f32 %v4782_v30, %v4780_v49 }
 0x2f8   : > { %4067 = vpow2.f32 %v1550_v63  ;;  %v620_v3 = vadd.f32 %v4368_v26, %v442_v24  ;;  %v623_v51 = vadd.f32 %v5780_v4, %v447_v2  ;;  %v4815_v24 = vld [vmem:[%s5712_s2 + $0x80] sm:$0xff]  ;;  %v5734_v2 = vlaneseq  ;;  %v4828_v4 = vld [vmem:[%s5712_s2 + $0x88] sm:$0xff] }
 0x2f9   : > { %v4788_v55 = vpop.eup %4055  ;;  %4069 = vpow2.f32 %v1552_v0  ;;  %1588 = vadd.xlane.f32.xlu0 %v1587_v58  ;;  %v5789_v58 = vmov 0 }
 0x2fa   : > { %5781 = vst [vmem:[#allocation6_spill] sm:$0xff] %v4788_v55  ;;  %v4790_v52 = vpop.eup %4057  ;;  %v3774_v9 = vpack.c.bf16 %v620_v3, %v620_v3  ;;  %v3775_v27 = vpack.c.bf16 %v623_v51, %v623_v51  ;;  %vm4819_vm1 = vcmp.lt.s32.totalorder %v5734_v2, 256  ;;  %v4211_v3 = vmov 0.0  }
 0x2fb   : > { %5782 = vst [vmem:[#allocation25_spill] sm:$0xff] %v4790_v52  ;;  %v1590_v10 = vadd.f32 %v4790_v52, %v4788_v55  ;;  %v5790_v58 = vsel %vm4819_vm1, 4294967295, %v5789_v58  ;;  %1215 = vst.msk [vmem:[#allocation5] sm:$0x3] %vm4819_vm1, %v4211_v3 }
 0x2fc   : > { %736 = vst [vmem:[#allocation3 + $0x50] sm:$0xf] %v3774_v9  ;;  %737 = vst [vmem:[#allocation3 + $0x58] sm:$0xf] %v3775_v27 }
 0x2fd   : > { %v4794_v56 = vpop.eup %4059  ;;  %1591 = vadd.xlane.f32.xlu1 %v1590_v10  ;;  %5791 = vst [vmem:[#allocation32_spill] sm:$0xff] %v5790_v58 }
 0x2fe   : > { %5783 = vst [vmem:[#allocation26_spill] sm:$0xff] %v4794_v56  ;;  %v4796_v36 = vpop.eup %4061 }
 0x2ff   : > { %5784 = vst [vmem:[#allocation27_spill] sm:$0xff] %v4796_v36  ;;  %v1593_v26 = vadd.f32 %v4796_v36, %v4794_v56 }
 0x301   : > { %v4800_v35 = vpop.eup %4063  ;;  %1594 = vadd.xlane.f32.xlu0 %v1593_v26  ;;  %v5792_v26 = vld [vmem:[#allocation11_spill] sm:$0xff] }
 0x302   : > { %5785 = vst [vmem:[#allocation28_spill] sm:$0xff] %v4800_v35  ;;  %v4802_v23 = vpop.eup %4065 }
 0x303   : > { %5786 = vst [vmem:[#allocation29_spill] sm:$0xff] %v4802_v23  ;;  %v1596_v29 = vadd.f32 %v4802_v23, %v4800_v35 }
 0x305   : > { %v4806_v13 = vpop.eup %4067  ;;  %1597 = vadd.xlane.f32.xlu1 %v1596_v29 }
 0x306   : > { %5787 = vst [vmem:[#allocation30_spill] sm:$0xff] %v4806_v13  ;;  %v4808_v63 = vpop.eup %4069 }
 0x307   : > { %5788 = vst [vmem:[#allocation31_spill] sm:$0xff] %v4808_v63  ;;  %v1599_v0 = vadd.f32 %v4808_v63, %v4806_v13 }
 0x309   : > { %1600 = vadd.xlane.f32.xlu0 %v1599_v0  ;;  %v5793_v0 = vld [vmem:[#allocation14_spill] sm:$0xff] }
 0x316   : > { %451 = vperm.xlu1 %3952, %v4815_v24  }
 0x31f   : > { %456 = vperm.xlu0 %3951, %v4828_v4  }
 0x324   : > { %v4831_v51 = vpop.xlane.xlu0 %2199 }
 0x328   : > { %v2197_v9 = vpop.xlane.xlu1 %2196  ;;  %v2206_v27 = vpop.xlane.xlu0 %2205 }
 0x329   : > { %v2243_v10 = vsub.f32 %v4552_v54, %v2197_v9  ;;  %v2244_v29 = vsub.f32 %v5792_v26, %v2197_v9  ;;  %v2249_v2 = vsub.f32 %v5793_v0, %v2206_v27  ;;  %v2250_v58 = vsub.f32 %v5794_v32, %v2206_v27  ;;  %v5795_v54 = vld [vmem:[#allocation17_spill] sm:$0xff] }
 0x32b   : > { %v2275_v3 = vmul.f32 1.442695, %v2243_v10  ;;  %v2277_v63 = vmul.f32 1.442695, %v2244_v29  ;;  %v2287_v13 = vmul.f32 1.442695, %v2249_v2 }
 0x32c   : > { %v2289_v23 = vmul.f32 1.442695, %v2250_v58  ;;  %v2203_v35 = vpop.xlane.xlu1 %2202  ;;  %v2212_v36 = vpop.xlane.xlu0 %2211 }
 0x32d   : > { %4071 = vpow2.f32 %v2275_v3  ;;  %v2247_v56 = vsub.f32 %v4560_v5, %v2203_v35  ;;  %v2248_v52 = vsub.f32 %v4562_v57, %v2203_v35  ;;  %v2253_v55 = vsub.f32 %v4581_v6, %v2212_v36 }
 0x32e   : > { %4073 = vpow2.f32 %v2277_v63  ;;  %v2254_v9 = vsub.f32 %v5795_v54, %v2212_v36 }
 0x32f   : > { %4075 = vpow2.f32 %v2287_v13  ;;  %v2283_v26 = vmul.f32 1.442695, %v2247_v56  ;;  %v2285_v0 = vmul.f32 1.442695, %v2248_v52  ;;  %v2295_v32 = vmul.f32 1.442695, %v2253_v55 }
 0x330   : > { %4077 = vpow2.f32 %v2289_v23  ;;  %v2297_v27 = vmul.f32 1.442695, %v2254_v9  ;;  %v2209_v2 = vpop.xlane.xlu1 %2208  ;;  %v2218_v58 = vpop.xlane.xlu0 %2217 }
 0x331   : > { %4079 = vpow2.f32 %v2283_v26  ;;  %v2251_v10 = vsub.f32 %v4576_v62, %v2209_v2  ;;  %v2252_v5 = vsub.f32 %v4578_v1, %v2209_v2  ;;  %v2257_v57 = vsub.f32 %v4589_v22, %v2218_v58  ;;  %v5796_v22 = vld [vmem:[#allocation18_spill] sm:$0xff] }
 0x332   : > { %4081 = vpow2.f32 %v2285_v0  ;;  %v2258_v6 = vsub.f32 %v4591_v34, %v2218_v58 }
 0x333   : > { %4083 = vpow2.f32 %v2295_v32  ;;  %v2291_v36 = vmul.f32 1.442695, %v2251_v10  ;;  %v2293_v35 = vmul.f32 1.442695, %v2252_v5  ;;  %v2303_v56 = vmul.f32 1.442695, %v2257_v57 }
 0x334   : > { %4085 = vpow2.f32 %v2297_v27  ;;  %v2305_v55 = vmul.f32 1.442695, %v2258_v6  ;;  %v2215_v52 = vpop.xlane.xlu1 %2214  ;;  %v2224_v23 = vpop.xlane.xlu0 %2223 }
 0x335   : > { %4087 = vpow2.f32 %v2291_v36  ;;  %v2255_v13 = vsub.f32 %v4585_v14, %v2215_v52  ;;  %v2256_v62 = vsub.f32 %v4587_v17, %v2215_v52  ;;  %v2261_v1 = vsub.f32 %v4597_v44, %v2224_v23  ;;  %v5797_v44 = vld [vmem:[#allocation19_spill] sm:$0xff] }
 0x336   : > { %4089 = vpow2.f32 %v2293_v35  ;;  %v2262_v63 = vsub.f32 %v5796_v22, %v2224_v23  ;;  %v5798_v23 = vld [vmem:[#allocation22_spill] sm:$0xff] }
 0x337   : > { %4091 = vpow2.f32 %v2303_v56  ;;  %v2299_v34 = vmul.f32 1.442695, %v2255_v13  ;;  %v2301_v29 = vmul.f32 1.442695, %v2256_v62  ;;  %v2311_v3 = vmul.f32 1.442695, %v2261_v1 }
 0x338   : > { %4093 = vpow2.f32 %v2305_v55  ;;  %v2313_v54 = vmul.f32 1.442695, %v2262_v63  ;;  %v2221_v9 = vpop.xlane.xlu1 %2220  ;;  %v2230_v26 = vpop.xlane.xlu0 %2229 }
 0x339   : > { %4095 = vpow2.f32 %v2299_v34  ;;  %v2259_v0 = vsub.f32 %v4593_v39, %v2221_v9  ;;  %v2260_v14 = vsub.f32 %v4595_v42, %v2221_v9  ;;  %v2265_v17 = vsub.f32 %v4605_v53, %v2230_v26  ;;  %v5800_v9 = vld [vmem:[#allocation20_spill] sm:$0xff] }
 0x33a   : > { %v4852_v32 = vpop.eup %4071  ;;  %4097 = vpow2.f32 %v2301_v29  ;;  %v2266_v27 = vsub.f32 %v5797_v44, %v2230_v26 }
 0x33b   : > { %v4855_v2 = vpop.eup %4073  ;;  %4099 = vpow2.f32 %v2311_v3  ;;  %v2307_v58 = vmul.f32 1.442695, %v2259_v0  ;;  %v2309_v10 = vmul.f32 1.442695, %v2260_v14  ;;  %v2319_v5 = vmul.f32 1.442695, %v2265_v17 }
 0x33c   : > { %v4857_v57 = vpop.eup %4075  ;;  %4101 = vpow2.f32 %v2313_v54  ;;  %v2321_v6 = vmul.f32 1.442695, %v2266_v27  ;;  %v2227_v39 = vpop.xlane.xlu1 %2226  ;;  %v2339_v42 = vadd.f32 %v4855_v2, %v4852_v32  ;;  %v5801_v0 = vld [vmem:[#allocation21_spill] sm:$0xff]  ;;  %v5802_v17 = vld [vmem:[#allocation23_spill] sm:$0xff] }
 0x33d   : > { %v2236_v36 = vpop.xlane.xlu0 %2235  ;;  %v4861_v53 = vpop.eup %4077  ;;  %4103 = vpow2.f32 %v2307_v58  ;;  %v2263_v35 = vsub.f32 %v4601_v48, %v2227_v39  ;;  %v2264_v56 = vsub.f32 %v4603_v50, %v2227_v39  ;;  %v5804_v58 = vld [vmem:[#allocation24_spill] sm:$0xff] }
 0x33e   : > { %v2269_v55 = vsub.f32 %v4619_v60, %v2236_v36  ;;  %v4866_v52 = vpop.eup %4079  ;;  %4105 = vpow2.f32 %v2309_v10  ;;  %v2270_v13 = vsub.f32 %v5798_v23, %v2236_v36  ;;  %2340 = vadd.xlane.f32.xlu1 %v2339_v42  ;;  %v2348_v62 = vadd.f32 %v4861_v53, %v4857_v57 }
 0x33f   : > { %v4871_v1 = vpop.eup %4081  ;;  %4107 = vpow2.f32 %v2319_v5  ;;  %v2315_v22 = vmul.f32 1.442695, %v2263_v35  ;;  %v2317_v63 = vmul.f32 1.442695, %v2264_v56 }
 0x340   : > { %v2327_v34 = vmul.f32 1.442695, %v2269_v55  ;;  %v4873_v48 = vpop.eup %4083  ;;  %4109 = vpow2.f32 %v2321_v6  ;;  %v2329_v50 = vmul.f32 1.442695, %v2270_v13  ;;  %2349 = vadd.xlane.f32.xlu0 %v2348_v62  ;;  %v2233_v60 = vpop.xlane.xlu1 %2232  ;;  %v2345_v3 = vadd.f32 %v4871_v1, %v4866_v52 }
 0x341   : > { %v2242_v29 = vpop.xlane.xlu0 %2241  ;;  %v4877_v54 = vpop.eup %4085  ;;  %4111 = vpow2.f32 %v2315_v22  ;;  %v2267_v26 = vsub.f32 %v5800_v9, %v2233_v60  ;;  %v2268_v14 = vsub.f32 %v5801_v0, %v2233_v60  ;;  %v5810_v60 = vld [vmem:[#allocation12_spill] sm:$0xff] }
 0x342   : > { %5799 = vst [vmem:[#allocation11_spill] sm:$0xff] %v4877_v54  ;;  %v2273_v44 = vsub.f32 %v5802_v17, %v2242_v29  ;;  %v4882_v27 = vpop.eup %4087  ;;  %4113 = vpow2.f32 %v2317_v63  ;;  %v2274_v10 = vsub.f32 %v5804_v58, %v2242_v29  ;;  %2346 = vadd.xlane.f32.xlu1 %v2345_v3  ;;  %v2354_v5 = vadd.f32 %v4877_v54, %v4873_v48 }
 0x343   : > { %5803 = vst [vmem:[#allocation14_spill] sm:$0xff] %v4882_v27  ;;  %v4887_v6 = vpop.eup %4089  ;;  %4115 = vpow2.f32 %v2327_v34  ;;  %v2323_v39 = vmul.f32 1.442695, %v2267_v26  ;;  %v2325_v36 = vmul.f32 1.442695, %v2268_v14  ;;  %v2245_v29 = vsub.f32 %v5810_v60, %v4831_v51 }
 0x344   : > { %5805 = vst [vmem:[#allocation15_spill] sm:$0xff] %v4887_v6  ;;  %v2335_v42 = vmul.f32 1.442695, %v2273_v44  ;;  %v4889_v35 = vpop.eup %4091  ;;  %4117 = vpow2.f32 %v2329_v50  ;;  %v2337_v56 = vmul.f32 1.442695, %v2274_v10  ;;  %2355 = vadd.xlane.f32.xlu0 %v2354_v5  ;;  %v2239_v55 = vpop.xlane.xlu1 %2238  ;;  %v2351_v23 = vadd.f32 %v4887_v6, %v4882_v27  ;;  %v5820_v27 = vld [vmem:[#allocation16_spill] sm:$0xff] }
 0x345   : > { %5806 = vst [vmem:[#allocation17_spill] sm:$0xff] %v4889_v35  ;;  %v4893_v13 = vpop.eup %4093  ;;  %4119 = vpow2.f32 %v2323_v39  ;;  %v2271_v62 = vsub.f32 %v4633_v33, %v2239_v55  ;;  %v2272_v22 = vsub.f32 %v4639_v8, %v2239_v55  ;;  %v5812_v33 = vld [vmem:[#allocation13_spill] sm:$0xff]  ;;  %v2279_v10 = vmul.f32 1.442695, %v2245_v29 }
 0x346   : > { %5807 = vst [vmem:[#allocation18_spill] sm:$0xff] %v4893_v13  ;;  %v4897_v63 = vpop.eup %4095  ;;  %4121 = vpow2.f32 %v2325_v36  ;;  %2352 = vadd.xlane.f32.xlu1 %v2351_v23  ;;  %v2360_v34 = vadd.f32 %v4893_v13, %v4889_v35  ;;  %v2246_v26 = vsub.f32 %v5812_v33, %v4831_v51 }
 0x347   : > { %5808 = vst [vmem:[#allocation19_spill] sm:$0xff] %v4897_v63  ;;  %v4901_v50 = vpop.eup %4097  ;;  %4123 = vpow2.f32 %v2335_v42  ;;  %v2331_v3 = vmul.f32 1.442695, %v2271_v62  ;;  %v2333_v8 = vmul.f32 1.442695, %v2272_v22 }
 0x348   : > { %5809 = vst [vmem:[#allocation22_spill] sm:$0xff] %v4901_v50  ;;  %v4905_v9 = vpop.eup %4099  ;;  %4125 = vpow2.f32 %v2337_v56  ;;  %2361 = vadd.xlane.f32.xlu0 %v2360_v34  ;;  %v2357_v0 = vadd.f32 %v4901_v50, %v4897_v63  ;;  %v2281_v51 = vmul.f32 1.442695, %v2246_v26 }
 0x349   : > { %5811 = vst [vmem:[#allocation20_spill] sm:$0xff] %v4905_v9  ;;  %v4911_v14 = vpop.eup %4101  ;;  %4127 = vpow2.f32 %v2331_v3 }
 0x34a   : > { %5813 = vst [vmem:[#allocation21_spill] sm:$0xff] %v4911_v14  ;;  %v4913_v17 = vpop.eup %4103  ;;  %2358 = vadd.xlane.f32.xlu1 %v2357_v0  ;;  %v2366_v44 = vadd.f32 %v4911_v14, %v4905_v9  ;;  %4129 = vpow2.f32 %v2333_v8 }
 0x34b   : > { %5814 = vst [vmem:[#allocation23_spill] sm:$0xff] %v4913_v17  ;;  %v4917_v58 = vpop.eup %4105  ;;  %4131 = vpow2.f32 %v2279_v10 }
 0x34c   : > { %5815 = vst [vmem:[#allocation24_spill] sm:$0xff] %v4917_v58  ;;  %v4919_v5 = vpop.eup %4107  ;;  %2367 = vadd.xlane.f32.xlu0 %v2366_v44  ;;  %v2363_v39 = vadd.f32 %v4917_v58, %v4913_v17  ;;  %4133 = vpow2.f32 %v2281_v51 }
 0x34d   : > { %5816 = vst [vmem:[#allocation12_spill] sm:$0xff] %v4919_v5  ;;  %v4923_v36 = vpop.eup %4109 }
 0x34e   : > { %v4925_v42 = vpop.eup %4111  ;;  %2364 = vadd.xlane.f32.xlu1 %v2363_v39  ;;  %v2372_v3 = vadd.f32 %v4923_v36, %v4919_v5  ;;  %v5827_v5 = vld [vmem:[#allocation28_spill] sm:$0xff] }
 0x34f   : > { %5817 = vst [vmem:[#allocation13_spill] sm:$0xff] %v4925_v42  ;;  %v4927_v56 = vpop.eup %4113 }
 0x350   : > { %5818 = vst [vmem:[#allocation33_spill] sm:$0xff] %v4927_v56  ;;  %v4929_v55 = vpop.eup %4115  ;;  %v2369_v23 = vadd.f32 %v4927_v56, %v4925_v42 }
 0x351   : > { %5819 = vst [vmem:[#allocation34_spill] sm:$0xff] %v4929_v55  ;;  %v4933_v62 = vpop.eup %4117 }
 0x352   : > { %v4935_v22 = vpop.eup %4119  ;;  %2370 = vadd.xlane.f32.xlu0 %v2369_v23  ;;  %v2378_v34 = vadd.f32 %v4933_v62, %v4929_v55  ;;  %v5828_v55 = vld [vmem:[#allocation29_spill] sm:$0xff] }
 0x353   : > { %v4939_v60 = vpop.eup %4121 }
 0x354   : > { %v4941_v29 = vpop.eup %4123  ;;  %2379 = vadd.xlane.f32.xlu1 %v2378_v34  ;;  %v2375_v0 = vadd.f32 %v4939_v60, %v4935_v22  ;;  %v4966_v34 = vld [vmem:[%s5712_s2 + $0x90] sm:$0xff] }
 0x355   : > { %v4945_v33 = vpop.eup %4125 }
 0x356   : > { %2373 = vadd.xlane.f32.xlu0 %v2372_v3  ;;  %v2384_v26 = vadd.f32 %v4945_v33, %v4941_v29  ;;  %v4949_v8 = vpop.eup %4127  ;;  %v790_v3 = vld [vmem:[%s5712_s2 + $0x20] sm:$0xff] }
 0x357   : > { %v4953_v44 = vpop.eup %4129 }
 0x358   : > { %2385 = vadd.xlane.f32.xlu1 %v2384_v26  ;;  %v4955_v10 = vpop.eup %4131  ;;  %v2381_v51 = vadd.f32 %v4953_v44, %v4949_v8  ;;  %v1556_v26 = vpop.xlane.xlu1 %1555 }
 0x359   : > { %v4959_v39 = vpop.eup %4133 }
 0x35a   : > { %2376 = vadd.xlane.f32.xlu0 %v2375_v0  ;;  %v2342_v23 = vadd.f32 %v4959_v39, %v4955_v10  ;;  %v791_v0 = vld [vmem:[%s5712_s2 + $0x28] sm:$0xff] }
 0x35e   : > { %2382 = vadd.xlane.f32.xlu0 %v2381_v51  ;;  %v1559_v51 = vpop.xlane.xlu0 %1558  ;;  %v1562_v35 = vpop.xlane.xlu1 %1561 }
 0x35f   : > { %4135 = vrcp.f32 %v1559_v51 }
 0x360   : > { %4137 = vrcp.f32 %v1556_v26  ;;  %v797_v26 = vld [vmem:[%s5712_s2 + $0x58] sm:$0xff] }
 0x361   : > { %4139 = vrcp.f32 %v1562_v35  ;;  %v792_v35 = vld [vmem:[%s5712_s2 + $0x30] sm:$0xff] }
 0x362   : > { %2343 = vadd.xlane.f32.xlu0 %v2342_v23  ;;  %v793_v23 = vld [vmem:[%s5712_s2 + $0x38] sm:$0xff]  ;;  %v1565_v9 = vpop.xlane.xlu0 %1564 }
 0x363   : > { %4141 = vrcp.f32 %v1565_v9 }
 0x366   : > { %v1568_v13 = vpop.xlane.xlu1 %1567 }
 0x367   : > { %4143 = vrcp.f32 %v1568_v13  ;;  %v794_v13 = vld [vmem:[%s5712_s2 + $0x40] sm:$0xff] }
 0x369   : > { %461 = vperm.xlu1 %3952, %v4966_v34  }
 0x36a   : > { %v1571_v51 = vpop.xlane.xlu0 %1570 }
 0x36b   : > { %4145 = vrcp.f32 %v1571_v51 }
 0x36c   : > { %v4136_v17 = vpop.eup %4135 }
 0x36d   : > { %828 = vperm.xlu1 %3952, %v790_v3   ;;  %v4981_v3 = vld [vmem:[%s5712_s2 + $0x98] sm:$0xff]  ;;  %v4138_v50 = vpop.eup %4137  ;;  %v5006_v6 = vmul.f32 %v4136_v17, %v4702_v7 }
 0x36e   : > { %v1574_v63 = vpop.xlane.xlu1 %1573  ;;  %v4140_v42 = vpop.eup %4139 }
 0x36f   : > { %4147 = vrcp.f32 %v1574_v63  ;;  %v796_v63 = vld [vmem:[%s5712_s2 + $0x50] sm:$0xff]  ;;  %v5022_v7 = vmul.f32 %v4140_v42, %v4710_v12 }
 0x371   : > { %833 = vperm.xlu1 %3952, %v791_v0   ;;  %v795_v0 = vld [vmem:[%s5712_s2 + $0x48] sm:$0xff] }
 0x372   : > { %v1577_v9 = vpop.xlane.xlu0 %1576 }
 0x373   : > { %4149 = vrcp.f32 %v1577_v9 }
 0x375   : > { %843 = vperm.xlu1 %3952, %v793_v23  }
 0x376   : > { %v1580_v23 = vpop.xlane.xlu1 %1579 }
 0x377   : > { %4151 = vrcp.f32 %v1580_v23  ;;  %v5009_v23 = vmul.f32 %v4138_v50, %v4692_v59 }
 0x378   : > { %466 = vperm.xlu0 %3951, %v4981_v3  }
 0x379   : > { %853 = vperm.xlu1 %3952, %v795_v0   ;;  %v799_v0 = vld [vmem:[%s5712_s2 + $0x68] sm:$0xff] }
 0x37a   : > { %v1583_v51 = vpop.xlane.xlu0 %1582 }
 0x37b   : > { %4153 = vrcp.f32 %v1583_v51  ;;  %v5019_v51 = vmul.f32 %v4138_v50, %v4694_v25 }
 0x37c   : > { %838 = vperm.xlu0 %3951, %v792_v35   ;;  %v5003_v35 = vmul.f32 %v4136_v17, %v4700_v61  ;;  %v798_v61 = vld [vmem:[%s5712_s2 + $0x60] sm:$0xff] }
 0x37d   : > { %863 = vperm.xlu1 %3952, %v797_v26   ;;  %v4142_v26 = vpop.eup %4141 }
 0x37e   : > { %v1586_v14 = vpop.xlane.xlu1 %1585  ;;  %v5025_v59 = vmul.f32 %v4142_v26, %v4716_v15 }
 0x37f   : > { %4155 = vrcp.f32 %v1586_v14 }
 0x380   : > { %848 = vperm.xlu0 %3951, %v794_v13   ;;  %v5012_v13 = vmul.f32 %v4140_v42, %v4708_v11  ;;  %v1651_v11 = vadd.f32 %v5003_v35, %v5009_v23 }
 0x381   : > { %873 = vperm.xlu1 %3952, %v799_v0   ;;  %v4144_v0 = vpop.eup %4143 }
 0x382   : > { %v1589_v9 = vpop.xlane.xlu0 %1588  ;;  %v4146_v17 = vpop.eup %4145  ;;  %v5035_v25 = vmul.f32 %v4144_v0, %v4724_v19  ;;  %v1652_v12 = vadd.f32 %v1651_v11, %v5012_v13  ;;  %v5040_v15 = vmul.f32 %v4144_v0, %v4726_v20  ;;  %v4201_v20 = vld [vmem:[%s5712_s2 + $0x70] sm:$0xff] }
 0x383   : > { %4157 = vrcp.f32 %v1589_v9  ;;  %v4148_v50 = vpop.eup %4147  ;;  %v5048_v19 = vmul.f32 %v4146_v17, %v4734_v31 }
 0x384   : > { %858 = vperm.xlu0 %3951, %v796_v63   ;;  %v1672_v63 = vadd.f32 %v5006_v6, %v5019_v51  ;;  %v1653_v9 = vadd.f32 %v1652_v12, %v5025_v59  ;;  %v5060_v11 = vmul.f32 %v4148_v50, %v4742_v38 }
 0x385   : > { %883 = vperm.xlu1 %3952, %v5820_v27   ;;  %v5030_v27 = vmul.f32 %v4142_v26, %v4718_v16  ;;  %v5044_v26 = vmul.f32 %v4146_v17, %v4732_v28 }
 0x386   : > { %v1592_v14 = vpop.xlane.xlu1 %1591  ;;  %v1673_v42 = vadd.f32 %v1672_v63, %v5022_v7  ;;  %v1654_v28 = vadd.f32 %v1653_v9, %v5035_v25  ;;  %v2963_v63 = vld [vmem:[%s5714_s4 + $0x8] sm:$0xff] }
 0x387   : > { %4159 = vrcp.f32 %v1592_v14 }
 0x388   : > { %868 = vperm.xlu0 %3951, %v798_v61   ;;  %v4150_v61 = vpop.eup %4149  ;;  %v1674_v14 = vadd.f32 %v1673_v42, %v5030_v27 }
 0x389   : > { %893 = vperm.xlu1 %3952, %v4828_v4   ;;  %v5055_v4 = vmul.f32 %v4148_v50, %v4740_v37  ;;  %v4152_v0 = vpop.eup %4151  ;;  %v5067_v12 = vmul.f32 %v4150_v61, %v4748_v40  ;;  %v1655_v37 = vadd.f32 %v1654_v28, %v5044_v26 }
 0x38a   : > { %v1595_v16 = vpop.xlane.xlu0 %1594  ;;  %v1675_v31 = vadd.f32 %v1674_v14, %v5040_v15  ;;  %v4154_v42 = vpop.eup %4153  ;;  %v5080_v40 = vmul.f32 %v4152_v0, %v4758_v18 }
 0x38b   : > { %4161 = vrcp.f32 %v1595_v16  ;;  %v5071_v16 = vmul.f32 %v4150_v61, %v4750_v41  ;;  %v1656_v50 = vadd.f32 %v1655_v37, %v5055_v4  ;;  %v5084_v41 = vmul.f32 %v4154_v42, %v4764_v45 }
 0x38c   : > { %878 = vperm.xlu0 %3951, %v4201_v20   ;;  %v1676_v38 = vadd.f32 %v1675_v31, %v5048_v19  ;;  %v4156_v9 = vpop.eup %4155  ;;  %v5821_v31 = vld [vmem:[#allocation8_spill] sm:$0xff] }
 0x38d   : > { %903 = vperm.xlu1 %3952, %v4981_v3   ;;  %v5076_v3 = vmul.f32 %v4152_v0, %v4756_v43  ;;  %v1657_v61 = vadd.f32 %v1656_v50, %v5067_v12  ;;  %v2965_v43 = vld [vmem:[%s5714_s4 + $0x18] sm:$0xff]  ;;  %v5096_v0 = vmul.f32 %v4156_v9, %v4772_v47  ;;  %v5101_v50 = vmul.f32 %v4156_v9, %v4774_v21 }
 0x38e   : > { %v1598_v17 = vpop.xlane.xlu1 %1597  ;;  %v1677_v14 = vadd.f32 %v1676_v38, %v5060_v11 }
 0x38f   : > { %4163 = vrcp.f32 %v1598_v17  ;;  %v1658_v45 = vadd.f32 %v1657_v61, %v5076_v3  ;;  %v5822_v61 = vld [vmem:[#allocation6_spill] sm:$0xff] }
 0x390   : > { %888 = vperm.xlu0 %3951, %v4815_v24   ;;  %v4158_v24 = vpop.eup %4157  ;;  %v1678_v18 = vadd.f32 %v1677_v14, %v5071_v16 }
 0x391   : > { %2985 = vperm.xlu1 %3952, %v2963_v63   ;;  %v5092_v63 = vmul.f32 %v4154_v42, %v4766_v46  ;;  %v2962_v46 = vld [vmem:[%s5714_s4] sm:$0xff]  ;;  %v5108_v42 = vmul.f32 %v4158_v24, %v4780_v49  ;;  %v1659_v47 = vadd.f32 %v1658_v45, %v5084_v41  ;;  %v5115_v21 = vmul.f32 %v4158_v24, %v4782_v30  ;;  %v2969_v45 = vld [vmem:[%s5714_s4 + $0x38] sm:$0xff] }
 0x392   : > { %v452_v20 = vpop.permute.xlu1 %451  ;;  %v1601_v28 = vpop.xlane.xlu0 %1600  ;;  %v5823_v49 = vld [vmem:[#allocation25_spill] sm:$0xff] }
 0x393   : > { %v628_v17 = vadd.f32 %v5821_v31, %v452_v20  ;;  %4165 = vrcp.f32 %v1601_v28  ;;  %v1679_v20 = vadd.f32 %v1678_v18, %v5080_v40  ;;  %v2964_v18 = vld [vmem:[%s5714_s4 + $0x10] sm:$0xff] }
 0x394   : > { %898 = vperm.xlu0 %3951, %v4966_v34   ;;  %v4160_v37 = vpop.eup %4159  ;;  %v2967_v34 = vld [vmem:[%s5714_s4 + $0x28] sm:$0xff] }
 0x395   : > { %v3776_v38 = vpack.c.bf16 %v628_v17, %v628_v17  ;;  %2995 = vperm.xlu1 %3952, %v2965_v43   ;;  %v1680_v9 = vadd.f32 %v1679_v20, %v5092_v63  ;;  %v1642_v28 = vmul.f32 %v4160_v37, %v5822_v61  ;;  %v1660_v43 = vadd.f32 %v1659_v47, %v5096_v0  ;;  %v5825_v47 = vld [vmem:[#allocation27_spill] sm:$0xff]  ;;  %v5826_v61 = vld [vmem:[#allocation10_spill] sm:$0xff] }
 0x396   : > { %v1643_v31 = vmul.f32 %v4160_v37, %v5823_v49 }
 0x397   : > { %738 = vst [vmem:[#allocation3 + $0x60] sm:$0xf] %v3776_v38  ;;  %v1681_v17 = vadd.f32 %v1680_v9, %v5101_v50  ;;  %v1661_v30 = vadd.f32 %v1660_v43, %v5108_v42  ;;  %v5824_v38 = vld [vmem:[#allocation26_spill] sm:$0xff] }
 0x398   : > { %v4162_v14 = vpop.eup %4161  ;;  %2980 = vperm.xlu0 %3951, %v2962_v46  }
 0x399   : > { %3005 = vperm.xlu1 %3952, %v2967_v34   ;;  %v1644_v20 = vmul.f32 %v4162_v14, %v5824_v38  ;;  %v1645_v46 = vmul.f32 %v4162_v14, %v5825_v47  ;;  %v1682_v37 = vadd.f32 %v1681_v17, %v5115_v21  ;;  %v1662_v49 = vadd.f32 %v1661_v30, %v1642_v28  ;;  %v2966_v38 = vld [vmem:[%s5714_s4 + $0x20] sm:$0xff]  ;;  %v2971_v14 = vld [vmem:[%s5714_s4 + $0x48] sm:$0xff] }
 0x39a   : > { %v457_v24 = vpop.permute.xlu0 %456  ;;  %v5829_v47 = vld [vmem:[#allocation30_spill] sm:$0xff] }
 0x39b   : > { %v631_v9 = vadd.f32 %v5826_v61, %v457_v24  ;;  %v1683_v56 = vadd.f32 %v1682_v37, %v1643_v31  ;;  %v1663_v17 = vadd.f32 %v1662_v49, %v1644_v20  ;;  %v5830_v37 = vld [vmem:[#allocation31_spill] sm:$0xff] }
 0x39c   : > { %v4164_v34 = vpop.eup %4163  ;;  %2990 = vperm.xlu0 %3951, %v2964_v18  }
 0x39d   : > { %v1646_v58 = vmul.f32 %v4164_v34, %v5827_v5  ;;  %v1647_v43 = vmul.f32 %v4164_v34, %v5828_v55  ;;  %v3777_v54 = vpack.c.bf16 %v631_v9, %v631_v9  ;;  %3015 = vperm.xlu1 %3952, %v2969_v45   ;;  %v1684_v24 = vadd.f32 %v1683_v56, %v1645_v46  ;;  %v2968_v45 = vld [vmem:[%s5714_s4 + $0x30] sm:$0xff]  ;;  %v2973_v9 = vld [vmem:[%s5714_s4 + $0x58] sm:$0xff] }
 0x39f   : > { %739 = vst [vmem:[#allocation3 + $0x68] sm:$0xf] %v3777_v54  ;;  %v1664_v18 = vadd.f32 %v1663_v17, %v1646_v58  ;;  %v1685_v5 = vadd.f32 %v1684_v24, %v1647_v43  ;;  %v1774_v24 = vpack.c.bf16 %v1645_v46, %v1643_v31  ;;  %v1772_v31 = vpack.c.bf16 %v5115_v21, %v5101_v50  ;;  %v2972_v46 = vld [vmem:[%s5714_s4 + $0x50] sm:$0xff] }
 0x3a0   : > { %v4166_v30 = vpop.eup %4165  ;;  %3000 = vperm.xlu0 %3951, %v2966_v38   ;;  %v1771_v50 = vpack.c.bf16 %v5108_v42, %v5096_v0  ;;  %v1769_v0 = vpack.c.bf16 %v5084_v41, %v5076_v3  ;;  %v1766_v3 = vpack.c.bf16 %v5048_v19, %v5040_v15  ;;  %v1762_v15 = vpack.c.bf16 %v5006_v6, %v5019_v51 }
 0x3a1   : > { %v1648_v55 = vmul.f32 %v4166_v30, %v5829_v47  ;;  %v1649_v61 = vmul.f32 %v4166_v30, %v5830_v37  ;;  %3025 = vperm.xlu1 %3952, %v2971_v14   ;;  %v2970_v14 = vld [vmem:[%s5714_s4 + $0x40] sm:$0xff]  ;;  %v2975_v30 = vld [vmem:[%s5714_s4 + $0x68] sm:$0xff]  ;;  %v4212_v47 = vmov 1966171168   ;;  %v1761_v19 = vpack.c.bf16 %v5003_v35, %v5009_v23 }
 0x3a3   : > { %v1665_v34 = vadd.f32 %v1664_v18, %v1648_v55  ;;  %v1686_v56 = vadd.f32 %v1685_v5, %v1649_v61  ;;  %v1776_v54 = vpack.c.bf16 %v1649_v61, %v1647_v43  ;;  %v1775_v49 = vpack.c.bf16 %v1648_v55, %v1646_v58  ;;  %v2977_v61 = vld [vmem:[%s5714_s4 + $0x78] sm:$0xff] }
 0x3a4   : > { %3010 = vperm.xlu0 %3951, %v2968_v45   ;;  %v1697_v18 = vunpack.c.l.s4 %v4212_v47  ;;  %v1773_v58 = vpack.c.bf16 %v1644_v20, %v1642_v28  ;;  %v1767_v47 = vpack.c.bf16 %v5067_v12, %v5055_v4  ;;  %v1763_v4 = vpack.c.bf16 %v5025_v59, %v5012_v13  ;;  %v5202_v12 = vpop.f32.mrf.mxu1  ;;  %v3984_v13 = vld [vmem:[#allocation3 + $0x10] ss:$8 sps:$4 sm:$0xff]  }
 0x3a5   : > { %v1666_v38 = vrot.slane %v1665_v34, 4  ;;  %v1687_v17 = vrot.slane %v1686_v56, 4  ;;  %3035 = vperm.xlu1 %3952, %v2973_v9   ;;  %1825 = vmatprep.subr.bf16.mxu1 %v1776_v54  ;;  %v5831_v9 = vlaneseq  ;;  %v1770_v54 = vpack.c.bf16 %v5092_v63, %v5080_v40  ;;  %v2976_v40 = vld [vmem:[%s5714_s4 + $0x70] sm:$0xff] }
 0x3a6   : > { %1826 = vmatpush1.bf16.msra.mxu1 %v1775_v49  ;;  %v1698_v45 = vunpack.c.0.s8 %v1697_v18  ;;  %v2974_v49 = vld [vmem:[%s5714_s4 + $0x60] sm:$0xff] }
 0x3a7   : > { %v1667_v5 = vadd.f32 %v1666_v38, %v1665_v34  ;;  %v1688_v43 = vadd.f32 %v1687_v17, %v1686_v56  ;;  %1827 = vmatprep.subr.bf16.mxu1 %v1774_v24  ;;  %v5164_v34 = vshrl.u32 %v5831_v9, 7  ;;  %v3986_v9 = vld [vmem:[#allocation3 + $0x30] ss:$8 sps:$4 sm:$0xff]  }
 0x3a8   : > { %3020 = vperm.xlu0 %3951, %v2970_v14   ;;  %v1768_v14 = vpack.c.bf16 %v5071_v16, %v5060_v11  ;;  %v1765_v16 = vpack.c.bf16 %v5044_v26, %v5035_v25  ;;  %v3983_v25 = vld [vmem:[#allocation3] ss:$8 sps:$4 sm:$0xff]   ;;  %v5833_v26 = vmov 0  }
 0x3a9   : > { %v1668_v55 = vrot.slane %v1667_v5, 2  ;;  %v1689_v37 = vrot.slane %v1688_v43, 2  ;;  %3045 = vperm.xlu1 %3952, %v2975_v30   ;;  %v5174_v38 = vsub.s32 %v1698_v45, %v5164_v34  ;;  %v1650_v30 = vld [vmem:[#allocation5] sm:$0x3] }
 0x3aa   : > { %1828 = vmatpush1.bf16.msra.mxu1 %v1773_v58 }
 0x3ab   : > { %v1669_v28 = vadd.f32 %v1668_v55, %v1667_v5  ;;  %v1690_v20 = vadd.f32 %v1689_v37, %v1688_v43  ;;  %1829 = vmatprep.subr.bf16.mxu1 %v1772_v31  ;;  %v1764_v5 = vpack.c.bf16 %v5030_v27, %v5022_v7  ;;  %v1016_v43 = vpop.f32.mrf.mxu1  ;;  %v3985_v37 = vld [vmem:[#allocation3 + $0x20] ss:$8 sps:$4 sm:$0xff]  }
 0x3ac   : > { %3030 = vperm.xlu0 %3951, %v2972_v46  }
 0x3ad   : > { %v1670_v21 = vrot.slane %v1669_v28, 1  ;;  %v1691_v56 = vrot.slane %v1690_v20, 1  ;;  %3055 = vperm.xlu1 %3952, %v2977_v61   ;;  %v5205_v6 = vpop.f32.mrf.mxu1 }
 0x3ae   : > { %1830 = vmatpush1.bf16.msra.mxu1 %v1771_v50 }
 0x3af   : > { %v1671_v17 = vadd.f32 %v1670_v21, %v1669_v28  ;;  %v1692_v24 = vadd.f32 %v1691_v56, %v1690_v20  ;;  %1831 = vmatprep.subr.bf16.mxu1 %v1770_v54  ;;  %v1019_v23 = vpop.f32.mrf.mxu1 }
 0x3b0   : > { %3040 = vperm.xlu0 %3951, %v2974_v49   ;;  %v3987_v49 = vld [vmem:[#allocation3 + $0x40] ss:$8 sps:$4 sm:$0xff]  }
 0x3b1   : > { %v1695_v42 = vcombine.low %v1671_v17, %v1692_v24  ;;  %v5210_v31 = vpop.f32.mrf.mxu1 }
 0x3b2   : > { %1832 = vmatpush1.bf16.msra.mxu1 %v1769_v0  ;;  %v5834_v0 = vld [vmem:[#allocation7_spill] sm:$0xff] }
 0x3b3   : > { %v1702_v63 = vrot.slane %v1695_v42, %v5174_v38  ;;  %1833 = vmatprep.subr.bf16.mxu1 %v1768_v14  ;;  %v5212_v28 = vpop.f32.mrf.mxu1 }
 0x3b4   : > { %3050 = vperm.xlu0 %3951, %v2976_v40  }
 0x3b5   : > { %v1709_v18 = vrot.slane %v1702_v63, %v5174_v38  ;;  %v5215_v21 = vpop.f32.mrf.mxu1 }
 0x3b6   : > { %1834 = vmatpush1.bf16.msra.mxu1 %v1767_v47 }
 0x3b7   : > { %v1711_v11 = vadd.f32 %v1709_v18, %v1650_v30  ;;  %1835 = vmatprep.subr.bf16.mxu1 %v1766_v3  ;;  %v1035_v17 = vpop.f32.mrf.mxu1  ;;  %v3988_v3 = vld [vmem:[#allocation3 + $0x50] ss:$8 sps:$4 sm:$0xff]  }
 0x3b9   : > { %1712 = vst.msk [vmem:[#allocation5] sm:$0x3] %vm4819_vm1, %v1711_v11  ;;  %v5219_v40 = vpop.f32.mrf.mxu1 }
 0x3ba   : > { %1836 = vmatpush1.bf16.msra.mxu1 %v1765_v16 }
 0x3bb   : > { %1837 = vmatprep.subr.bf16.mxu1 %v1764_v5  ;;  %v5221_v11 = vpop.f32.mrf.mxu1 }
 0x3be   : > { %1838 = vmatpush1.bf16.msra.mxu1 %v1763_v4 }
 0x3bf   : > { %1839 = vmatprep.subr.bf16.mxu1 %v1762_v15 }
 0x3c2   : > { %1840 = vmatpush1.bf16.msra.mxu1 %v1761_v19  ;;  %v5224_v19 = vpop.f32.mrf.mxu1 }
 0x3c5   : > { %1858 = vmatmul.mubr.bf16.vlgmr.msra.gmra.mxu1 %v3983_v25 }
 0x3c6   : > { %1867 = vmatprep.mubr.bf16.mxu1 %v5833_v26 }
 0x3c7   : > { %v2341_v7 = vpop.xlane.xlu1 %2340 }
 0x3c8   : > { %4167 = vrcp.f32 %v2341_v7 }
 0x3c9   : > { %v2350_v27 = vpop.xlane.xlu0 %2349 }
 0x3ca   : > { %4169 = vrcp.f32 %v2350_v27 }
 0x3cb   : > { %v2347_v58 = vpop.xlane.xlu1 %2346 }
 0x3cd   : > { %v2356_v59 = vpop.xlane.xlu0 %2355  ;;  %1868 = vmatmul.mubr.bf16.gmra.mxu1 %v3984_v13 }
 0x3ce   : > { %1877 = vmatprep.mubr.bf16.mxu1 %v5833_v26 }
 0x3cf   : > { %v2353_v51 = vpop.xlane.xlu1 %2352 }
 0x3d1   : > { %v5207_v35 = vpop.xlane.xlu0 %2361 }
 0x3d3   : > { %v2359_v55 = vpop.xlane.xlu1 %2358 }
 0x3d5   : > { %1878 = vmatmul.mubr.bf16.gmra.mxu1 %v3985_v37  ;;  %v2368_v46 = vpop.xlane.xlu0 %2367  ;;  %v4168_v15 = vpop.eup %4167 }
 0x3d6   : > { %1887 = vmatprep.mubr.bf16.mxu1 %v5833_v26  ;;  %v5228_v37 = vpop.f32.mrf.mxu1 }
 0x3d7   : > { %v2365_v61 = vpop.xlane.xlu1 %2364  ;;  %v4170_v25 = vpop.eup %4169 }
 0x3db   : > { %v2371_v45 = vpop.xlane.xlu0 %2370 }
 0x3dd   : > { %v2380_v20 = vpop.xlane.xlu1 %2379  ;;  %1888 = vmatmul.mubr.bf16.gmra.mxu1 %v3986_v9  ;;  %v5835_v9 = vld [vmem:[#allocation9_spill] sm:$0xff] }
 0x3de   : > { %1897 = vmatprep.mubr.bf16.mxu1 %v5833_v26 }
 0x3df   : > { %v2374_v50 = vpop.xlane.xlu0 %2373 }
 0x3e1   : > { %v2386_v56 = vpop.xlane.xlu1 %2385 }
 0x3e2   : > { %4171 = vrcp.f32 %v2386_v56 }
 0x3e3   : > { %v2377_v54 = vpop.xlane.xlu0 %2376 }
 0x3e4   : > { %4173 = vrcp.f32 %v2377_v54 }
 0x3e5   : > { %v462_v24 = vpop.permute.xlu1 %461  ;;  %1898 = vmatmul.mubr.bf16.gmra.mxu1 %v3987_v49  ;;  %4175 = vrcp.f32 %v2347_v58 }
 0x3e6   : > { %v636_v42 = vadd.f32 %v5834_v0, %v462_v24  ;;  %1907 = vmatprep.mubr.bf16.mxu1 %v5833_v26  ;;  %4177 = vrcp.f32 %v2380_v20 }
 0x3e7   : > { %v2383_v14 = vpop.xlane.xlu0 %2382 }
 0x3e8   : > { %v3778_v63 = vpack.c.bf16 %v636_v42, %v636_v42  ;;  %4179 = vrcp.f32 %v2383_v14  ;;  %v5260_v42 = vmul.f32 %v4170_v25, %v4861_v53  ;;  %v5265_v14 = vpop.f32.mrf.mxu1 }
 0x3e9   : > { %4181 = vrcp.f32 %v2374_v50  ;;  %v829_v30 = vpop.permute.xlu1 %828  ;;  %v5235_v50 = vmul.f32 %v4168_v15, %v4855_v2 }
 0x3ea   : > { %4183 = vrcp.f32 %v2356_v59  ;;  %740 = vst [vmem:[#allocation3 + $0x70] sm:$0xf] %v3778_v63  ;;  %v1017_v47 = vadd.f32 %v1016_v43, %v829_v30 }
 0x3eb   : > { %4185 = vrcp.f32 %v2371_v45  ;;  %v2344_v18 = vpop.xlane.xlu0 %2343 }
 0x3ec   : > { %v3784_v16 = vpack.c.bf16 %v1017_v47, %v1017_v47  ;;  %4187 = vrcp.f32 %v2344_v18 }
 0x3ed   : > { %4189 = vrcp.f32 %v2365_v61  ;;  %v834_v5 = vpop.permute.xlu1 %833  ;;  %1908 = vmatmul.mubr.bf16.gmra.mxu1 %v3988_v3 }
 0x3ee   : > { %4191 = vrcp.f32 %v2353_v51  ;;  %1163 = vst [vmem:[#allocation3 + $0x4] sm:$0xf] %v3784_v16  ;;  %v1020_v4 = vadd.f32 %v1019_v23, %v834_v5  ;;  %1917 = vmatprep.mubr.bf16.mxu1 %v5833_v26  ;;  %v3989_v23 = vld [vmem:[#allocation3 + $0x60] ss:$8 sps:$4 sm:$0xff]  }
 0x3ef   : > { %4193 = vrcp.f32 %v2368_v46  ;;  %v4172_v27 = vpop.eup %4171  ;;  %v5231_v46 = vmul.f32 %v4168_v15, %v4852_v32 }
 0x3f0   : > { %v3785_v7 = vpack.c.bf16 %v1020_v4, %v1020_v4  ;;  %4195 = vrcp.f32 %v2359_v55  ;;  %v5244_v56 = vmul.f32 %v4172_v27, %v4945_v33  ;;  %v5257_v33 = vmul.f32 %v4170_v25, %v4857_v57  ;;  %v5836_v25 = vld [vmem:[#allocation11_spill] sm:$0xff] }
 0x3f1   : > { %v844_v43 = vpop.permute.xlu1 %843  ;;  %v4174_v58 = vpop.eup %4173  ;;  %4197 = vrcp.f32 %v5207_v35  ;;  %v5241_v35 = vmul.f32 %v4172_v27, %v4941_v29  ;;  %v5837_v27 = vld [vmem:[#allocation33_spill] sm:$0xff] }
 0x3f2   : > { %1164 = vst [vmem:[#allocation3 + $0xc] sm:$0xf] %v3785_v7  ;;  %v1028_v13 = vadd.f32 %v5205_v6, %v844_v43  ;;  %v4176_v59 = vpop.eup %4175  ;;  %v5238_v6 = vmul.f32 %v4174_v58, %v4939_v60  ;;  %v5279_v18 = vmul.f32 %v4174_v58, %v4935_v22 }
 0x3f3   : > { %v467_v51 = vpop.permute.xlu0 %466  ;;  %v4178_v61 = vpop.eup %4177  ;;  %v5254_v29 = vmul.f32 %v4176_v59, %v4866_v52  ;;  %v5273_v53 = vmul.f32 %v4176_v59, %v4871_v1 }
 0x3f4   : > { %v3787_v45 = vpack.c.bf16 %v1028_v13, %v1028_v13  ;;  %v639_v20 = vadd.f32 %v5835_v9, %v467_v51  ;;  %v5302_v13 = vpop.f32.mrf.mxu1 }
 0x3f5   : > { %v4180_v55 = vpop.eup %4179  ;;  %v854_v54 = vpop.permute.xlu1 %853  ;;  %1918 = vmatmul.mubr.bf16.gmra.mxu1 %v3989_v23 }
 0x3f6   : > { %v4182_v32 = vpop.eup %4181  ;;  %v5247_v49 = vmul.f32 %v4180_v55, %v4949_v8  ;;  %v5250_v24 = vmul.f32 %v4180_v55, %v4953_v44  ;;  %1166 = vst [vmem:[#allocation3 + $0x1c] sm:$0xf] %v3787_v45  ;;  %v1036_v2 = vadd.f32 %v1035_v17, %v854_v54  ;;  %v3779_v0 = vpack.c.bf16 %v639_v20, %v639_v20  ;;  %v5839_v45 = vld [vmem:[#allocation24_spill] sm:$0xff] }
 0x3f7   : > { %1927 = vmatprep.mubr.bf16.mxu1 %v5833_v26  ;;  %v4184_v60 = vpop.eup %4183  ;;  %v5263_v8 = vmul.f32 %v4178_v61, %v4933_v62  ;;  %v839_v44 = vpop.permute.xlu0 %838  ;;  %v5276_v62 = vmul.f32 %v4182_v32, %v4923_v36 }
 0x3f8   : > { %v4186_v17 = vpop.eup %4185  ;;  %v3789_v63 = vpack.c.bf16 %v1036_v2, %v1036_v2  ;;  %741 = vst [vmem:[#allocation3 + $0x78] sm:$0xf] %v3779_v0  ;;  %v1025_v30 = vadd.f32 %v5202_v12, %v839_v44  ;;  %v2561_v52 = vpack.c.bf16 %v5244_v56, %v5250_v24  ;;  %v2560_v57 = vpack.c.bf16 %v5241_v35, %v5247_v49 }
 0x3f9   : > { %v4188_v47 = vpop.eup %4187  ;;  %v864_v3 = vpop.permute.xlu1 %863  ;;  %v2559_v12 = vpack.c.bf16 %v5263_v8, %v5238_v6  ;;  %v5291_v22 = vmul.f32 %v4184_v60, %v4873_v48  ;;  %v5294_v7 = vmul.f32 %v4184_v60, %v5836_v25  ;;  %v5297_v43 = vmul.f32 %v4186_v17, %v5837_v27 }
 0x3fa   : > { %v4190_v16 = vpop.eup %4189  ;;  %v5284_v5 = vmul.f32 %v4188_v47, %v4955_v10  ;;  %v5287_v4 = vmul.f32 %v4188_v47, %v4959_v39  ;;  %1168 = vst [vmem:[#allocation3 + $0x2c] sm:$0xf] %v3789_v63  ;;  %v1044_v1 = vadd.f32 %v5215_v21, %v864_v3  ;;  %v3786_v15 = vpack.c.bf16 %v1025_v30, %v1025_v30  ;;  %v5838_v10 = vld [vmem:[#allocation34_spill] sm:$0xff]  ;;  %v5843_v47 = vld [vmem:[#allocation21_spill] sm:$0xff]  ;;  %v3923_v25 = vpop.f32.mrf.mxu1 }
 0x3fb   : > { %2610 = vmatprep.subr.bf16.mxu1 %v2561_v52  ;;  %v4192_v36 = vpop.eup %4191  ;;  %v5300_v58 = vmul.f32 %v4178_v61, %v5838_v10  ;;  %v849_v39 = vpop.permute.xlu0 %848  ;;  %v5310_v9 = vmul.f32 %v4190_v16, %v5839_v45  ;;  %v5840_v61 = vld [vmem:[#allocation12_spill] sm:$0xff]  ;;  %v2557_v2 = vpack.c.bf16 %v5276_v62, %v5297_v43  ;;  %v5841_v30 = vld [vmem:[#allocation14_spill] sm:$0xff] }
 0x3fc   : > { %2611 = vmatpush1.bf16.msra.mxu1 %v2560_v57  ;;  %v4194_v21 = vpop.eup %4193  ;;  %v2436_v59 = vadd.f32 %v5284_v5, %v5231_v46  ;;  %v2457_v48 = vadd.f32 %v5287_v4, %v5235_v50  ;;  %v3791_v51 = vpack.c.bf16 %v1044_v1, %v1044_v1  ;;  %1165 = vst [vmem:[#allocation3 + $0x14] sm:$0xf] %v3786_v15 }
 0x3fd   : > { %v1033_v23 = vadd.f32 %v5212_v28, %v849_v39  ;;  %2612 = vmatprep.subr.bf16.mxu1 %v2559_v12  ;;  %v5313_v20 = vmul.f32 %v4182_v32, %v5840_v61  ;;  %v874_v55 = vpop.permute.xlu1 %873  ;;  %v2558_v54 = vpack.c.bf16 %v5300_v58, %v5279_v18  ;;  %v4196_v0 = vpop.eup %4195  ;;  %v5323_v52 = vmul.f32 %v4192_v36, %v5841_v30  ;;  %v5842_v32 = vld [vmem:[#allocation15_spill] sm:$0xff]  ;;  %v5844_v12 = vld [vmem:[#allocation13_spill] sm:$0xff]  ;;  %v5849_v30 = vld [vmem:[#allocation20_spill] sm:$0xff] }
 0x3fe   : > { %v2437_v60 = vadd.f32 %v2436_v59, %v5254_v29  ;;  %v2458_v44 = vadd.f32 %v2457_v48, %v5273_v53  ;;  %1170 = vst [vmem:[#allocation3 + $0x3c] sm:$0xf] %v3791_v51  ;;  %v1052_v28 = vadd.f32 %v5228_v37, %v874_v55  ;;  %v5326_v57 = vmul.f32 %v4192_v36, %v5842_v32  ;;  %v4198_v10 = vpop.eup %4197  ;;  %v5845_v48 = vld [vmem:[#allocation22_spill] sm:$0xff] }
 0x3ff   : > { %v3788_v63 = vpack.c.bf16 %v1033_v23, %v1033_v23  ;;  %v5329_v3 = vmul.f32 %v4194_v21, %v5843_v47  ;;  %v5332_v1 = vmul.f32 %v4186_v17, %v5844_v12  ;;  %v859_v15 = vpop.permute.xlu0 %858  ;;  %v3990_v27 = vld [vmem:[#allocation3 + $0x70] ss:$8 sps:$4 sm:$0xff]   ;;  %v2416_v51 = vmul.f32 %v4196_v0, %v5845_v48  ;;  %v1067_v47 = vpop.f32.mrf.mxu1 }
 0x400   : > { %2613 = vmatpush1.bf16.msra.mxu1 %v2558_v54  ;;  %v2438_v37 = vadd.f32 %v2437_v60, %v5257_v33  ;;  %v2459_v39 = vadd.f32 %v2458_v44, %v5260_v42  ;;  %v3793_v59 = vpack.c.bf16 %v1052_v28, %v1052_v28  ;;  %v1041_v36 = vadd.f32 %v5210_v31, %v859_v15  ;;  %v5846_v23 = vld [vmem:[#allocation23_spill] sm:$0xff]  ;;  %v5848_v28 = vld [vmem:[#allocation18_spill] sm:$0xff] }
 0x401   : > { %1167 = vst [vmem:[#allocation3 + $0x24] sm:$0xf] %v3788_v63  ;;  %2614 = vmatprep.subr.bf16.mxu1 %v2557_v2  ;;  %v2419_v45 = vmul.f32 %v4190_v16, %v5846_v23  ;;  %v884_v17 = vpop.permute.xlu1 %883  ;;  %1928 = vmatmul.mubr.bf16.gmra.mxu1 %v3990_v27  ;;  %v2556_v61 = vpack.c.bf16 %v5313_v20, %v5332_v1  ;;  %v5847_v44 = vld [vmem:[#allocation19_spill] sm:$0xff] }
 0x402   : > { %v2555_v55 = vpack.c.bf16 %v5329_v3, %v5310_v9  ;;  %v2439_v54 = vadd.f32 %v2438_v37, %v5323_v52  ;;  %v2460_v60 = vadd.f32 %v2459_v39, %v5326_v57  ;;  %1172 = vst [vmem:[#allocation3 + $0x4c] sm:$0xf] %v3793_v59  ;;  %v1060_v31 = vadd.f32 %v5224_v19, %v884_v17  ;;  %v5850_v39 = vld [vmem:[#allocation17_spill] sm:$0xff] }
 0x403   : > { %v3790_v2 = vpack.c.bf16 %v1041_v36, %v1041_v36  ;;  %2642 = vmatprep.mubr.bf16.mxu1 %v5833_v26  ;;  %v2415_v16 = vmul.f32 %v4196_v0, %v5847_v44  ;;  %v2418_v63 = vmul.f32 %v4198_v10, %v5848_v28  ;;  %v2421_v32 = vmul.f32 %v4194_v21, %v5849_v30  ;;  %v869_v12 = vpop.permute.xlu0 %868 }
 0x404   : > { %2615 = vmatpush1.bf16.msra.mxu1 %v2556_v61  ;;  %v2440_v15 = vadd.f32 %v2439_v54, %v5291_v22  ;;  %v2461_v27 = vadd.f32 %v2460_v60, %v5294_v7  ;;  %v3795_v37 = vpack.c.bf16 %v1060_v31, %v1060_v31  ;;  %v1049_v19 = vadd.f32 %v5221_v11, %v869_v12 }
 0x405   : > { %1169 = vst [vmem:[#allocation3 + $0x34] sm:$0xf] %v3790_v2  ;;  %2616 = vmatprep.subr.bf16.mxu1 %v2555_v55  ;;  %v2417_v59 = vmul.f32 %v4198_v10, %v5850_v39  ;;  %v894_v36 = vpop.permute.xlu1 %893  ;;  %v2554_v0 = vpack.c.bf16 %v2421_v32, %v2419_v45  ;;  %v2553_v48 = vpack.c.bf16 %v2418_v63, %v2416_v51 }
 0x406   : > { %v2441_v23 = vadd.f32 %v2440_v15, %v2415_v16  ;;  %v2462_v17 = vadd.f32 %v2461_v27, %v2416_v51  ;;  %1174 = vst [vmem:[#allocation3 + $0x5c] sm:$0xf] %v3795_v37  ;;  %v1068_v21 = vadd.f32 %v1067_v47, %v894_v36  ;;  %v3792_v61 = vpack.c.bf16 %v1049_v19, %v1049_v19 }
 0x407   : > { %v879_v44 = vpop.permute.xlu0 %878  ;;  %v2552_v55 = vpack.c.bf16 %v2417_v59, %v2415_v16  ;;  %v2551_v10 = vpack.c.bf16 %v5294_v7, %v5326_v57  ;;  %v2550_v16 = vpack.c.bf16 %v5291_v22, %v5323_v52  ;;  %v2548_v22 = vpack.c.bf16 %v5257_v33, %v5254_v29 }
 0x408   : > { %2617 = vmatpush1.bf16.msra.mxu1 %v2554_v0  ;;  %v2442_v54 = vadd.f32 %v2441_v23, %v2417_v59  ;;  %v2463_v28 = vadd.f32 %v2462_v17, %v2418_v63  ;;  %v3797_v60 = vpack.c.bf16 %v1068_v21, %v1068_v21  ;;  %1171 = vst [vmem:[#allocation3 + $0x44] sm:$0xf] %v3792_v61  ;;  %v3993_v0 = vld [vmem:[#allocation3 + $0x24] ss:$8 sps:$4 sm:$0xff]   ;;  %v2435_v23 = vld [vmem:[#allocation5] sm:$0x3] }
 0x409   : > { %v1057_v31 = vadd.f32 %v5219_v40, %v879_v44  ;;  %2618 = vmatprep.subr.bf16.mxu1 %v2553_v48  ;;  %v904_v11 = vpop.permute.xlu1 %903 }
 0x40a   : > { %v2443_v2 = vadd.f32 %v2442_v54, %v2419_v45  ;;  %v2464_v51 = vadd.f32 %v2463_v28, %v5310_v9  ;;  %1176 = vst [vmem:[#allocation3 + $0x6c] sm:$0xf] %v3797_v60  ;;  %v1076_v30 = vadd.f32 %v3923_v25, %v904_v11  ;;  %v2549_v25 = vpack.c.bf16 %v5260_v42, %v5273_v53 }
 0x40b   : > { %v3794_v47 = vpack.c.bf16 %v1057_v31, %v1057_v31  ;;  %v889_v12 = vpop.permute.xlu0 %888  ;;  %v2547_v42 = vpack.c.bf16 %v5287_v4, %v5235_v50  ;;  %v3991_v50 = vld [vmem:[#allocation3 + $0x4] ss:$8 sps:$4 sm:$0xff]  }
 0x40c   : > { %2619 = vmatpush1.bf16.msra.mxu1 %v2552_v55  ;;  %v2444_v15 = vadd.f32 %v2443_v2, %v2421_v32  ;;  %v2465_v63 = vadd.f32 %v2464_v51, %v5329_v3  ;;  %v3799_v27 = vpack.c.bf16 %v1076_v30, %v1076_v30  ;;  %v1065_v40 = vadd.f32 %v5302_v13, %v889_v12  ;;  %v3994_v21 = vld [vmem:[#allocation3 + $0x34] ss:$8 sps:$4 sm:$0xff]  }
 0x40d   : > { %1173 = vst [vmem:[#allocation3 + $0x54] sm:$0xf] %v3794_v47  ;;  %2620 = vmatprep.subr.bf16.mxu1 %v2551_v10 }
 0x40e   : > { %v2445_v7 = vadd.f32 %v2444_v15, %v5332_v1  ;;  %v2466_v9 = vadd.f32 %v2465_v63, %v5297_v43  ;;  %1178 = vst [vmem:[#allocation3 + $0x7c] sm:$0xf] %v3799_v27  ;;  %v3796_v57 = vpack.c.bf16 %v1065_v40, %v1065_v40 }
 0x40f   : > { %v899_v45 = vpop.permute.xlu0 %898  ;;  %v3995_v61 = vld [vmem:[#allocation3 + $0x44] ss:$8 sps:$4 sm:$0xff]  }
 0x410   : > { %2621 = vmatpush1.bf16.msra.mxu1 %v2550_v16  ;;  %v2446_v3 = vadd.f32 %v2445_v7, %v5313_v20  ;;  %v2467_v32 = vadd.f32 %v2466_v9, %v5276_v62  ;;  %1175 = vst [vmem:[#allocation3 + $0x64] sm:$0xf] %v3796_v57  ;;  %v1073_v13 = vadd.f32 %v5265_v14, %v899_v45 }
 0x411   : > { %2622 = vmatprep.subr.bf16.mxu1 %v2549_v25  ;;  %v2546_v14 = vpack.c.bf16 %v5284_v5, %v5231_v46 }
 0x412   : > { %v2447_v43 = vadd.f32 %v2446_v3, %v5279_v18  ;;  %v2468_v52 = vadd.f32 %v2467_v32, %v5238_v6  ;;  %v3798_v1 = vpack.c.bf16 %v1073_v13, %v1073_v13 }
 0x414   : > { %2623 = vmatpush1.bf16.msra.mxu1 %v2548_v22  ;;  %v2448_v53 = vadd.f32 %v2447_v43, %v5300_v58  ;;  %v2469_v62 = vadd.f32 %v2468_v52, %v5263_v8  ;;  %1177 = vst [vmem:[#allocation3 + $0x74] sm:$0xf] %v3798_v1  ;;  %v3996_v44 = vld [vmem:[#allocation3 + $0x54] ss:$8 sps:$4 sm:$0xff]  }
 0x415   : > { %2624 = vmatprep.subr.bf16.mxu1 %v2547_v42 }
 0x416   : > { %v2449_v29 = vadd.f32 %v2448_v53, %v5247_v49  ;;  %v2470_v33 = vadd.f32 %v2469_v62, %v5250_v24  ;;  %v3992_v49 = vld [vmem:[#allocation3 + $0x14] ss:$8 sps:$4 sm:$0xff]  }
 0x418   : > { %2625 = vmatpush1.bf16.msra.mxu1 %v2546_v14  ;;  %v2450_v6 = vadd.f32 %v2449_v29, %v5241_v35  ;;  %v2471_v18 = vadd.f32 %v2470_v33, %v5244_v56  ;;  %v2826_v33 = vsub.s32 0, %v5164_v34 }
 0x41a   : > { %v2451_v4 = vrot.slane %v2450_v6, 4  ;;  %v2472_v20 = vrot.slane %v2471_v18, 4 }
 0x41b   : > { %2643 = vmatmul.mubr.bf16.vlgmr.msra.gmra.mxu1 %v3991_v50  ;;  %v3998_v54 = vld [vmem:[#allocation3 + $0x74] ss:$8 sps:$4 sm:$0xff]   ;;  %v2830_v50 = vsub.s32 1, %v5164_v34 }
 0x41c   : > { %2652 = vmatprep.mubr.bf16.mxu1 %v5833_v26  ;;  %v2452_v8 = vadd.f32 %v2451_v4, %v2450_v6  ;;  %v2473_v58 = vadd.f32 %v2472_v20, %v2471_v18 }
 0x41e   : > { %v2453_v37 = vrot.slane %v2452_v8, 2  ;;  %v2474_v19 = vrot.slane %v2473_v58, 2 }
 0x420   : > { %v2454_v46 = vadd.f32 %v2453_v37, %v2452_v8  ;;  %v2475_v5 = vadd.f32 %v2474_v19, %v2473_v58 }
 0x422   : > { %v2455_v39 = vrot.slane %v2454_v46, 1  ;;  %v2476_v24 = vrot.slane %v2475_v5, 1 }
 0x423   : > { %2653 = vmatmul.mubr.bf16.gmra.mxu1 %v3992_v49  ;;  %v2866_v49 = vld [vmem:[%s4275_s10] sm:$0xff] }
 0x424   : > { %2662 = vmatprep.mubr.bf16.mxu1 %v5833_v26  ;;  %v2456_v35 = vadd.f32 %v2455_v39, %v2454_v46  ;;  %v2477_v56 = vadd.f32 %v2476_v24, %v2475_v5  ;;  %v2868_v39 = vld [vmem:[%s4275_s10 + $0x10] sm:$0xff] }
 0x426   : > { %v2480_v59 = vcombine.low %v2456_v35, %v2477_v56 }
 0x428   : > { %v2487_v36 = vrot.slane %v2480_v59, %v5174_v38  ;;  %v2867_v59 = vld [vmem:[%s4275_s10 + $0x8] sm:$0xff] }
 0x42a   : > { %v2494_v48 = vrot.slane %v2487_v36, %v5174_v38  ;;  %v3997_v38 = vld [vmem:[#allocation3 + $0x64] ss:$8 sps:$4 sm:$0xff]   ;;  %v2869_v36 = vld [vmem:[%s4275_s10 + $0x18] sm:$0xff] }
 0x42b   : > { %2663 = vmatmul.mubr.bf16.gmra.mxu1 %v3993_v0 }
 0x42c   : > { %2672 = vmatprep.mubr.bf16.mxu1 %v5833_v26  ;;  %v2496_v17 = vadd.f32 %v2494_v48, %v2435_v23 }
 0x42e   : > { %2497 = vst.msk [vmem:[#allocation5] sm:$0x3] %vm4819_vm1, %v2496_v17 }
 0x433   : > { %2673 = vmatmul.mubr.bf16.gmra.mxu1 %v3994_v21 }
 0x434   : > { %2682 = vmatprep.mubr.bf16.mxu1 %v5833_v26 }
 0x435   : > { %v2787_v43 = vld [vmem:[#allocation5] sm:$0x3] }
 0x436   : > { %v2788_v1 = vadd.f32 1e-09, %v2787_v43 }
 0x438   : > { %4199 = vrcp.f32 %v2788_v1  ;;  %v2870_v1 = vld [vmem:[%s4275_s10 + $0x20] sm:$0xff] }
 0x43b   : > { %2683 = vmatmul.mubr.bf16.gmra.mxu1 %v3995_v61 }
 0x43c   : > { %2692 = vmatprep.mubr.bf16.mxu1 %v5833_v26 }
 0x443   : > { %2693 = vmatmul.mubr.bf16.gmra.mxu1 %v3996_v44 }
 0x444   : > { %2702 = vmatprep.mubr.bf16.mxu1 %v5833_v26 }
 0x445   : > { %v4200_v6 = vpop.eup %4199 }
 0x446   : > { %v5446_v8 = vrot.slane %v4200_v6, %v2826_v33  ;;  %v5448_v19 = vrot.slane %v4200_v6, %v2830_v50  ;;  %v2872_v33 = vld [vmem:[%s4275_s10 + $0x30] sm:$0xff] }
 0x44b   : > { %2703 = vmatmul.mubr.bf16.gmra.mxu1 %v3997_v38 }
 0x44c   : > { %2712 = vmatprep.mubr.bf16.mxu1 %v5833_v26 }
 0x453   : > { %2713 = vmatmul.mubr.bf16.gmra.mxu1 %v3998_v54 }
 0x485   : > { %v1859_v41 = vpop.f32.mrf.mxu1 }
 0x487   : > { %v1861_v28 = vpop.f32.mrf.mxu1 }
 0x489   : > { %v1863_v60 = vpop.f32.mrf.mxu1 }
 0x48b   : > { %v1865_v31 = vpop.f32.mrf.mxu1 }
 0x48d   : > { %v1869_v11 = vpop.f32.mrf.mxu1 }
 0x48f   : > { %v1871_v55 = vpop.f32.mrf.mxu1 }
 0x491   : > { %v1873_v10 = vpop.f32.mrf.mxu1 }
 0x493   : > { %v5394_v2 = vpop.f32.mrf.mxu1 }
 0x495   : > { %v5396_v51 = vpop.f32.mrf.mxu1 }
 0x497   : > { %v5398_v30 = vpop.f32.mrf.mxu1 }
 0x499   : > { %v5400_v47 = vpop.f32.mrf.mxu1 }
 0x49b   : > { %v5402_v12 = vpop.f32.mrf.mxu1 }
 0x49d   : > { %v5404_v15 = vpop.f32.mrf.mxu1 }
 0x49f   : > { %v5406_v63 = vpop.f32.mrf.mxu1 }
 0x4a1   : > { %v5408_v27 = vpop.f32.mrf.mxu1 }
 0x4a3   : > { %v5410_v40 = vpop.f32.mrf.mxu1 }
 0x4a5   : > { %v5412_v16 = vpop.f32.mrf.mxu1 }
 0x4a7   : > { %v5414_v7 = vpop.f32.mrf.mxu1 }
 0x4a9   : > { %v5416_v9 = vpop.f32.mrf.mxu1 }
 0x4ab   : > { %v5418_v57 = vpop.f32.mrf.mxu1 }
 0x4ad   : > { %v5420_v25 = vpop.f32.mrf.mxu1 }
 0x4af   : > { %v5422_v45 = vpop.f32.mrf.mxu1 }
 0x4b1   : > { %v5424_v3 = vpop.f32.mrf.mxu1 }
 0x4b3   : > { %v5426_v32 = vpop.f32.mrf.mxu1 }
 0x4b5   : > { %v5428_v13 = vpop.f32.mrf.mxu1 }
 0x4b7   : > { %v5430_v22 = vpop.f32.mrf.mxu1 }
 0x4b9   : > { %v5432_v52 = vpop.f32.mrf.mxu1 }
 0x4bb   : > { %v5434_v42 = vpop.f32.mrf.mxu1 }
 0x4c1   : > { %v5436_v53 = vpop.f32.mrf.mxu1 }
 0x4c3   : > { %v5438_v62 = vpop.f32.mrf.mxu1 }
 0x4c5   : > { %v5440_v14 = vpop.f32.mrf.mxu1 }
 0x4c7   : > { %v5442_v29 = vpop.f32.mrf.mxu1 }
 0x4db   : > { %v2644_v18 = vpop.f32.mrf.mxu1 }
 0x4dc   : > { %v2723_v4 = vadd.f32 %v2644_v18, %v1859_v41 }
 0x4dd   : > { %v2646_v20 = vpop.f32.mrf.mxu1 }
 0x4de   : > { %v2724_v58 = vadd.f32 %v2646_v20, %v1861_v28  ;;  %v2834_v46 = vmul.f32 %v5446_v8, %v2723_v4  ;;  %v2871_v4 = vld [vmem:[%s4275_s10 + $0x28] sm:$0xff]  ;;  %v2873_v20 = vld [vmem:[%s4275_s10 + $0x38] sm:$0xff] }
 0x4df   : > { %v2648_v37 = vpop.f32.mrf.mxu1 }
 0x4e0   : > { %v2725_v5 = vadd.f32 %v2648_v37, %v1863_v60  ;;  %v2835_v35 = vmul.f32 %v5448_v19, %v2724_v58  ;;  %v2898_v48 = vsub.f32 %v2866_v49, %v2834_v46 }
 0x4e1   : > { %v2650_v24 = vpop.f32.mrf.mxu1 }
 0x4e2   : > { %v2836_v56 = vmul.f32 %v5446_v8, %v2725_v5  ;;  %v2726_v34 = vadd.f32 %v2650_v24, %v1865_v31  ;;  %v2899_v44 = vsub.f32 %v2867_v59, %v2835_v35 }
 0x4e3   : > { %v2654_v0 = vpop.f32.mrf.mxu1 }
 0x4e4   : > { %v2900_v23 = vsub.f32 %v2868_v39, %v2836_v56  ;;  %v2837_v17 = vmul.f32 %v5448_v19, %v2726_v34  ;;  %v2727_v21 = vadd.f32 %v2654_v0, %v1869_v11 }
 0x4e5   : > { %v2656_v61 = vpop.f32.mrf.mxu1 }
 0x4e6   : > { %v5458_v38 = vpack.c.bf16 %v2900_v23, %v2898_v48  ;;  %v2901_v54 = vsub.f32 %v2869_v36, %v2837_v17  ;;  %v2728_v41 = vadd.f32 %v2656_v61, %v1871_v55  ;;  %v2838_v60 = vmul.f32 %v5446_v8, %v2727_v21 }
 0x4e7   : > { %v2658_v28 = vpop.f32.mrf.mxu1 }
 0x4e8   : > { %v2729_v31 = vadd.f32 %v2658_v28, %v1873_v10  ;;  %v5461_v43 = vpack.c.bf16 %v2901_v54, %v2899_v44  ;;  %v2839_v18 = vmul.f32 %v5448_v19, %v2728_v41  ;;  %v2902_v55 = vsub.f32 %v2870_v1, %v2838_v60 }
 0x4e9   : > { %v2660_v6 = vpop.f32.mrf.mxu1 }
 0x4ea   : > { %v2840_v11 = vmul.f32 %v5446_v8, %v2729_v31  ;;  %v2730_v50 = vadd.f32 %v2660_v6, %v5394_v2  ;;  %v2903_v5 = vsub.f32 %v2871_v4, %v2839_v18 }
 0x4eb   : > { %v5470_v58 = vpop.f32.mrf.mxu1 }
 0x4ec   : > { %v2904_v37 = vsub.f32 %v2872_v33, %v2840_v11  ;;  %v2841_v46 = vmul.f32 %v5448_v19, %v2730_v50 }
 0x4ed   : > { %v5473_v10 = vpop.f32.mrf.mxu1 }
 0x4ee   : > { %v5475_v49 = vpack.c.bf16 %v2904_v37, %v2902_v55  ;;  %v2905_v39 = vsub.f32 %v2873_v20, %v2841_v46 }
 0x4ef   : > { %v5477_v24 = vpop.f32.mrf.mxu1 }
 0x4f0   : > { %v5479_v35 = vpack.c.bf16 %v2905_v39, %v2903_v5 }
 0x4f1   : > { %v5481_v56 = vpop.f32.mrf.mxu1 }
 0x4f3   : > { %v5483_v2 = vpop.f32.mrf.mxu1 }
 0x4f5   : > { %v5485_v34 = vpop.f32.mrf.mxu1 }
 0x4f7   : > { %v5487_v59 = vpop.f32.mrf.mxu1 }
 0x4f9   : > { %v2680_v36 = vpop.f32.mrf.mxu1 }
 0x4fb   : > { %v5489_v0 = vpop.f32.mrf.mxu1 }
 0x4fd   : > { %v2686_v48 = vpop.f32.mrf.mxu1 }
 0x4ff   : > { %v2688_v23 = vpop.f32.mrf.mxu1 }
 0x501   : > { %v2690_v17 = vpop.f32.mrf.mxu1 }
 0x503   : > { %v2694_v21 = vpop.f32.mrf.mxu1 }
 0x505   : > { %v2696_v61 = vpop.f32.mrf.mxu1 }
 0x507   : > { %v2698_v44 = vpop.f32.mrf.mxu1 }
 0x509   : > { %v2700_v54 = vpop.f32.mrf.mxu1 }
 0x50a   : > { %v2746_v55 = vadd.f32 %v2700_v54, %v5426_v32  ;;  %v2895_v32 = vld [vmem:[%s4275_s10 + $0xe8] sm:$0xff]  ;;  %v2897_v54 = vld [vmem:[%s4275_s10 + $0xf8] sm:$0xff] }
 0x50b   : > { %v2704_v41 = vpop.f32.mrf.mxu1 }
 0x50d   : > { %v2706_v28 = vpop.f32.mrf.mxu1 }
 0x50e   : > { %v2748_v4 = vadd.f32 %v2706_v28, %v5430_v22  ;;  %v2747_v22 = vadd.f32 %v2704_v41, %v5428_v13 }
 0x50f   : > { %v2708_v60 = vpop.f32.mrf.mxu1 }
 0x510   : > { %v2749_v37 = vadd.f32 %v2708_v60, %v5432_v52  ;;  %v2744_v52 = vadd.f32 %v2696_v61, %v5422_v45  ;;  %v2859_v60 = vmul.f32 %v5448_v19, %v2748_v4  ;;  %v2743_v4 = vadd.f32 %v2694_v21, %v5420_v25 }
 0x511   : > { %v2710_v31 = vpop.f32.mrf.mxu1 }
 0x512   : > { %v2750_v6 = vadd.f32 %v2710_v31, %v5434_v42  ;;  %v2894_v31 = vld [vmem:[%s4275_s10 + $0xe0] sm:$0xff]  ;;  %v2860_v13 = vmul.f32 %v5446_v8, %v2749_v37 }
 0x513   : > { %v2714_v1 = vpop.f32.mrf.mxu1  ;;  %v2890_v37 = vld [vmem:[%s4275_s10 + $0xc0] sm:$0xff] }
 0x514   : > { %v2751_v11 = vadd.f32 %v2714_v1, %v5436_v53  ;;  %v2861_v5 = vmul.f32 %v5448_v19, %v2750_v6  ;;  %v2896_v53 = vld [vmem:[%s4275_s10 + $0xf0] sm:$0xff]  ;;  %v2891_v6 = vld [vmem:[%s4275_s10 + $0xc8] sm:$0xff] }
 0x515   : > { %v2716_v33 = vpop.f32.mrf.mxu1 }
 0x516   : > { %v2752_v18 = vadd.f32 %v2716_v33, %v5438_v62  ;;  %v2862_v28 = vmul.f32 %v5446_v8, %v2751_v11  ;;  %v2742_v33 = vadd.f32 %v2690_v17, %v5418_v57  ;;  %v2892_v11 = vld [vmem:[%s4275_s10 + $0xd0] sm:$0xff]  ;;  %v2858_v57 = vmul.f32 %v5446_v8, %v2747_v22 }
 0x517   : > { %v2718_v50 = vpop.f32.mrf.mxu1  ;;  %v2924_v25 = vsub.f32 %v2892_v11, %v2860_v13  ;;  %v2733_v11 = vadd.f32 %v5477_v24, %v5400_v47  ;;  %v2878_v24 = vld [vmem:[%s4275_s10 + $0x60] sm:$0xff] }
 0x518   : > { %v2753_v20 = vadd.f32 %v2718_v50, %v5440_v14  ;;  %v2863_v42 = vmul.f32 %v5448_v19, %v2752_v18  ;;  %v2893_v14 = vld [vmem:[%s4275_s10 + $0xd8] sm:$0xff]  ;;  %v2857_v18 = vmul.f32 %v5448_v19, %v2746_v55  ;;  %v2926_v17 = vsub.f32 %v2894_v31, %v2862_v28 }
 0x519   : > { %v2720_v46 = vpop.f32.mrf.mxu1  ;;  %v2925_v50 = vsub.f32 %v2893_v14, %v2861_v5  ;;  %v2741_v55 = vadd.f32 %v2688_v23, %v5416_v9  ;;  %v2887_v5 = vld [vmem:[%s4275_s10 + $0xa8] sm:$0xff]  ;;  %v2739_v14 = vadd.f32 %v5489_v0, %v5412_v16  ;;  %v2885_v28 = vld [vmem:[%s4275_s10 + $0x98] sm:$0xff]  ;;  %v2854_v9 = vmul.f32 %v5446_v8, %v2743_v4  ;;  %v2880_v4 = vld [vmem:[%s4275_s10 + $0x70] sm:$0xff] }
 0x51a   : > { %v2864_v62 = vmul.f32 %v5446_v8, %v2753_v20  ;;  %v2754_v39 = vadd.f32 %v2720_v46, %v5442_v29  ;;  %v2745_v29 = vadd.f32 %v2698_v44, %v5424_v3  ;;  %v2927_v45 = vsub.f32 %v2895_v32, %v2863_v42  ;;  %v2889_v20 = vld [vmem:[%s4275_s10 + $0xb8] sm:$0xff] }
 0x51b   : > { %v2740_v3 = vadd.f32 %v2686_v48, %v5414_v7  ;;  %v2855_v44 = vmul.f32 %v5448_v19, %v2744_v52  ;;  %v2923_v46 = vsub.f32 %v2891_v6, %v2859_v60  ;;  %v2888_v7 = vld [vmem:[%s4275_s10 + $0xb0] sm:$0xff]  ;;  %v2921_v48 = vsub.f32 %v2889_v20, %v2857_v18  ;;  %v2883_v60 = vld [vmem:[%s4275_s10 + $0x88] sm:$0xff] }
 0x51c   : > { %v2865_v1 = vmul.f32 %v5448_v19, %v2754_v39  ;;  %v2928_v41 = vsub.f32 %v2896_v53, %v2864_v62  ;;  %v2856_v42 = vmul.f32 %v5446_v8, %v2745_v29  ;;  %v2738_v53 = vadd.f32 %v2680_v36, %v5410_v40  ;;  %v2886_v36 = vld [vmem:[%s4275_s10 + $0xa0] sm:$0xff] }
 0x51d   : > { %v2853_v39 = vmul.f32 %v5448_v19, %v2742_v33  ;;  %v2943_v22 = vpack.c.bf16 %v2925_v50, %v2923_v46  ;;  %v2922_v23 = vsub.f32 %v2890_v37, %v2858_v57  ;;  %v2736_v32 = vadd.f32 %v5485_v34, %v5406_v63  ;;  %v2884_v34 = vld [vmem:[%s4275_s10 + $0x90] sm:$0xff]  ;;  %v2877_v57 = vld [vmem:[%s4275_s10 + $0x58] sm:$0xff]  ;;  %v2875_v37 = vld [vmem:[%s4275_s10 + $0x48] sm:$0xff] }
 0x51e   : > { %v2929_v61 = vsub.f32 %v2897_v54, %v2865_v1  ;;  %v2944_v21 = vpack.c.bf16 %v2928_v41, %v2926_v17  ;;  %v2851_v40 = vmul.f32 %v5448_v19, %v2740_v3  ;;  %v2919_v54 = vsub.f32 %v2887_v5, %v2855_v44  ;;  %v2876_v5 = vld [vmem:[%s4275_s10 + $0x50] sm:$0xff] }
 0x51f   : > { %v2737_v52 = vadd.f32 %v5487_v59, %v5408_v27  ;;  %v2852_v16 = vmul.f32 %v5446_v8, %v2741_v55  ;;  %v2920_v0 = vsub.f32 %v2888_v7, %v2856_v42  ;;  %v2942_v31 = vpack.c.bf16 %v2924_v25, %v2922_v23  ;;  %v2881_v27 = vld [vmem:[%s4275_s10 + $0x78] sm:$0xff]  ;;  %v2981_v23 = vpop.permute.xlu0 %2980 }
 0x520   : > { %v2945_v62 = vpack.c.bf16 %v2929_v61, %v2927_v45  ;;  %v2734_v1 = vadd.f32 %v5481_v56, %v5402_v12  ;;  %v2849_v63 = vmul.f32 %v5448_v19, %v2738_v53  ;;  %v2917_v33 = vsub.f32 %v2885_v28, %v2853_v39  ;;  %v2882_v56 = vld [vmem:[%s4275_s10 + $0x80] sm:$0xff]  ;;  %v4005_v28 = vld [vmem:[%s5713_s3 + $0x30] sm:$0xff]  }
 0x521   : > { %v2941_v29 = vpack.c.bf16 %v2921_v48, %v2919_v54  ;;  %v2735_v6 = vadd.f32 %v5483_v2, %v5404_v15  ;;  %v2850_v59 = vmul.f32 %v5446_v8, %v2739_v14  ;;  %v2918_v13 = vsub.f32 %v2886_v36, %v2854_v9  ;;  %v2879_v15 = vld [vmem:[%s4275_s10 + $0x68] sm:$0xff]  ;;  %v4006_v9 = vld [vmem:[%s5713_s3 + $0x38] sm:$0xff]  }
 0x522   : > { %3106 = vmatprep.subr.bf16.mxu0 %v2945_v62  ;;  %v2732_v41 = vadd.f32 %v5473_v10, %v5398_v30  ;;  %v2847_v12 = vmul.f32 %v5448_v19, %v2736_v32  ;;  %v2915_v18 = vsub.f32 %v2883_v60, %v2851_v40  ;;  %v2848_v2 = vmul.f32 %v5446_v8, %v2737_v52  ;;  %v4000_v14 = vld [vmem:[%s5713_s3 + $0x8] sm:$0xff]   ;;  %v2986_v52 = vpop.permute.xlu1 %2985 }
 0x523   : > { %3107 = vmatpush1.bf16.msra.mxu0 %v2944_v21  ;;  %v2916_v50 = vsub.f32 %v2884_v34, %v2852_v16  ;;  %v2940_v45 = vpack.c.bf16 %v2920_v0, %v2918_v13  ;;  %v2845_v61 = vmul.f32 %v5448_v19, %v2734_v1  ;;  %v2913_v30 = vsub.f32 %v2881_v27, %v2849_v63  ;;  %v2874_v21 = vld [vmem:[%s4275_s10 + $0x40] sm:$0xff] }
 0x524   : > { %3108 = vmatprep.subr.bf16.mxu0 %v2943_v22  ;;  %v2939_v10 = vpack.c.bf16 %v2917_v33, %v2915_v18  ;;  %v2731_v20 = vadd.f32 %v5470_v58, %v5396_v51  ;;  %v2846_v17 = vmul.f32 %v5446_v8, %v2735_v6  ;;  %v2914_v3 = vsub.f32 %v2882_v56, %v2850_v59 }
 0x525   : > { %v2843_v47 = vmul.f32 %v5448_v19, %v2732_v41  ;;  %v2911_v44 = vsub.f32 %v2879_v15, %v2847_v12  ;;  %v2844_v46 = vmul.f32 %v5446_v8, %v2733_v11  ;;  %v2912_v62 = vsub.f32 %v2880_v4, %v2848_v2 }
 0x526   : > { %v2938_v55 = vpack.c.bf16 %v2916_v50, %v2914_v3  ;;  %v2909_v42 = vsub.f32 %v2877_v57, %v2845_v61  ;;  %v2842_v51 = vmul.f32 %v5446_v8, %v2731_v20  ;;  %v2910_v58 = vsub.f32 %v2878_v24, %v2846_v17  ;;  %v3999_v8 = vld [vmem:[%s5713_s3] sm:$0xff]   ;;  %v2996_v61 = vpop.permute.xlu1 %2995 }
 0x527   : > { %3109 = vmatpush1.bf16.msra.mxu0 %v2942_v31  ;;  %v2937_v25 = vpack.c.bf16 %v2913_v30, %v2911_v44  ;;  %v2907_v53 = vsub.f32 %v2875_v37, %v2843_v47  ;;  %v2908_v39 = vsub.f32 %v2876_v5, %v2844_v46 }
 0x528   : > { %3110 = vmatprep.subr.bf16.mxu0 %v2941_v29  ;;  %v2936_v19 = vpack.c.bf16 %v2912_v62, %v2910_v58  ;;  %v2906_v48 = vsub.f32 %v2874_v21, %v2842_v51  ;;  %v2991_v29 = vpop.permute.xlu0 %2990 }
 0x529   : > { %v2935_v7 = vpack.c.bf16 %v2909_v42, %v2907_v53 }
 0x52a   : > { %v2934_v22 = vpack.c.bf16 %v2908_v39, %v2906_v48  ;;  %v3006_v58 = vpop.permute.xlu1 %3005 }
 0x52b   : > { %3111 = vmatpush1.bf16.msra.mxu0 %v2940_v45 }
 0x52c   : > { %3112 = vmatprep.subr.bf16.mxu0 %v2939_v10  ;;  %v3001_v47 = vpop.permute.xlu0 %3000 }
 0x52f   : > { %3113 = vmatpush1.bf16.msra.mxu0 %v2938_v55 }
 0x530   : > { %3114 = vmatprep.subr.bf16.mxu0 %v2937_v25 }
 0x533   : > { %3115 = vmatpush1.bf16.msra.mxu0 %v2936_v19 }
 0x534   : > { %3116 = vmatprep.subr.bf16.mxu0 %v2935_v7 }
 0x537   : > { %3117 = vmatpush1.bf16.msra.mxu0 %v2934_v22 }
 0x538   : > { %3118 = vmatprep.subr.bf16.mxu0 %v5479_v35  ;;  %v4004_v35 = vld [vmem:[%s5713_s3 + $0x28] sm:$0xff]  }
 0x53b   : > { %3119 = vmatpush1.bf16.msra.mxu0 %v5475_v49  ;;  %v4003_v49 = vld [vmem:[%s5713_s3 + $0x20] sm:$0xff]  }
 0x53c   : > { %3120 = vmatprep.subr.bf16.mxu0 %v5461_v43  ;;  %v4001_v43 = vld [vmem:[%s5713_s3 + $0x10] sm:$0xff]  }
 0x53f   : > { %3121 = vmatpush1.bf16.msra.mxu0 %v5458_v38  ;;  %v4002_v38 = vld [vmem:[%s5713_s3 + $0x18] sm:$0xff]  }
 0x542   : > { %3139 = vmatmul.mubr.bf16.vlgmr.msra.gmra.mxu0 %v3999_v8 }
 0x543   : > { %3148 = vmatprep.mubr.bf16.mxu0 %v5833_v26 }
 0x54a   : > { %3149 = vmatmul.mubr.bf16.gmra.mxu0 %v4000_v14  ;;  %v3011_v14 = vpop.permute.xlu0 %3010 }
 0x54b   : > { %3158 = vmatprep.mubr.bf16.mxu0 %v5833_v26 }
 0x552   : > { %3159 = vmatmul.mubr.bf16.gmra.mxu0 %v4001_v43 }
 0x553   : > { %3168 = vmatprep.mubr.bf16.mxu0 %v5833_v26 }
 0x55a   : > { %3169 = vmatmul.mubr.bf16.gmra.mxu0 %v4002_v38 }
 0x55b   : > { %3178 = vmatprep.mubr.bf16.mxu0 %v5833_v26 }
 0x562   : > { %3179 = vmatmul.mubr.bf16.gmra.mxu0 %v4003_v49 }
 0x563   : > { %3188 = vmatprep.mubr.bf16.mxu0 %v5833_v26 }
 0x56a   : > { %3189 = vmatmul.mubr.bf16.gmra.mxu0 %v4004_v35 }
 0x56b   : > { %3198 = vmatprep.mubr.bf16.mxu0 %v5833_v26 }
 0x572   : > { %3199 = vmatmul.mubr.bf16.gmra.mxu0 %v4005_v28 }
 0x573   : > { %3208 = vmatprep.mubr.bf16.mxu0 %v5833_v26 }
 0x57a   : > { %3209 = vmatmul.mubr.bf16.gmra.mxu0 %v4006_v9 }
 0x602   : > { %v3140_v32 = vpop.f32.mrf.mxu0 }
 0x603   : > { %v3141_v40 = vadd.f32 %v3140_v32, %v2981_v23 }
 0x604   : > { %v3142_v36 = vpop.f32.mrf.mxu0 }
 0x605   : > { %v3143_v54 = vadd.f32 %v3142_v36, %v2981_v23  ;;  %v3284_v60 = vmul.f32 %v3141_v40, %v3141_v40 }
 0x606   : > { %v3144_v26 = vpop.f32.mrf.mxu0 }
 0x607   : > { %v3285_v16 = vmul.f32 %v3143_v54, %v3143_v54  ;;  %v3800_v0 = vpack.c.bf16 %v3143_v54, %v3141_v40  ;;  %v3145_v31 = vadd.f32 %v3144_v26, %v2986_v52  ;;  %v3219_v1 = vadd.f32 %v3143_v54, %v3141_v40  ;;  %v3016_v54 = vpop.permute.xlu1 %3015 }
 0x608   : > { %v3146_v63 = vpop.f32.mrf.mxu0 }
 0x609   : > { %3476 = vst [vmem:[%s5613_s19] sm:$0xff] %v3800_v0  ;;  %v3147_v34 = vadd.f32 %v3146_v63, %v2986_v52  ;;  %3220 = vadd.xlane.f32.xlu0 %v3219_v1  ;;  %v3316_v33 = vadd.f32 %v3285_v16, %v3284_v60  ;;  %v3286_v27 = vmul.f32 %v3145_v31, %v3145_v31 }
 0x60a   : > { %v3150_v6 = vpop.f32.mrf.mxu0 }
 0x60b   : > { %v3287_v59 = vmul.f32 %v3147_v34, %v3147_v34  ;;  %v3801_v13 = vpack.c.bf16 %v3147_v34, %v3145_v31  ;;  %v3151_v41 = vadd.f32 %v3150_v6, %v2991_v29  ;;  %3317 = vadd.xlane.f32.xlu1 %v3316_v33  ;;  %v3222_v18 = vadd.f32 %v3147_v34, %v3145_v31  ;;  %v3021_v34 = vpop.permute.xlu0 %3020 }
 0x60c   : > { %v3152_v12 = vpop.f32.mrf.mxu0 }
 0x60d   : > { %3477 = vst [vmem:[%s5613_s19 + $0x8] sm:$0xff] %v3801_v13  ;;  %v3153_v56 = vadd.f32 %v3152_v12, %v2991_v29  ;;  %v3319_v11 = vadd.f32 %v3287_v59, %v3286_v27  ;;  %v3288_v2 = vmul.f32 %v3151_v41, %v3151_v41 }
 0x60e   : > { %v3154_v15 = vpop.f32.mrf.mxu0 }
 0x60f   : > { %v3289_v50 = vmul.f32 %v3153_v56, %v3153_v56  ;;  %v3802_v45 = vpack.c.bf16 %v3153_v56, %v3151_v41  ;;  %3223 = vadd.xlane.f32.xlu1 %v3222_v18  ;;  %3320 = vadd.xlane.f32.xlu0 %v3319_v11  ;;  %v3155_v30 = vadd.f32 %v3154_v15, %v2996_v61  ;;  %v3026_v11 = vpop.permute.xlu1 %3025 }
 0x610   : > { %v3156_v4 = vpop.f32.mrf.mxu0  ;;  %v3225_v57 = vadd.f32 %v3153_v56, %v3151_v41 }
 0x611   : > { %3478 = vst [vmem:[%s5613_s19 + $0x10] sm:$0xff] %v3802_v45  ;;  %v3157_v10 = vadd.f32 %v3156_v4, %v2996_v61  ;;  %v3322_v20 = vadd.f32 %v3289_v50, %v3288_v2  ;;  %v3290_v5 = vmul.f32 %v3155_v30, %v3155_v30 }
 0x612   : > { %v3160_v17 = vpop.f32.mrf.mxu0 }
 0x613   : > { %v3803_v3 = vpack.c.bf16 %v3157_v10, %v3155_v30  ;;  %3323 = vadd.xlane.f32.xlu1 %v3322_v20  ;;  %3226 = vadd.xlane.f32.xlu0 %v3225_v57  ;;  %v3291_v44 = vmul.f32 %v3157_v10, %v3157_v10  ;;  %v3161_v37 = vadd.f32 %v3160_v17, %v3001_v47  ;;  %v3031_v20 = vpop.permute.xlu0 %3030 }
 0x614   : > { %v3162_v24 = vpop.f32.mrf.mxu0  ;;  %v3228_v62 = vadd.f32 %v3157_v10, %v3155_v30 }
 0x615   : > { %3479 = vst [vmem:[%s5613_s19 + $0x18] sm:$0xff] %v3803_v3  ;;  %v3163_v46 = vadd.f32 %v3162_v24, %v3001_v47  ;;  %v3292_v53 = vmul.f32 %v3161_v37, %v3161_v37  ;;  %v3325_v7 = vadd.f32 %v3291_v44, %v3290_v5  ;;  %v3036_v5 = vpop.permute.xlu1 %3035 }
 0x616   : > { %v3164_v55 = vpop.f32.mrf.mxu0 }
 0x617   : > { %v3293_v42 = vmul.f32 %v3163_v46, %v3163_v46  ;;  %v3804_v25 = vpack.c.bf16 %v3163_v46, %v3161_v37  ;;  %3229 = vadd.xlane.f32.xlu0 %v3228_v62  ;;  %v3231_v51 = vadd.f32 %v3163_v46, %v3161_v37  ;;  %v3165_v39 = vadd.f32 %v3164_v55, %v3006_v58 }
 0x618   : > { %v3166_v21 = vpop.f32.mrf.mxu0 }
 0x619   : > { %3480 = vst [vmem:[%s5613_s19 + $0x20] sm:$0xff] %v3804_v25  ;;  %v3167_v19 = vadd.f32 %v3166_v21, %v3006_v58  ;;  %3232 = vadd.xlane.f32.xlu1 %v3231_v51  ;;  %v3328_v8 = vadd.f32 %v3293_v42, %v3292_v53  ;;  %v3294_v23 = vmul.f32 %v3165_v39, %v3165_v39 }
 0x61a   : > { %v3170_v48 = vpop.f32.mrf.mxu0 }
 0x61b   : > { %v3805_v22 = vpack.c.bf16 %v3167_v19, %v3165_v39  ;;  %3326 = vadd.xlane.f32.xlu0 %v3325_v7  ;;  %v3295_v38 = vmul.f32 %v3167_v19, %v3167_v19  ;;  %v3171_v49 = vadd.f32 %v3170_v48, %v3011_v14  ;;  %v3234_v28 = vadd.f32 %v3167_v19, %v3165_v39  ;;  %v3041_v7 = vpop.permute.xlu0 %3040 }
 0x61c   : > { %v3172_v43 = vpop.f32.mrf.mxu0 }
 0x61d   : > { %3481 = vst [vmem:[%s5613_s19 + $0x28] sm:$0xff] %v3805_v22  ;;  %v3173_v35 = vadd.f32 %v3172_v43, %v3011_v14  ;;  %3329 = vadd.xlane.f32.xlu1 %v3328_v8  ;;  %v3296_v60 = vmul.f32 %v3171_v49, %v3171_v49  ;;  %v3331_v0 = vadd.f32 %v3295_v38, %v3294_v23  ;;  %v3046_v23 = vpop.permute.xlu1 %3045 }
 0x61e   : > { %v3174_v9 = vpop.f32.mrf.mxu0 }
 0x61f   : > { %v3297_v32 = vmul.f32 %v3173_v35, %v3173_v35  ;;  %v3806_v40 = vpack.c.bf16 %v3173_v35, %v3171_v49  ;;  %3235 = vadd.xlane.f32.xlu0 %v3234_v28  ;;  %v3237_v36 = vadd.f32 %v3173_v35, %v3171_v49  ;;  %v3175_v26 = vadd.f32 %v3174_v9, %v3016_v54 }
 0x620   : > { %v3176_v52 = vpop.f32.mrf.mxu0 }
 0x621   : > { %3482 = vst [vmem:[%s5613_s19 + $0x30] sm:$0xff] %v3806_v40  ;;  %v3177_v16 = vadd.f32 %v3176_v52, %v3016_v54  ;;  %3238 = vadd.xlane.f32.xlu1 %v3237_v36  ;;  %v3334_v63 = vadd.f32 %v3297_v32, %v3296_v60  ;;  %v3298_v41 = vmul.f32 %v3175_v26, %v3175_v26 }
 0x622   : > { %v3180_v31 = vpop.f32.mrf.mxu0 }
 0x623   : > { %v3807_v1 = vpack.c.bf16 %v3177_v16, %v3175_v26  ;;  %3332 = vadd.xlane.f32.xlu0 %v3331_v0  ;;  %v3299_v29 = vmul.f32 %v3177_v16, %v3177_v16  ;;  %v3181_v6 = vadd.f32 %v3180_v31, %v3021_v34  ;;  %v3240_v59 = vadd.f32 %v3177_v16, %v3175_v26  ;;  %v3051_v0 = vpop.permute.xlu0 %3050 }
 0x624   : > { %v3182_v33 = vpop.f32.mrf.mxu0 }
 0x625   : > { %3483 = vst [vmem:[%s5613_s19 + $0x38] sm:$0xff] %v3807_v1  ;;  %v3183_v27 = vadd.f32 %v3182_v33, %v3021_v34  ;;  %3335 = vadd.xlane.f32.xlu1 %v3334_v63  ;;  %v3300_v2 = vmul.f32 %v3181_v6, %v3181_v6  ;;  %v3337_v61 = vadd.f32 %v3299_v29, %v3298_v41  ;;  %v3056_v41 = vpop.permute.xlu1 %3055 }
 0x626   : > { %v3184_v13 = vpop.f32.mrf.mxu0 }
 0x627   : > { %v3301_v12 = vmul.f32 %v3183_v27, %v3183_v27  ;;  %v3808_v56 = vpack.c.bf16 %v3183_v27, %v3181_v6  ;;  %3241 = vadd.xlane.f32.xlu0 %v3240_v59  ;;  %v3243_v18 = vadd.f32 %v3183_v27, %v3181_v6  ;;  %v3185_v50 = vadd.f32 %v3184_v13, %v3026_v11 }
 0x628   : > { %v3186_v15 = vpop.f32.mrf.mxu0 }
 0x629   : > { %3484 = vst [vmem:[%s5613_s19 + $0x40] sm:$0xff] %v3808_v56  ;;  %v3187_v45 = vadd.f32 %v3186_v15, %v3026_v11  ;;  %3244 = vadd.xlane.f32.xlu1 %v3243_v18  ;;  %v3340_v10 = vadd.f32 %v3301_v12, %v3300_v2  ;;  %v3302_v37 = vmul.f32 %v3185_v50, %v3185_v50 }
 0x62a   : > { %v3190_v4 = vpop.f32.mrf.mxu0 }
 0x62b   : > { %v3809_v30 = vpack.c.bf16 %v3187_v45, %v3185_v50  ;;  %3338 = vadd.xlane.f32.xlu0 %v3337_v61  ;;  %v3303_v17 = vmul.f32 %v3187_v45, %v3187_v45  ;;  %v3191_v3 = vadd.f32 %v3190_v4, %v3031_v20  ;;  %v3246_v24 = vadd.f32 %v3187_v45, %v3185_v50 }
 0x62c   : > { %v3192_v57 = vpop.f32.mrf.mxu0 }
 0x62d   : > { %3485 = vst [vmem:[%s5613_s19 + $0x48] sm:$0xff] %v3809_v30  ;;  %v3193_v47 = vadd.f32 %v3192_v57, %v3031_v20  ;;  %3341 = vadd.xlane.f32.xlu1 %v3340_v10  ;;  %v3304_v25 = vmul.f32 %v3191_v3, %v3191_v3  ;;  %v3343_v21 = vadd.f32 %v3303_v17, %v3302_v37 }
 0x62e   : > { %v3194_v44 = vpop.f32.mrf.mxu0 }
 0x62f   : > { %v3305_v46 = vmul.f32 %v3193_v47, %v3193_v47  ;;  %v3810_v62 = vpack.c.bf16 %v3193_v47, %v3191_v3  ;;  %3247 = vadd.xlane.f32.xlu0 %v3246_v24  ;;  %v3249_v55 = vadd.f32 %v3193_v47, %v3191_v3  ;;  %v3195_v51 = vadd.f32 %v3194_v44, %v3036_v5 }
 0x630   : > { %v3196_v42 = vpop.f32.mrf.mxu0 }
 0x631   : > { %3486 = vst [vmem:[%s5613_s19 + $0x50] sm:$0xff] %v3810_v62  ;;  %v3197_v58 = vadd.f32 %v3196_v42, %v3036_v5  ;;  %3250 = vadd.xlane.f32.xlu1 %v3249_v55  ;;  %v3346_v19 = vadd.f32 %v3305_v46, %v3304_v25  ;;  %v3306_v49 = vmul.f32 %v3195_v51, %v3195_v51 }
 0x632   : > { %v3200_v53 = vpop.f32.mrf.mxu0 }
 0x633   : > { %v3811_v39 = vpack.c.bf16 %v3197_v58, %v3195_v51  ;;  %3344 = vadd.xlane.f32.xlu0 %v3343_v21  ;;  %v3307_v22 = vmul.f32 %v3197_v58, %v3197_v58  ;;  %v3201_v8 = vadd.f32 %v3200_v53, %v3041_v7  ;;  %v3252_v43 = vadd.f32 %v3197_v58, %v3195_v51 }
 0x634   : > { %v3202_v48 = vpop.f32.mrf.mxu0 }
 0x635   : > { %3487 = vst [vmem:[%s5613_s19 + $0x58] sm:$0xff] %v3811_v39  ;;  %v3203_v14 = vadd.f32 %v3202_v48, %v3041_v7  ;;  %3347 = vadd.xlane.f32.xlu1 %v3346_v19  ;;  %v3308_v40 = vmul.f32 %v3201_v8, %v3201_v8  ;;  %v3349_v52 = vadd.f32 %v3307_v22, %v3306_v49 }
 0x636   : > { %v3204_v38 = vpop.f32.mrf.mxu0 }
 0x637   : > { %v3309_v35 = vmul.f32 %v3203_v14, %v3203_v14  ;;  %v3812_v28 = vpack.c.bf16 %v3203_v14, %v3201_v8  ;;  %3253 = vadd.xlane.f32.xlu0 %v3252_v43  ;;  %v3255_v9 = vadd.f32 %v3203_v14, %v3201_v8  ;;  %v3205_v36 = vadd.f32 %v3204_v38, %v3046_v23 }
 0x638   : > { %v3206_v32 = vpop.f32.mrf.mxu0 }
 0x639   : > { %3488 = vst [vmem:[%s5613_s19 + $0x60] sm:$0xff] %v3812_v28  ;;  %v3207_v54 = vadd.f32 %v3206_v32, %v3046_v23  ;;  %3256 = vadd.xlane.f32.xlu1 %v3255_v9  ;;  %v3352_v16 = vadd.f32 %v3309_v35, %v3308_v40  ;;  %v3310_v6 = vmul.f32 %v3205_v36, %v3205_v36 }
 0x63a   : > { %v3210_v60 = vpop.f32.mrf.mxu0 }
 0x63b   : > { %v3813_v26 = vpack.c.bf16 %v3207_v54, %v3205_v36  ;;  %3350 = vadd.xlane.f32.xlu0 %v3349_v52  ;;  %v3311_v1 = vmul.f32 %v3207_v54, %v3207_v54  ;;  %v3211_v63 = vadd.f32 %v3210_v60, %v3051_v0  ;;  %v3258_v33 = vadd.f32 %v3207_v54, %v3205_v36 }
 0x63c   : > { %v3212_v31 = vpop.f32.mrf.mxu0 }
 0x63d   : > { %3489 = vst [vmem:[%s5613_s19 + $0x68] sm:$0xff] %v3813_v26  ;;  %v3213_v34 = vadd.f32 %v3212_v31, %v3051_v0  ;;  %3353 = vadd.xlane.f32.xlu1 %v3352_v16  ;;  %v3312_v56 = vmul.f32 %v3211_v63, %v3211_v63  ;;  %v3355_v15 = vadd.f32 %v3311_v1, %v3310_v6 }
 0x63e   : > { %v3214_v29 = vpop.f32.mrf.mxu0 }
 0x63f   : > { %v3313_v27 = vmul.f32 %v3213_v34, %v3213_v34  ;;  %v3814_v59 = vpack.c.bf16 %v3213_v34, %v3211_v63  ;;  %3259 = vadd.xlane.f32.xlu0 %v3258_v33  ;;  %v3261_v13 = vadd.f32 %v3213_v34, %v3211_v63  ;;  %v3215_v18 = vadd.f32 %v3214_v29, %v3056_v41 }
 0x640   : > { %v3216_v12 = vpop.f32.mrf.mxu0 }
 0x641   : > { %3490 = vst [vmem:[%s5613_s19 + $0x70] sm:$0xff] %v3814_v59  ;;  %v3217_v11 = vadd.f32 %v3216_v12, %v3056_v41  ;;  %3262 = vadd.xlane.f32.xlu1 %v3261_v13  ;;  %v3358_v50 = vadd.f32 %v3313_v27, %v3312_v56  ;;  %v3314_v4 = vmul.f32 %v3215_v18, %v3215_v18 }
 0x643   : > { %v3815_v2 = vpack.c.bf16 %v3217_v11, %v3215_v18  ;;  %3356 = vadd.xlane.f32.xlu0 %v3355_v15  ;;  %v3315_v45 = vmul.f32 %v3217_v11, %v3217_v11  ;;  %v3264_v61 = vadd.f32 %v3217_v11, %v3215_v18 }
 0x645   : > { %3491 = vst [vmem:[%s5613_s19 + $0x78] sm:$0xff] %v3815_v2  ;;  %3359 = vadd.xlane.f32.xlu1 %v3358_v50  ;;  %v3361_v30 = vadd.f32 %v3315_v45, %v3314_v4 }
 0x647   : > { %3265 = vadd.xlane.f32.xlu0 %v3264_v61 }
 0x64b   : > { %3362 = vadd.xlane.f32.xlu0 %v3361_v30 }
 0x692   : > { %v3221_v10 = vpop.xlane.xlu0 %3220 }
 0x693   : > { %3268 = vst.msk [vmem:[%s5635_s21] sm:$0xff] %vm3267_vm2, %v3221_v10 }
 0x694   : > { %v3318_v20 = vpop.xlane.xlu1 %3317 }
 0x695   : > { %3364 = vst.msk [vmem:[%s5641_s23] sm:$0xff] %vm3267_vm2, %v3318_v20 }
 0x698   : > { %v3224_v57 = vpop.xlane.xlu1 %3223  ;;  %v3321_v17 = vpop.xlane.xlu0 %3320 }
 0x699   : > { %3269 = vst.msk [vmem:[%s5635_s21 + $0x8] sm:$0xff] %vm3267_vm2, %v3224_v57  ;;  %3365 = vst.msk [vmem:[%s5641_s23 + $0x8] sm:$0xff] %vm3267_vm2, %v3321_v17 }
 0x69c   : > { %v3324_v3 = vpop.xlane.xlu1 %3323  ;;  %v3227_v47 = vpop.xlane.xlu0 %3226 }
 0x69d   : > { %3366 = vst.msk [vmem:[%s5641_s23 + $0x10] sm:$0xff] %vm3267_vm2, %v3324_v3  ;;  %3270 = vst.msk [vmem:[%s5635_s21 + $0x10] sm:$0xff] %vm3267_vm2, %v3227_v47 }
 0x6a0   : > { %v3230_v24 = vpop.xlane.xlu0 %3229 }
 0x6a1   : > { %3271 = vst.msk [vmem:[%s5635_s21 + $0x18] sm:$0xff] %vm3267_vm2, %v3230_v24 }
 0x6a2   : > { %v3233_v44 = vpop.xlane.xlu1 %3232 }
 0x6a3   : > { %3272 = vst.msk [vmem:[%s5635_s21 + $0x20] sm:$0xff] %vm3267_vm2, %v3233_v44 }
 0x6a4   : > { %v3327_v37 = vpop.xlane.xlu0 %3326 }
 0x6a5   : > { %3367 = vst.msk [vmem:[%s5641_s23 + $0x18] sm:$0xff] %vm3267_vm2, %v3327_v37 }
 0x6a6   : > { %v3330_v46 = vpop.xlane.xlu1 %3329 }
 0x6a7   : > { %3368 = vst.msk [vmem:[%s5641_s23 + $0x20] sm:$0xff] %vm3267_vm2, %v3330_v46 }
 0x6a8   : > { %v3236_v62 = vpop.xlane.xlu0 %3235 }
 0x6a9   : > { %3273 = vst.msk [vmem:[%s5635_s21 + $0x28] sm:$0xff] %vm3267_vm2, %v3236_v62 }
 0x6aa   : > { %v3239_v55 = vpop.xlane.xlu1 %3238 }
 0x6ab   : > { %3274 = vst.msk [vmem:[%s5635_s21 + $0x30] sm:$0xff] %vm3267_vm2, %v3239_v55 }
 0x6ac   : > { %v3333_v5 = vpop.xlane.xlu0 %3332 }
 0x6ad   : > { %3369 = vst.msk [vmem:[%s5641_s23 + $0x28] sm:$0xff] %vm3267_vm2, %v3333_v5 }
 0x6ae   : > { %v3336_v42 = vpop.xlane.xlu1 %3335 }
 0x6af   : > { %3370 = vst.msk [vmem:[%s5641_s23 + $0x30] sm:$0xff] %vm3267_vm2, %v3336_v42 }
 0x6b0   : > { %v3242_v25 = vpop.xlane.xlu0 %3241 }
 0x6b1   : > { %3275 = vst.msk [vmem:[%s5635_s21 + $0x38] sm:$0xff] %vm3267_vm2, %v3242_v25 }
 0x6b2   : > { %v3245_v51 = vpop.xlane.xlu1 %3244 }
 0x6b3   : > { %3276 = vst.msk [vmem:[%s5635_s21 + $0x40] sm:$0xff] %vm3267_vm2, %v3245_v51 }
 0x6b4   : > { %v3339_v58 = vpop.xlane.xlu0 %3338 }
 0x6b5   : > { %3371 = vst.msk [vmem:[%s5641_s23 + $0x38] sm:$0xff] %vm3267_vm2, %v3339_v58 }
 0x6b6   : > { %v3342_v21 = vpop.xlane.xlu1 %3341 }
 0x6b7   : > { %3372 = vst.msk [vmem:[%s5641_s23 + $0x40] sm:$0xff] %vm3267_vm2, %v3342_v21 }
 0x6b8   : > { %v3248_v53 = vpop.xlane.xlu0 %3247 }
 0x6b9   : > { %3277 = vst.msk [vmem:[%s5635_s21 + $0x48] sm:$0xff] %vm3267_vm2, %v3248_v53 }
 0x6ba   : > { %v3251_v39 = vpop.xlane.xlu1 %3250 }
 0x6bb   : > { %3278 = vst.msk [vmem:[%s5635_s21 + $0x50] sm:$0xff] %vm3267_vm2, %v3251_v39 }
 0x6bc   : > { %v3345_v19 = vpop.xlane.xlu0 %3344 }
 0x6bd   : > { %3373 = vst.msk [vmem:[%s5641_s23 + $0x48] sm:$0xff] %vm3267_vm2, %v3345_v19 }
 0x6be   : > { %v3348_v7 = vpop.xlane.xlu1 %3347 }
 0x6bf   : > { %3374 = vst.msk [vmem:[%s5641_s23 + $0x50] sm:$0xff] %vm3267_vm2, %v3348_v7 }
 0x6c0   : > { %v3254_v48 = vpop.xlane.xlu0 %3253 }
 0x6c1   : > { %3279 = vst.msk [vmem:[%s5635_s21 + $0x58] sm:$0xff] %vm3267_vm2, %v3254_v48 }
 0x6c2   : > { %v3257_v22 = vpop.xlane.xlu1 %3256 }
 0x6c3   : > { %3280 = vst.msk [vmem:[%s5635_s21 + $0x60] sm:$0xff] %vm3267_vm2, %v3257_v22 }
 0x6c4   : > { %v3351_v8 = vpop.xlane.xlu0 %3350 }
 0x6c5   : > { %3375 = vst.msk [vmem:[%s5641_s23 + $0x58] sm:$0xff] %vm3267_vm2, %v3351_v8 }
 0x6c6   : > { %v3354_v14 = vpop.xlane.xlu1 %3353 }
 0x6c7   : > { %3376 = vst.msk [vmem:[%s5641_s23 + $0x60] sm:$0xff] %vm3267_vm2, %v3354_v14 }
 0x6c8   : > { %v3260_v43 = vpop.xlane.xlu0 %3259 }
 0x6c9   : > { %3281 = vst.msk [vmem:[%s5635_s21 + $0x68] sm:$0xff] %vm3267_vm2, %v3260_v43 }
 0x6ca   : > { %v3263_v38 = vpop.xlane.xlu1 %3262 }
 0x6cb   : > { %3282 = vst.msk [vmem:[%s5635_s21 + $0x70] sm:$0xff] %vm3267_vm2, %v3263_v38 }
 0x6cc   : > { %v3357_v49 = vpop.xlane.xlu0 %3356 }
 0x6cd   : > { %3377 = vst.msk [vmem:[%s5641_s23 + $0x68] sm:$0xff] %vm3267_vm2, %v3357_v49 }
 0x6ce   : > { %v3360_v35 = vpop.xlane.xlu1 %3359 }
 0x6cf   : > { %3378 = vst.msk [vmem:[%s5641_s23 + $0x70] sm:$0xff] %vm3267_vm2, %v3360_v35 }
 0x6d0   : > { %v3266_v28 = vpop.xlane.xlu0 %3265 }
 0x6d1   : > { %3283 = vst.msk [vmem:[%s5635_s21 + $0x78] sm:$0xff] %vm3267_vm2, %v3266_v28 }
 0x6d4   : > { %v3363_v9 = vpop.xlane.xlu0 %3362 }
 0x6d5   : > { %3379 = vst.msk [vmem:[%s5641_s23 + $0x78] sm:$0xff] %vm3267_vm2, %v3363_v9 }
 0x6d6 PF: > { %s18_s24 = sadd.s32 1, %s4208_s24  }
 0x6d7   : > { %p15_p4 = scmp.ge.s32.totalorder %s18_s24, 4  }
 0x6d9   :  { %17 = sbr.rel (!%p15_p4) target bundleno = 1 (0x1), region = 94 }

</bundles_post_ra>
